<compile_context>
chip_gen: v5e
topology: v5e:2x2
jax: 0.10.0
libtpu: 0.0.40
codegen_flags: <defaults>
</compile_context>

<pallas_src>
import jax
import jax.numpy as jnp
from jax.experimental import pallas as pl
from jax.experimental.pallas import tpu as pltpu  # noqa: F401  (TPU backend)

# ---- model hyper-parameters (TabAttention defaults at small size) ----------
CATEGORIES = (5, 6, 7)          # 3 categorical features
NUM_CONT = 2                    # 2 continuous features
DIM = 32                        # token embedding dim
DEPTH = 2
HEADS = 8
DIM_HEAD = 16
INNER = HEADS * DIM_HEAD        # 128
FF_MULT = 4
FF_HID = FF_MULT * DIM          # 128
DIM_OUT = 1
LN_EPS = 1e-5
SCALE = DIM_HEAD ** -0.5

NFEATS = len(CATEGORIES) + NUM_CONT          # 5 tokens through attention
INPUT_SIZE = DIM * NFEATS                    # 160
MLP_L = INPUT_SIZE // 8                      # 20
MLP_DIMS = [INPUT_SIZE, MLP_L * 4, MLP_L * 2, DIM_OUT]   # [160, 80, 40, 1]


# ---------------------------------------------------------------------------
# Kernel helpers (run inside Pallas)
# ---------------------------------------------------------------------------
def _layernorm(x, gamma, beta):
    # PyTorch nn.LayerNorm over the last dim (biased variance, eps=1e-5)
    mu = jnp.mean(x, axis=-1, keepdims=True)
    var = jnp.mean((x - mu) ** 2, axis=-1, keepdims=True)
    return (x - mu) * jax.lax.rsqrt(var + LN_EPS) * gamma + beta


def _gelu_exact(x):
    # F.gelu default = exact (erf-based) gelu
    return 0.5 * x * (1.0 + jax.lax.erf(x * 0.7071067811865476))


# ---------------------------------------------------------------------------
# Single fused Pallas kernel: DEPTH transformer layers + MLP head
#   activations are token-major:  row index r = t*B + b  (t=token, b=batch)
# ---------------------------------------------------------------------------
def fused_forward_kernel(x_ref, wqkv_ref, wo_ref, w1_ref, w2_ref, vecs_ref,
                         b1_ref, hw1_ref, hb1_ref, hw2_ref, hb2_ref,
                         hw3_ref, hb3_ref, o_ref):
    x = x_ref[...]                               # (NFEATS*B, DIM)  f32
    nb = x.shape[0]
    bsz = nb // NFEATS

    # block-diagonal attention mask: batch id of row r is r % B
    row = jax.lax.broadcasted_iota(jnp.int32, (nb, nb), 0)
    col = jax.lax.broadcasted_iota(jnp.int32, (nb, nb), 1)
    same_batch = (row % bsz) == (col % bsz)
    neg_inf = jnp.float32(-1e30)

    for l in range(DEPTH):                       # static unroll (DEPTH = 2)
        vecs = vecs_ref[l]                       # (6, DIM) packed row-vectors
        ln1_g, ln1_b = vecs[0:1], vecs[1:2]
        bo = vecs[2:3]
        ln2_g, ln2_b = vecs[3:4], vecs[4:5]
        b2 = vecs[5:6]

        # ----- PreNorm(Residual(Attention)): residual adds normed input -----
        y = _layernorm(x, ln1_g, ln1_b)
        qkv = jnp.dot(y, wqkv_ref[l], preferred_element_type=jnp.float32)
        q = qkv[:, :INNER]
        k = qkv[:, INNER:2 * INNER]
        v = qkv[:, 2 * INNER:]

        heads_out = []
        for h in range(HEADS):                   # static lane slices
            sl = slice(h * DIM_HEAD, (h + 1) * DIM_HEAD)
            sim = jax.lax.dot_general(
                q[:, sl], k[:, sl], (((1,), (1,)), ((), ())),
                preferred_element_type=jnp.float32) * SCALE
            sim = jnp.where(same_batch, sim, neg_inf)
            m = jnp.max(sim, axis=-1, keepdims=True)
            p = jnp.exp(sim - m)
            attn = p / jnp.sum(p, axis=-1, keepdims=True)
            heads_out.append(jnp.dot(attn, v[:, sl],
                                     preferred_element_type=jnp.float32))
        out = jnp.concatenate(heads_out, axis=-1)             # (nb, INNER)
        x = jnp.dot(out, wo_ref[l],
                    preferred_element_type=jnp.float32) + bo + y

        # ----- PreNorm(Residual(GEGLU FeedForward)) -----
        y2 = _layernorm(x, ln2_g, ln2_b)
        pre = jnp.dot(y2, w1_ref[l],
                      preferred_element_type=jnp.float32) + b1_ref[l]
        a = pre[:, :FF_HID]
        g = pre[:, FF_HID:]
        ff = jnp.dot(a * _gelu_exact(g), w2_ref[l],
                     preferred_element_type=jnp.float32) + b2
        x = ff + y2

    # ----- MLP head (3 linears, no activation: mlp_act=None) -----
    # flatten(x)[b] @ W1  ==  sum_t  x[t*B+b, :] @ W1[t*DIM:(t+1)*DIM, :]
    w1h = hw1_ref[...]                                          # (160, 80)
    acc = jnp.zeros((bsz, MLP_DIMS[1]), jnp.float32)
    for t in range(NFEATS):
        acc = acc + jnp.dot(x[t * bsz:(t + 1) * bsz, :],
                            w1h[t * DIM:(t + 1) * DIM, :],
                            preferred_element_type=jnp.float32)
    h1 = acc + hb1_ref[...]
    h2 = jnp.dot(h1, hw2_ref[...],
                 preferred_element_type=jnp.float32) + hb2_ref[...]
    o = jnp.dot(h2, hw3_ref[...],
                preferred_element_type=jnp.float32) + hb3_ref[...]
    o_ref[...] = o.astype(o_ref.dtype)


# ---------------------------------------------------------------------------
# Full TabAttention forward (col attention, MLP cont-embeddings path)
# ---------------------------------------------------------------------------
def tab_attention_forward(x_categ, x_cont, x_categ_enc, x_cont_enc,
                          packed, mlp_params):
    # x_categ / x_cont are unused in this branch of the PyTorch forward
    # (cont_embeddings == 'MLP'); kept in the signature for fidelity.
    del x_categ, x_cont
    B = x_categ_enc.shape[0]
    x = jnp.concatenate([x_categ_enc, x_cont_enc], axis=1)     # (B, n, dim)
    # token-major 2-D slab so batch folds into the matmul M dimension
    x2d = x.transpose(1, 0, 2).reshape(NFEATS * B, DIM)        # (n*B, dim)

    return pl.pallas_call(
        fused_forward_kernel,
        out_shape=jax.ShapeDtypeStruct((B, DIM_OUT), jnp.float32),
        # no grid: single invocation, everything (weights + activations)
        # resident in VMEM for the whole forward.
    )(x2d,
      packed['wqkv'], packed['wo'], packed['w1'], packed['w2'],
      packed['vecs'], packed['b1'],
      mlp_params['w1'], mlp_params['b1'],
      mlp_params['w2'], mlp_params['b2'],
      mlp_params['w3'], mlp_params['b3'])


# ---------------------------------------------------------------------------
# Deterministic parameter construction (synthetic, PyTorch-equivalent shapes)
# ---------------------------------------------------------------------------
def init_params(key):
    def nrm(k, shape, s=0.08):
        return jax.random.normal(k, shape, jnp.float32) * s

    layer_ref = []
    wqkv_l, wo_l, w1_l, w2_l, vecs_l, b1_l = [], [], [], [], [], []
    for _ in range(DEPTH):
        key, *ks = jax.random.split(key, 12)
        ln1_g = 1.0 + nrm(ks[0], (1, DIM), 0.02)
        ln1_b = nrm(ks[1], (1, DIM), 0.02)
        wqkv = nrm(ks[2], (DIM, 3 * INNER))          # to_qkv (no bias)
        wo_full = nrm(ks[3], (INNER, DIM))
        bo = nrm(ks[4], (1, DIM))
        ln2_g = 1.0 + nrm(ks[5], (1, DIM), 0.02)
        ln2_b = nrm(ks[6], (1, DIM), 0.02)
        w1_full = nrm(ks[7], (DIM, 2 * FF_HID))
        b1_full = nrm(ks[8], (1, 2 * FF_HID))
        w2 = nrm(ks[9], (FF_HID, DIM))
        b2 = nrm(ks[10], (1, DIM))

        wqkv_l.append(wqkv)
        wo_l.append(wo_full)
        w1_l.append(w1_full)
        w2_l.append(w2)
        vecs_l.append(jnp.concatenate([ln1_g, ln1_b, bo, ln2_g, ln2_b, b2],
                                      axis=0))                    # (6, DIM)
        b1_l.append(b1_full)                                       # (1, 256)

        layer_ref.append(dict(ln1_g=ln1_g, ln1_b=ln1_b, wqkv=wqkv,
                              wo_full=wo_full, bo=bo, ln2_g=ln2_g,
                              ln2_b=ln2_b, w1_full=w1_full, b1_full=b1_full,
                              w2=w2, b2=b2))

    packed = dict(
        wqkv=jnp.stack(wqkv_l),      # (DEPTH, 32, 384)
        wo=jnp.stack(wo_l),          # (DEPTH, 128, 32)
        w1=jnp.stack(w1_l),          # (DEPTH, 32, 256)
        w2=jnp.stack(w2_l),          # (DEPTH, 128, 32)
        vecs=jnp.stack(vecs_l),      # (DEPTH, 6, 32)
        b1=jnp.stack(b1_l),          # (DEPTH, 1, 256)
    )

    key, k1, k2, k3, k4, k5, k6 = jax.random.split(key, 7)
    mlp_params = dict(
        w1=nrm(k1, (MLP_DIMS[0], MLP_DIMS[1])), b1=nrm(k2, (1, MLP_DIMS[1])),
        w2=nrm(k3, (MLP_DIMS[1], MLP_DIMS[2])), b2=nrm(k4, (1, MLP_DIMS[2])),
        w3=nrm(k5, (MLP_DIMS[2], MLP_DIMS[3])), b3=nrm(k6, (1, MLP_DIMS[3])))
    return packed, layer_ref, mlp_params


# ---------------------------------------------------------------------------
# Plain-JAX reference (mirrors the PyTorch forward) for correctness check
# ---------------------------------------------------------------------------
def reference_forward(x_categ_enc, x_cont_enc, layer_ref, mp):
    def ln(x, g, b):
        mu = jnp.mean(x, -1, keepdims=True)
        var = jnp.mean((x - mu) ** 2, -1, keepdims=True)
        return (x - mu) / jnp.sqrt(var + LN_EPS) * g + b

    gelu = lambda t: 0.5 * t * (1.0 + jax.lax.erf(t * 0.7071067811865476))
    x = jnp.concatenate([x_categ_enc, x_cont_enc], axis=1)
    B, n, _ = x.shape
    for L in layer_ref:
        y = ln(x, L['ln1_g'], L['ln1_b'])
        qkv = y @ L['wqkv']
        q, k, v = jnp.split(qkv, 3, axis=-1)
        heads = lambda t: t.reshape(B, n, HEADS, DIM_HEAD).transpose(0, 2, 1, 3)
        q, k, v = heads(q), heads(k), heads(v)
        sim = jnp.einsum('bhid,bhjd->bhij', q, k) * SCALE
        attn = jax.nn.softmax(sim, axis=-1)
        out = jnp.einsum('bhij,bhjd->bhid', attn, v)
        out = out.transpose(0, 2, 1, 3).reshape(B, n, INNER)
        x = out @ L['wo_full'] + L['bo'][0] + y
        y2 = ln(x, L['ln2_g'], L['ln2_b'])
        h = y2 @ L['w1_full'] + L['b1_full'][0]
        a, g = jnp.split(h, 2, axis=-1)
        x = (a * gelu(g)) @ L['w2'] + L['b2'][0] + y2
    flat = x.reshape(B, -1)
    h = flat @ mp['w1'] + mp['b1'][0]
    h = h @ mp['w2'] + mp['b2'][0]
    return h @ mp['w3'] + mp['b3'][0]


if __name__ == "__main__":
    B = 2
    key = jax.random.PRNGKey(0)
    kp, k1, k2, k3, k4 = jax.random.split(key, 5)
    packed, layer_ref, mlp_params = init_params(kp)

    x_categ = jax.random.randint(k1, (B, len(CATEGORIES)), 0, min(CATEGORIES))
    x_cont = jax.random.normal(k2, (B, NUM_CONT), jnp.float32)
    x_categ_enc = jax.random.normal(k3, (B, len(CATEGORIES), DIM), jnp.float32)
    x_cont_enc = jax.random.normal(k4, (B, NUM_CONT, DIM), jnp.float32)

    out = tab_attention_forward(x_categ, x_cont, x_categ_enc, x_cont_enc,
                                packed, mlp_params)
    out = jax.block_until_ready(out)
    assert out.shape == (B, DIM_OUT)
    assert bool(jnp.all(jnp.isfinite(out)))

    with jax.default_matmul_precision("highest"):
        ref = reference_forward(x_categ_enc, x_cont_enc, layer_ref, mlp_params)
    # tightened tolerance vs. previous version (f32 accumulation throughout)
    assert jnp.allclose(out, ref, rtol=2e-3, atol=2e-4), (out, ref)

    print("KERNEL_OK")
</pallas_src>

<mosaic_0001>
module attributes {stable_mosaic.version = 11 : i64} {
  func.func @fused_forward_kernel(%arg0: memref<10x32xf32, #tpu.memory_space<vmem>>, %arg1: memref<2x32x384xf32, #tpu.memory_space<vmem>>, %arg2: memref<2x128x32xf32, #tpu.memory_space<vmem>>, %arg3: memref<2x32x256xf32, #tpu.memory_space<vmem>>, %arg4: memref<2x128x32xf32, #tpu.memory_space<vmem>>, %arg5: memref<2x6x32xf32, #tpu.memory_space<vmem>>, %arg6: memref<2x1x256xf32, #tpu.memory_space<vmem>>, %arg7: memref<160x80xf32, #tpu.memory_space<vmem>>, %arg8: memref<1x80xf32, #tpu.memory_space<vmem>>, %arg9: memref<80x40xf32, #tpu.memory_space<vmem>>, %arg10: memref<1x40xf32, #tpu.memory_space<vmem>>, %arg11: memref<40x1xf32, #tpu.memory_space<vmem>>, %arg12: memref<1x1xf32, #tpu.memory_space<vmem>>, %arg13: memref<2x1xf32, #tpu.memory_space<vmem>>) attributes {dimension_semantics = [], scalar_prefetch = 0 : i64, scratch_operands = 0 : i64, tpu.core_type = #tpu.core_type<tc>} {
    %c0 = arith.constant 0 : index
    %c0_0 = arith.constant 0 : index
    %0 = vector.load %arg0[%c0, %c0_0] : memref<10x32xf32, #tpu.memory_space<vmem>>, vector<10x32xf32>
    %1 = tpu.iota {dimensions = array<i32: 0>} : vector<10x10xi32>
    %2 = tpu.iota {dimensions = array<i32: 1>} : vector<10x10xi32>
    %c2_i32 = arith.constant 2 : i32
    %c0_i32 = arith.constant 0 : i32
    %3 = arith.cmpi eq, %c2_i32, %c0_i32 : i32
    %c1_i32 = arith.constant 1 : i32
    %4 = arith.select %3, %c1_i32, %c2_i32 : i32
    %5 = vector.broadcast %4 : i32 to vector<10x10xi32>
    %6 = arith.remsi %1, %5 : vector<10x10xi32>
    %c0_i32_1 = arith.constant 0 : i32
    %7 = vector.broadcast %c0_i32_1 : i32 to vector<10x10xi32>
    %8 = arith.cmpi ne, %6, %7 : vector<10x10xi32>
    %c0_i32_2 = arith.constant 0 : i32
    %9 = vector.broadcast %c0_i32_2 : i32 to vector<10x10xi32>
    %10 = arith.cmpi slt, %6, %9 : vector<10x10xi32>
    %c0_i32_3 = arith.constant 0 : i32
    %11 = arith.cmpi slt, %4, %c0_i32_3 : i32
    %12 = vector.broadcast %11 : i1 to vector<10x10xi1>
    %13 = vector.broadcast %12 : vector<10x10xi1> to vector<10x10xi1>
    %14 = arith.xori %10, %13 : vector<10x10xi1>
    %15 = arith.andi %14, %8 : vector<10x10xi1>
    %16 = vector.broadcast %4 : i32 to vector<10x10xi32>
    %17 = arith.addi %6, %16 : vector<10x10xi32>
    %18 = arith.select %15, %17, %6 : vector<10x10xi1>, vector<10x10xi32>
    %c2_i32_4 = arith.constant 2 : i32
    %c0_i32_5 = arith.constant 0 : i32
    %19 = arith.cmpi eq, %c2_i32_4, %c0_i32_5 : i32
    %c1_i32_6 = arith.constant 1 : i32
    %20 = arith.select %19, %c1_i32_6, %c2_i32_4 : i32
    %21 = vector.broadcast %20 : i32 to vector<10x10xi32>
    %22 = arith.remsi %2, %21 : vector<10x10xi32>
    %c0_i32_7 = arith.constant 0 : i32
    %23 = vector.broadcast %c0_i32_7 : i32 to vector<10x10xi32>
    %24 = arith.cmpi ne, %22, %23 : vector<10x10xi32>
    %c0_i32_8 = arith.constant 0 : i32
    %25 = vector.broadcast %c0_i32_8 : i32 to vector<10x10xi32>
    %26 = arith.cmpi slt, %22, %25 : vector<10x10xi32>
    %c0_i32_9 = arith.constant 0 : i32
    %27 = arith.cmpi slt, %20, %c0_i32_9 : i32
    %28 = vector.broadcast %27 : i1 to vector<10x10xi1>
    %29 = vector.broadcast %28 : vector<10x10xi1> to vector<10x10xi1>
    %30 = arith.xori %26, %29 : vector<10x10xi1>
    %31 = arith.andi %30, %24 : vector<10x10xi1>
    %32 = vector.broadcast %20 : i32 to vector<10x10xi32>
    %33 = arith.addi %22, %32 : vector<10x10xi32>
    %34 = arith.select %31, %33, %22 : vector<10x10xi1>, vector<10x10xi32>
    %35 = arith.cmpi eq, %18, %34 : vector<10x10xi32>
    %c0_10 = arith.constant 0 : index
    %c0_11 = arith.constant 0 : index
    %c0_12 = arith.constant 0 : index
    %36 = vector.load %arg5[%c0_10, %c0_11, %c0_12] : memref<2x6x32xf32, #tpu.memory_space<vmem>>, vector<1x6x32xf32>
    %37 = vector.shape_cast %36 : vector<1x6x32xf32> to vector<6x32xf32>
    %38 = vector.extract_strided_slice %37 {offsets = [0, 0], sizes = [1, 32], strides = [1, 1]} : vector<6x32xf32> to vector<1x32xf32>
    %39 = vector.extract_strided_slice %37 {offsets = [1, 0], sizes = [1, 32], strides = [1, 1]} : vector<6x32xf32> to vector<1x32xf32>
    %40 = vector.extract_strided_slice %37 {offsets = [2, 0], sizes = [1, 32], strides = [1, 1]} : vector<6x32xf32> to vector<1x32xf32>
    %41 = vector.extract_strided_slice %37 {offsets = [3, 0], sizes = [1, 32], strides = [1, 1]} : vector<6x32xf32> to vector<1x32xf32>
    %42 = vector.extract_strided_slice %37 {offsets = [4, 0], sizes = [1, 32], strides = [1, 1]} : vector<6x32xf32> to vector<1x32xf32>
    %43 = vector.extract_strided_slice %37 {offsets = [5, 0], sizes = [1, 32], strides = [1, 1]} : vector<6x32xf32> to vector<1x32xf32>
    %cst = arith.constant dense<0.000000e+00> : vector<10xf32>
    %44 = vector.multi_reduction <add>, %0, %cst [1] : vector<10x32xf32> to vector<10xf32>
    %45 = vector.shape_cast %44 : vector<10xf32> to vector<10x1xf32>
    %cst_13 = arith.constant 3.200000e+01 : f32
    %46 = vector.broadcast %cst_13 : f32 to vector<10x1xf32>
    %47 = arith.divf %45, %46 : vector<10x1xf32>
    %48 = vector.broadcast %47 : vector<10x1xf32> to vector<10x32xf32>
    %49 = arith.subf %0, %48 : vector<10x32xf32>
    %50 = arith.mulf %49, %49 : vector<10x32xf32>
    %cst_14 = arith.constant dense<0.000000e+00> : vector<10xf32>
    %51 = vector.multi_reduction <add>, %50, %cst_14 [1] : vector<10x32xf32> to vector<10xf32>
    %52 = vector.shape_cast %51 : vector<10xf32> to vector<10x1xf32>
    %cst_15 = arith.constant 3.200000e+01 : f32
    %53 = vector.broadcast %cst_15 : f32 to vector<10x1xf32>
    %54 = arith.divf %52, %53 : vector<10x1xf32>
    %55 = vector.broadcast %47 : vector<10x1xf32> to vector<10x32xf32>
    %56 = arith.subf %0, %55 : vector<10x32xf32>
    %cst_16 = arith.constant 9.99999974E-6 : f32
    %57 = vector.broadcast %cst_16 : f32 to vector<10x1xf32>
    %58 = arith.addf %54, %57 : vector<10x1xf32>
    %59 = math.rsqrt %58 : vector<10x1xf32>
    %60 = vector.broadcast %59 : vector<10x1xf32> to vector<10x32xf32>
    %61 = arith.mulf %56, %60 : vector<10x32xf32>
    %62 = vector.broadcast %38 : vector<1x32xf32> to vector<10x32xf32>
    %63 = arith.mulf %61, %62 : vector<10x32xf32>
    %64 = vector.broadcast %39 : vector<1x32xf32> to vector<10x32xf32>
    %65 = arith.addf %63, %64 : vector<10x32xf32>
    %c0_17 = arith.constant 0 : index
    %c0_18 = arith.constant 0 : index
    %c0_19 = arith.constant 0 : index
    %66 = vector.load %arg1[%c0_17, %c0_18, %c0_19] : memref<2x32x384xf32, #tpu.memory_space<vmem>>, vector<1x32x384xf32>
    %67 = vector.shape_cast %66 : vector<1x32x384xf32> to vector<32x384xf32>
    %cst_20 = arith.constant dense<0.000000e+00> : vector<10x384xf32>
    %68 = tpu.matmul %65, %67, %cst_20 {dimension_numbers = #tpu.dot_dimension_numbers<[1], [0], [0], [1], [0, 0, 1, 1], [], []>} : vector<10x32xf32>, vector<32x384xf32>, vector<10x384xf32> -> vector<10x384xf32>
    %69 = vector.extract_strided_slice %68 {offsets = [0, 0], sizes = [10, 128], strides = [1, 1]} : vector<10x384xf32> to vector<10x128xf32>
    %70 = vector.extract_strided_slice %68 {offsets = [0, 128], sizes = [10, 128], strides = [1, 1]} : vector<10x384xf32> to vector<10x128xf32>
    %71 = vector.extract_strided_slice %68 {offsets = [0, 256], sizes = [10, 128], strides = [1, 1]} : vector<10x384xf32> to vector<10x128xf32>
    %72 = vector.extract_strided_slice %69 {offsets = [0, 0], sizes = [10, 16], strides = [1, 1]} : vector<10x128xf32> to vector<10x16xf32>
    %73 = vector.extract_strided_slice %70 {offsets = [0, 0], sizes = [10, 16], strides = [1, 1]} : vector<10x128xf32> to vector<10x16xf32>
    %cst_21 = arith.constant dense<0.000000e+00> : vector<10x10xf32>
    %74 = tpu.matmul %72, %73, %cst_21 {dimension_numbers = #tpu.dot_dimension_numbers<[1], [1], [0], [0], [0, 0, 1, 0], [], []>} : vector<10x16xf32>, vector<10x16xf32>, vector<10x10xf32> -> vector<10x10xf32>
    %cst_22 = arith.constant 2.500000e-01 : f32
    %75 = vector.broadcast %cst_22 : f32 to vector<10x10xf32>
    %76 = arith.mulf %74, %75 : vector<10x10xf32>
    %cst_23 = arith.constant -1.000000e+30 : f32
    %77 = vector.broadcast %cst_23 : f32 to vector<10x10xf32>
    %78 = arith.select %35, %76, %77 : vector<10x10xi1>, vector<10x10xf32>
    %cst_24 = arith.constant dense<0xFF800000> : vector<10xf32>
    %79 = vector.multi_reduction <maximumf>, %78, %cst_24 [1] : vector<10x10xf32> to vector<10xf32>
    %80 = vector.shape_cast %79 : vector<10xf32> to vector<10x1xf32>
    %81 = vector.broadcast %80 : vector<10x1xf32> to vector<10x10xf32>
    %82 = arith.subf %78, %81 : vector<10x10xf32>
    %83 = math.exp %82 : vector<10x10xf32>
    %cst_25 = arith.constant dense<0.000000e+00> : vector<10xf32>
    %84 = vector.multi_reduction <add>, %83, %cst_25 [1] : vector<10x10xf32> to vector<10xf32>
    %85 = vector.shape_cast %84 : vector<10xf32> to vector<10x1xf32>
    %86 = vector.broadcast %85 : vector<10x1xf32> to vector<10x10xf32>
    %87 = arith.divf %83, %86 : vector<10x10xf32>
    %88 = vector.extract_strided_slice %71 {offsets = [0, 0], sizes = [10, 16], strides = [1, 1]} : vector<10x128xf32> to vector<10x16xf32>
    %cst_26 = arith.constant dense<0.000000e+00> : vector<10x16xf32>
    %89 = tpu.matmul %87, %88, %cst_26 {dimension_numbers = #tpu.dot_dimension_numbers<[1], [0], [0], [1], [0, 0, 1, 1], [], []>} : vector<10x10xf32>, vector<10x16xf32>, vector<10x16xf32> -> vector<10x16xf32>
    %90 = vector.extract_strided_slice %69 {offsets = [0, 16], sizes = [10, 16], strides = [1, 1]} : vector<10x128xf32> to vector<10x16xf32>
    %91 = vector.extract_strided_slice %70 {offsets = [0, 16], sizes = [10, 16], strides = [1, 1]} : vector<10x128xf32> to vector<10x16xf32>
    %cst_27 = arith.constant dense<0.000000e+00> : vector<10x10xf32>
    %92 = tpu.matmul %90, %91, %cst_27 {dimension_numbers = #tpu.dot_dimension_numbers<[1], [1], [0], [0], [0, 0, 1, 0], [], []>} : vector<10x16xf32>, vector<10x16xf32>, vector<10x10xf32> -> vector<10x10xf32>
    %cst_28 = arith.constant 2.500000e-01 : f32
    %93 = vector.broadcast %cst_28 : f32 to vector<10x10xf32>
    %94 = arith.mulf %92, %93 : vector<10x10xf32>
    %cst_29 = arith.constant -1.000000e+30 : f32
    %95 = vector.broadcast %cst_29 : f32 to vector<10x10xf32>
    %96 = arith.select %35, %94, %95 : vector<10x10xi1>, vector<10x10xf32>
    %cst_30 = arith.constant dense<0xFF800000> : vector<10xf32>
    %97 = vector.multi_reduction <maximumf>, %96, %cst_30 [1] : vector<10x10xf32> to vector<10xf32>
    %98 = vector.shape_cast %97 : vector<10xf32> to vector<10x1xf32>
    %99 = vector.broadcast %98 : vector<10x1xf32> to vector<10x10xf32>
    %100 = arith.subf %96, %99 : vector<10x10xf32>
    %101 = math.exp %100 : vector<10x10xf32>
    %cst_31 = arith.constant dense<0.000000e+00> : vector<10xf32>
    %102 = vector.multi_reduction <add>, %101, %cst_31 [1] : vector<10x10xf32> to vector<10xf32>
    %103 = vector.shape_cast %102 : vector<10xf32> to vector<10x1xf32>
    %104 = vector.broadcast %103 : vector<10x1xf32> to vector<10x10xf32>
    %105 = arith.divf %101, %104 : vector<10x10xf32>
    %106 = vector.extract_strided_slice %71 {offsets = [0, 16], sizes = [10, 16], strides = [1, 1]} : vector<10x128xf32> to vector<10x16xf32>
    %cst_32 = arith.constant dense<0.000000e+00> : vector<10x16xf32>
    %107 = tpu.matmul %105, %106, %cst_32 {dimension_numbers = #tpu.dot_dimension_numbers<[1], [0], [0], [1], [0, 0, 1, 1], [], []>} : vector<10x10xf32>, vector<10x16xf32>, vector<10x16xf32> -> vector<10x16xf32>
    %108 = vector.extract_strided_slice %69 {offsets = [0, 32], sizes = [10, 16], strides = [1, 1]} : vector<10x128xf32> to vector<10x16xf32>
    %109 = vector.extract_strided_slice %70 {offsets = [0, 32], sizes = [10, 16], strides = [1, 1]} : vector<10x128xf32> to vector<10x16xf32>
    %cst_33 = arith.constant dense<0.000000e+00> : vector<10x10xf32>
    %110 = tpu.matmul %108, %109, %cst_33 {dimension_numbers = #tpu.dot_dimension_numbers<[1], [1], [0], [0], [0, 0, 1, 0], [], []>} : vector<10x16xf32>, vector<10x16xf32>, vector<10x10xf32> -> vector<10x10xf32>
    %cst_34 = arith.constant 2.500000e-01 : f32
    %111 = vector.broadcast %cst_34 : f32 to vector<10x10xf32>
    %112 = arith.mulf %110, %111 : vector<10x10xf32>
    %cst_35 = arith.constant -1.000000e+30 : f32
    %113 = vector.broadcast %cst_35 : f32 to vector<10x10xf32>
    %114 = arith.select %35, %112, %113 : vector<10x10xi1>, vector<10x10xf32>
    %cst_36 = arith.constant dense<0xFF800000> : vector<10xf32>
    %115 = vector.multi_reduction <maximumf>, %114, %cst_36 [1] : vector<10x10xf32> to vector<10xf32>
    %116 = vector.shape_cast %115 : vector<10xf32> to vector<10x1xf32>
    %117 = vector.broadcast %116 : vector<10x1xf32> to vector<10x10xf32>
    %118 = arith.subf %114, %117 : vector<10x10xf32>
    %119 = math.exp %118 : vector<10x10xf32>
    %cst_37 = arith.constant dense<0.000000e+00> : vector<10xf32>
    %120 = vector.multi_reduction <add>, %119, %cst_37 [1] : vector<10x10xf32> to vector<10xf32>
    %121 = vector.shape_cast %120 : vector<10xf32> to vector<10x1xf32>
    %122 = vector.broadcast %121 : vector<10x1xf32> to vector<10x10xf32>
    %123 = arith.divf %119, %122 : vector<10x10xf32>
    %124 = vector.extract_strided_slice %71 {offsets = [0, 32], sizes = [10, 16], strides = [1, 1]} : vector<10x128xf32> to vector<10x16xf32>
    %cst_38 = arith.constant dense<0.000000e+00> : vector<10x16xf32>
    %125 = tpu.matmul %123, %124, %cst_38 {dimension_numbers = #tpu.dot_dimension_numbers<[1], [0], [0], [1], [0, 0, 1, 1], [], []>} : vector<10x10xf32>, vector<10x16xf32>, vector<10x16xf32> -> vector<10x16xf32>
    %126 = vector.extract_strided_slice %69 {offsets = [0, 48], sizes = [10, 16], strides = [1, 1]} : vector<10x128xf32> to vector<10x16xf32>
    %127 = vector.extract_strided_slice %70 {offsets = [0, 48], sizes = [10, 16], strides = [1, 1]} : vector<10x128xf32> to vector<10x16xf32>
    %cst_39 = arith.constant dense<0.000000e+00> : vector<10x10xf32>
    %128 = tpu.matmul %126, %127, %cst_39 {dimension_numbers = #tpu.dot_dimension_numbers<[1], [1], [0], [0], [0, 0, 1, 0], [], []>} : vector<10x16xf32>, vector<10x16xf32>, vector<10x10xf32> -> vector<10x10xf32>
    %cst_40 = arith.constant 2.500000e-01 : f32
    %129 = vector.broadcast %cst_40 : f32 to vector<10x10xf32>
    %130 = arith.mulf %128, %129 : vector<10x10xf32>
    %cst_41 = arith.constant -1.000000e+30 : f32
    %131 = vector.broadcast %cst_41 : f32 to vector<10x10xf32>
    %132 = arith.select %35, %130, %131 : vector<10x10xi1>, vector<10x10xf32>
    %cst_42 = arith.constant dense<0xFF800000> : vector<10xf32>
    %133 = vector.multi_reduction <maximumf>, %132, %cst_42 [1] : vector<10x10xf32> to vector<10xf32>
    %134 = vector.shape_cast %133 : vector<10xf32> to vector<10x1xf32>
    %135 = vector.broadcast %134 : vector<10x1xf32> to vector<10x10xf32>
    %136 = arith.subf %132, %135 : vector<10x10xf32>
    %137 = math.exp %136 : vector<10x10xf32>
    %cst_43 = arith.constant dense<0.000000e+00> : vector<10xf32>
    %138 = vector.multi_reduction <add>, %137, %cst_43 [1] : vector<10x10xf32> to vector<10xf32>
    %139 = vector.shape_cast %138 : vector<10xf32> to vector<10x1xf32>
    %140 = vector.broadcast %139 : vector<10x1xf32> to vector<10x10xf32>
    %141 = arith.divf %137, %140 : vector<10x10xf32>
    %142 = vector.extract_strided_slice %71 {offsets = [0, 48], sizes = [10, 16], strides = [1, 1]} : vector<10x128xf32> to vector<10x16xf32>
    %cst_44 = arith.constant dense<0.000000e+00> : vector<10x16xf32>
    %143 = tpu.matmul %141, %142, %cst_44 {dimension_numbers = #tpu.dot_dimension_numbers<[1], [0], [0], [1], [0, 0, 1, 1], [], []>} : vector<10x10xf32>, vector<10x16xf32>, vector<10x16xf32> -> vector<10x16xf32>
    %144 = vector.extract_strided_slice %69 {offsets = [0, 64], sizes = [10, 16], strides = [1, 1]} : vector<10x128xf32> to vector<10x16xf32>
    %145 = vector.extract_strided_slice %70 {offsets = [0, 64], sizes = [10, 16], strides = [1, 1]} : vector<10x128xf32> to vector<10x16xf32>
    %cst_45 = arith.constant dense<0.000000e+00> : vector<10x10xf32>
    %146 = tpu.matmul %144, %145, %cst_45 {dimension_numbers = #tpu.dot_dimension_numbers<[1], [1], [0], [0], [0, 0, 1, 0], [], []>} : vector<10x16xf32>, vector<10x16xf32>, vector<10x10xf32> -> vector<10x10xf32>
    %cst_46 = arith.constant 2.500000e-01 : f32
    %147 = vector.broadcast %cst_46 : f32 to vector<10x10xf32>
    %148 = arith.mulf %146, %147 : vector<10x10xf32>
    %cst_47 = arith.constant -1.000000e+30 : f32
    %149 = vector.broadcast %cst_47 : f32 to vector<10x10xf32>
    %150 = arith.select %35, %148, %149 : vector<10x10xi1>, vector<10x10xf32>
    %cst_48 = arith.constant dense<0xFF800000> : vector<10xf32>
    %151 = vector.multi_reduction <maximumf>, %150, %cst_48 [1] : vector<10x10xf32> to vector<10xf32>
    %152 = vector.shape_cast %151 : vector<10xf32> to vector<10x1xf32>
    %153 = vector.broadcast %152 : vector<10x1xf32> to vector<10x10xf32>
    %154 = arith.subf %150, %153 : vector<10x10xf32>
    %155 = math.exp %154 : vector<10x10xf32>
    %cst_49 = arith.constant dense<0.000000e+00> : vector<10xf32>
    %156 = vector.multi_reduction <add>, %155, %cst_49 [1] : vector<10x10xf32> to vector<10xf32>
    %157 = vector.shape_cast %156 : vector<10xf32> to vector<10x1xf32>
    %158 = vector.broadcast %157 : vector<10x1xf32> to vector<10x10xf32>
    %159 = arith.divf %155, %158 : vector<10x10xf32>
    %160 = vector.extract_strided_slice %71 {offsets = [0, 64], sizes = [10, 16], strides = [1, 1]} : vector<10x128xf32> to vector<10x16xf32>
    %cst_50 = arith.constant dense<0.000000e+00> : vector<10x16xf32>
    %161 = tpu.matmul %159, %160, %cst_50 {dimension_numbers = #tpu.dot_dimension_numbers<[1], [0], [0], [1], [0, 0, 1, 1], [], []>} : vector<10x10xf32>, vector<10x16xf32>, vector<10x16xf32> -> vector<10x16xf32>
    %162 = vector.extract_strided_slice %69 {offsets = [0, 80], sizes = [10, 16], strides = [1, 1]} : vector<10x128xf32> to vector<10x16xf32>
    %163 = vector.extract_strided_slice %70 {offsets = [0, 80], sizes = [10, 16], strides = [1, 1]} : vector<10x128xf32> to vector<10x16xf32>
    %cst_51 = arith.constant dense<0.000000e+00> : vector<10x10xf32>
    %164 = tpu.matmul %162, %163, %cst_51 {dimension_numbers = #tpu.dot_dimension_numbers<[1], [1], [0], [0], [0, 0, 1, 0], [], []>} : vector<10x16xf32>, vector<10x16xf32>, vector<10x10xf32> -> vector<10x10xf32>
    %cst_52 = arith.constant 2.500000e-01 : f32
    %165 = vector.broadcast %cst_52 : f32 to vector<10x10xf32>
    %166 = arith.mulf %164, %165 : vector<10x10xf32>
    %cst_53 = arith.constant -1.000000e+30 : f32
    %167 = vector.broadcast %cst_53 : f32 to vector<10x10xf32>
    %168 = arith.select %35, %166, %167 : vector<10x10xi1>, vector<10x10xf32>
    %cst_54 = arith.constant dense<0xFF800000> : vector<10xf32>
    %169 = vector.multi_reduction <maximumf>, %168, %cst_54 [1] : vector<10x10xf32> to vector<10xf32>
    %170 = vector.shape_cast %169 : vector<10xf32> to vector<10x1xf32>
    %171 = vector.broadcast %170 : vector<10x1xf32> to vector<10x10xf32>
    %172 = arith.subf %168, %171 : vector<10x10xf32>
    %173 = math.exp %172 : vector<10x10xf32>
    %cst_55 = arith.constant dense<0.000000e+00> : vector<10xf32>
    %174 = vector.multi_reduction <add>, %173, %cst_55 [1] : vector<10x10xf32> to vector<10xf32>
    %175 = vector.shape_cast %174 : vector<10xf32> to vector<10x1xf32>
    %176 = vector.broadcast %175 : vector<10x1xf32> to vector<10x10xf32>
    %177 = arith.divf %173, %176 : vector<10x10xf32>
    %178 = vector.extract_strided_slice %71 {offsets = [0, 80], sizes = [10, 16], strides = [1, 1]} : vector<10x128xf32> to vector<10x16xf32>
    %cst_56 = arith.constant dense<0.000000e+00> : vector<10x16xf32>
    %179 = tpu.matmul %177, %178, %cst_56 {dimension_numbers = #tpu.dot_dimension_numbers<[1], [0], [0], [1], [0, 0, 1, 1], [], []>} : vector<10x10xf32>, vector<10x16xf32>, vector<10x16xf32> -> vector<10x16xf32>
    %180 = vector.extract_strided_slice %69 {offsets = [0, 96], sizes = [10, 16], strides = [1, 1]} : vector<10x128xf32> to vector<10x16xf32>
    %181 = vector.extract_strided_slice %70 {offsets = [0, 96], sizes = [10, 16], strides = [1, 1]} : vector<10x128xf32> to vector<10x16xf32>
    %cst_57 = arith.constant dense<0.000000e+00> : vector<10x10xf32>
    %182 = tpu.matmul %180, %181, %cst_57 {dimension_numbers = #tpu.dot_dimension_numbers<[1], [1], [0], [0], [0, 0, 1, 0], [], []>} : vector<10x16xf32>, vector<10x16xf32>, vector<10x10xf32> -> vector<10x10xf32>
    %cst_58 = arith.constant 2.500000e-01 : f32
    %183 = vector.broadcast %cst_58 : f32 to vector<10x10xf32>
    %184 = arith.mulf %182, %183 : vector<10x10xf32>
    %cst_59 = arith.constant -1.000000e+30 : f32
    %185 = vector.broadcast %cst_59 : f32 to vector<10x10xf32>
    %186 = arith.select %35, %184, %185 : vector<10x10xi1>, vector<10x10xf32>
    %cst_60 = arith.constant dense<0xFF800000> : vector<10xf32>
    %187 = vector.multi_reduction <maximumf>, %186, %cst_60 [1] : vector<10x10xf32> to vector<10xf32>
    %188 = vector.shape_cast %187 : vector<10xf32> to vector<10x1xf32>
    %189 = vector.broadcast %188 : vector<10x1xf32> to vector<10x10xf32>
    %190 = arith.subf %186, %189 : vector<10x10xf32>
    %191 = math.exp %190 : vector<10x10xf32>
    %cst_61 = arith.constant dense<0.000000e+00> : vector<10xf32>
    %192 = vector.multi_reduction <add>, %191, %cst_61 [1] : vector<10x10xf32> to vector<10xf32>
    %193 = vector.shape_cast %192 : vector<10xf32> to vector<10x1xf32>
    %194 = vector.broadcast %193 : vector<10x1xf32> to vector<10x10xf32>
    %195 = arith.divf %191, %194 : vector<10x10xf32>
    %196 = vector.extract_strided_slice %71 {offsets = [0, 96], sizes = [10, 16], strides = [1, 1]} : vector<10x128xf32> to vector<10x16xf32>
    %cst_62 = arith.constant dense<0.000000e+00> : vector<10x16xf32>
    %197 = tpu.matmul %195, %196, %cst_62 {dimension_numbers = #tpu.dot_dimension_numbers<[1], [0], [0], [1], [0, 0, 1, 1], [], []>} : vector<10x10xf32>, vector<10x16xf32>, vector<10x16xf32> -> vector<10x16xf32>
    %198 = vector.extract_strided_slice %69 {offsets = [0, 112], sizes = [10, 16], strides = [1, 1]} : vector<10x128xf32> to vector<10x16xf32>
    %199 = vector.extract_strided_slice %70 {offsets = [0, 112], sizes = [10, 16], strides = [1, 1]} : vector<10x128xf32> to vector<10x16xf32>
    %cst_63 = arith.constant dense<0.000000e+00> : vector<10x10xf32>
    %200 = tpu.matmul %198, %199, %cst_63 {dimension_numbers = #tpu.dot_dimension_numbers<[1], [1], [0], [0], [0, 0, 1, 0], [], []>} : vector<10x16xf32>, vector<10x16xf32>, vector<10x10xf32> -> vector<10x10xf32>
    %cst_64 = arith.constant 2.500000e-01 : f32
    %201 = vector.broadcast %cst_64 : f32 to vector<10x10xf32>
    %202 = arith.mulf %200, %201 : vector<10x10xf32>
    %cst_65 = arith.constant -1.000000e+30 : f32
    %203 = vector.broadcast %cst_65 : f32 to vector<10x10xf32>
    %204 = arith.select %35, %202, %203 : vector<10x10xi1>, vector<10x10xf32>
    %cst_66 = arith.constant dense<0xFF800000> : vector<10xf32>
    %205 = vector.multi_reduction <maximumf>, %204, %cst_66 [1] : vector<10x10xf32> to vector<10xf32>
    %206 = vector.shape_cast %205 : vector<10xf32> to vector<10x1xf32>
    %207 = vector.broadcast %206 : vector<10x1xf32> to vector<10x10xf32>
    %208 = arith.subf %204, %207 : vector<10x10xf32>
    %209 = math.exp %208 : vector<10x10xf32>
    %cst_67 = arith.constant dense<0.000000e+00> : vector<10xf32>
    %210 = vector.multi_reduction <add>, %209, %cst_67 [1] : vector<10x10xf32> to vector<10xf32>
    %211 = vector.shape_cast %210 : vector<10xf32> to vector<10x1xf32>
    %212 = vector.broadcast %211 : vector<10x1xf32> to vector<10x10xf32>
    %213 = arith.divf %209, %212 : vector<10x10xf32>
    %214 = vector.extract_strided_slice %71 {offsets = [0, 112], sizes = [10, 16], strides = [1, 1]} : vector<10x128xf32> to vector<10x16xf32>
    %cst_68 = arith.constant dense<0.000000e+00> : vector<10x16xf32>
    %215 = tpu.matmul %213, %214, %cst_68 {dimension_numbers = #tpu.dot_dimension_numbers<[1], [0], [0], [1], [0, 0, 1, 1], [], []>} : vector<10x10xf32>, vector<10x16xf32>, vector<10x16xf32> -> vector<10x16xf32>
    %216 = tpu.concatenate %89, %107, %125, %143, %161, %179, %197, %215 in 1 : vector<10x16xf32>, vector<10x16xf32>, vector<10x16xf32>, vector<10x16xf32>, vector<10x16xf32>, vector<10x16xf32>, vector<10x16xf32>, vector<10x16xf32> -> vector<10x128xf32>
    %c0_69 = arith.constant 0 : index
    %c0_70 = arith.constant 0 : index
    %c0_71 = arith.constant 0 : index
    %217 = vector.load %arg2[%c0_69, %c0_70, %c0_71] : memref<2x128x32xf32, #tpu.memory_space<vmem>>, vector<1x128x32xf32>
    %218 = vector.shape_cast %217 : vector<1x128x32xf32> to vector<128x32xf32>
    %cst_72 = arith.constant dense<0.000000e+00> : vector<10x32xf32>
    %219 = tpu.matmul %216, %218, %cst_72 {dimension_numbers = #tpu.dot_dimension_numbers<[1], [0], [0], [1], [0, 0, 1, 1], [], []>} : vector<10x128xf32>, vector<128x32xf32>, vector<10x32xf32> -> vector<10x32xf32>
    %220 = vector.broadcast %40 : vector<1x32xf32> to vector<10x32xf32>
    %221 = arith.addf %219, %220 : vector<10x32xf32>
    %222 = arith.addf %221, %65 : vector<10x32xf32>
    %cst_73 = arith.constant dense<0.000000e+00> : vector<10xf32>
    %223 = vector.multi_reduction <add>, %222, %cst_73 [1] : vector<10x32xf32> to vector<10xf32>
    %224 = vector.shape_cast %223 : vector<10xf32> to vector<10x1xf32>
    %cst_74 = arith.constant 3.200000e+01 : f32
    %225 = vector.broadcast %cst_74 : f32 to vector<10x1xf32>
    %226 = arith.divf %224, %225 : vector<10x1xf32>
    %227 = vector.broadcast %226 : vector<10x1xf32> to vector<10x32xf32>
    %228 = arith.subf %222, %227 : vector<10x32xf32>
    %229 = arith.mulf %228, %228 : vector<10x32xf32>
    %cst_75 = arith.constant dense<0.000000e+00> : vector<10xf32>
    %230 = vector.multi_reduction <add>, %229, %cst_75 [1] : vector<10x32xf32> to vector<10xf32>
    %231 = vector.shape_cast %230 : vector<10xf32> to vector<10x1xf32>
    %cst_76 = arith.constant 3.200000e+01 : f32
    %232 = vector.broadcast %cst_76 : f32 to vector<10x1xf32>
    %233 = arith.divf %231, %232 : vector<10x1xf32>
    %234 = vector.broadcast %226 : vector<10x1xf32> to vector<10x32xf32>
    %235 = arith.subf %222, %234 : vector<10x32xf32>
    %cst_77 = arith.constant 9.99999974E-6 : f32
    %236 = vector.broadcast %cst_77 : f32 to vector<10x1xf32>
    %237 = arith.addf %233, %236 : vector<10x1xf32>
    %238 = math.rsqrt %237 : vector<10x1xf32>
    %239 = vector.broadcast %238 : vector<10x1xf32> to vector<10x32xf32>
    %240 = arith.mulf %235, %239 : vector<10x32xf32>
    %241 = vector.broadcast %41 : vector<1x32xf32> to vector<10x32xf32>
    %242 = arith.mulf %240, %241 : vector<10x32xf32>
    %243 = vector.broadcast %42 : vector<1x32xf32> to vector<10x32xf32>
    %244 = arith.addf %242, %243 : vector<10x32xf32>
    %c0_78 = arith.constant 0 : index
    %c0_79 = arith.constant 0 : index
    %c0_80 = arith.constant 0 : index
    %245 = vector.load %arg3[%c0_78, %c0_79, %c0_80] : memref<2x32x256xf32, #tpu.memory_space<vmem>>, vector<1x32x256xf32>
    %246 = vector.shape_cast %245 : vector<1x32x256xf32> to vector<32x256xf32>
    %cst_81 = arith.constant dense<0.000000e+00> : vector<10x256xf32>
    %247 = tpu.matmul %244, %246, %cst_81 {dimension_numbers = #tpu.dot_dimension_numbers<[1], [0], [0], [1], [0, 0, 1, 1], [], []>} : vector<10x32xf32>, vector<32x256xf32>, vector<10x256xf32> -> vector<10x256xf32>
    %c0_82 = arith.constant 0 : index
    %c0_83 = arith.constant 0 : index
    %c0_84 = arith.constant 0 : index
    %248 = vector.load %arg6[%c0_82, %c0_83, %c0_84] : memref<2x1x256xf32, #tpu.memory_space<vmem>>, vector<1x1x256xf32>
    %249 = vector.shape_cast %248 : vector<1x1x256xf32> to vector<1x256xf32>
    %250 = vector.broadcast %249 : vector<1x256xf32> to vector<10x256xf32>
    %251 = arith.addf %247, %250 : vector<10x256xf32>
    %252 = vector.extract_strided_slice %251 {offsets = [0, 0], sizes = [10, 128], strides = [1, 1]} : vector<10x256xf32> to vector<10x128xf32>
    %253 = vector.extract_strided_slice %251 {offsets = [0, 128], sizes = [10, 128], strides = [1, 1]} : vector<10x256xf32> to vector<10x128xf32>
    %cst_85 = arith.constant 5.000000e-01 : f32
    %254 = vector.broadcast %cst_85 : f32 to vector<10x128xf32>
    %255 = arith.mulf %254, %253 : vector<10x128xf32>
    %cst_86 = arith.constant 0.707106769 : f32
    %256 = vector.broadcast %cst_86 : f32 to vector<10x128xf32>
    %257 = arith.mulf %253, %256 : vector<10x128xf32>
    %258 = math.erf %257 : vector<10x128xf32>
    %cst_87 = arith.constant 1.000000e+00 : f32
    %259 = vector.broadcast %cst_87 : f32 to vector<10x128xf32>
    %260 = arith.addf %259, %258 : vector<10x128xf32>
    %261 = arith.mulf %255, %260 : vector<10x128xf32>
    %262 = arith.mulf %252, %261 : vector<10x128xf32>
    %c0_88 = arith.constant 0 : index
    %c0_89 = arith.constant 0 : index
    %c0_90 = arith.constant 0 : index
    %263 = vector.load %arg4[%c0_88, %c0_89, %c0_90] : memref<2x128x32xf32, #tpu.memory_space<vmem>>, vector<1x128x32xf32>
    %264 = vector.shape_cast %263 : vector<1x128x32xf32> to vector<128x32xf32>
    %cst_91 = arith.constant dense<0.000000e+00> : vector<10x32xf32>
    %265 = tpu.matmul %262, %264, %cst_91 {dimension_numbers = #tpu.dot_dimension_numbers<[1], [0], [0], [1], [0, 0, 1, 1], [], []>} : vector<10x128xf32>, vector<128x32xf32>, vector<10x32xf32> -> vector<10x32xf32>
    %266 = vector.broadcast %43 : vector<1x32xf32> to vector<10x32xf32>
    %267 = arith.addf %265, %266 : vector<10x32xf32>
    %268 = arith.addf %267, %244 : vector<10x32xf32>
    %c1 = arith.constant 1 : index
    %c0_92 = arith.constant 0 : index
    %c0_93 = arith.constant 0 : index
    %269 = vector.load %arg5[%c1, %c0_92, %c0_93] : memref<2x6x32xf32, #tpu.memory_space<vmem>>, vector<1x6x32xf32>
    %270 = vector.shape_cast %269 : vector<1x6x32xf32> to vector<6x32xf32>
    %271 = vector.extract_strided_slice %270 {offsets = [0, 0], sizes = [1, 32], strides = [1, 1]} : vector<6x32xf32> to vector<1x32xf32>
    %272 = vector.extract_strided_slice %270 {offsets = [1, 0], sizes = [1, 32], strides = [1, 1]} : vector<6x32xf32> to vector<1x32xf32>
    %273 = vector.extract_strided_slice %270 {offsets = [2, 0], sizes = [1, 32], strides = [1, 1]} : vector<6x32xf32> to vector<1x32xf32>
    %274 = vector.extract_strided_slice %270 {offsets = [3, 0], sizes = [1, 32], strides = [1, 1]} : vector<6x32xf32> to vector<1x32xf32>
    %275 = vector.extract_strided_slice %270 {offsets = [4, 0], sizes = [1, 32], strides = [1, 1]} : vector<6x32xf32> to vector<1x32xf32>
    %276 = vector.extract_strided_slice %270 {offsets = [5, 0], sizes = [1, 32], strides = [1, 1]} : vector<6x32xf32> to vector<1x32xf32>
    %cst_94 = arith.constant dense<0.000000e+00> : vector<10xf32>
    %277 = vector.multi_reduction <add>, %268, %cst_94 [1] : vector<10x32xf32> to vector<10xf32>
    %278 = vector.shape_cast %277 : vector<10xf32> to vector<10x1xf32>
    %cst_95 = arith.constant 3.200000e+01 : f32
    %279 = vector.broadcast %cst_95 : f32 to vector<10x1xf32>
    %280 = arith.divf %278, %279 : vector<10x1xf32>
    %281 = vector.broadcast %280 : vector<10x1xf32> to vector<10x32xf32>
    %282 = arith.subf %268, %281 : vector<10x32xf32>
    %283 = arith.mulf %282, %282 : vector<10x32xf32>
    %cst_96 = arith.constant dense<0.000000e+00> : vector<10xf32>
    %284 = vector.multi_reduction <add>, %283, %cst_96 [1] : vector<10x32xf32> to vector<10xf32>
    %285 = vector.shape_cast %284 : vector<10xf32> to vector<10x1xf32>
    %cst_97 = arith.constant 3.200000e+01 : f32
    %286 = vector.broadcast %cst_97 : f32 to vector<10x1xf32>
    %287 = arith.divf %285, %286 : vector<10x1xf32>
    %288 = vector.broadcast %280 : vector<10x1xf32> to vector<10x32xf32>
    %289 = arith.subf %268, %288 : vector<10x32xf32>
    %cst_98 = arith.constant 9.99999974E-6 : f32
    %290 = vector.broadcast %cst_98 : f32 to vector<10x1xf32>
    %291 = arith.addf %287, %290 : vector<10x1xf32>
    %292 = math.rsqrt %291 : vector<10x1xf32>
    %293 = vector.broadcast %292 : vector<10x1xf32> to vector<10x32xf32>
    %294 = arith.mulf %289, %293 : vector<10x32xf32>
    %295 = vector.broadcast %271 : vector<1x32xf32> to vector<10x32xf32>
    %296 = arith.mulf %294, %295 : vector<10x32xf32>
    %297 = vector.broadcast %272 : vector<1x32xf32> to vector<10x32xf32>
    %298 = arith.addf %296, %297 : vector<10x32xf32>
    %c1_99 = arith.constant 1 : index
    %c0_100 = arith.constant 0 : index
    %c0_101 = arith.constant 0 : index
    %299 = vector.load %arg1[%c1_99, %c0_100, %c0_101] : memref<2x32x384xf32, #tpu.memory_space<vmem>>, vector<1x32x384xf32>
    %300 = vector.shape_cast %299 : vector<1x32x384xf32> to vector<32x384xf32>
    %cst_102 = arith.constant dense<0.000000e+00> : vector<10x384xf32>
    %301 = tpu.matmul %298, %300, %cst_102 {dimension_numbers = #tpu.dot_dimension_numbers<[1], [0], [0], [1], [0, 0, 1, 1], [], []>} : vector<10x32xf32>, vector<32x384xf32>, vector<10x384xf32> -> vector<10x384xf32>
    %302 = vector.extract_strided_slice %301 {offsets = [0, 0], sizes = [10, 128], strides = [1, 1]} : vector<10x384xf32> to vector<10x128xf32>
    %303 = vector.extract_strided_slice %301 {offsets = [0, 128], sizes = [10, 128], strides = [1, 1]} : vector<10x384xf32> to vector<10x128xf32>
    %304 = vector.extract_strided_slice %301 {offsets = [0, 256], sizes = [10, 128], strides = [1, 1]} : vector<10x384xf32> to vector<10x128xf32>
    %305 = vector.extract_strided_slice %302 {offsets = [0, 0], sizes = [10, 16], strides = [1, 1]} : vector<10x128xf32> to vector<10x16xf32>
    %306 = vector.extract_strided_slice %303 {offsets = [0, 0], sizes = [10, 16], strides = [1, 1]} : vector<10x128xf32> to vector<10x16xf32>
    %cst_103 = arith.constant dense<0.000000e+00> : vector<10x10xf32>
    %307 = tpu.matmul %305, %306, %cst_103 {dimension_numbers = #tpu.dot_dimension_numbers<[1], [1], [0], [0], [0, 0, 1, 0], [], []>} : vector<10x16xf32>, vector<10x16xf32>, vector<10x10xf32> -> vector<10x10xf32>
    %cst_104 = arith.constant 2.500000e-01 : f32
    %308 = vector.broadcast %cst_104 : f32 to vector<10x10xf32>
    %309 = arith.mulf %307, %308 : vector<10x10xf32>
    %cst_105 = arith.constant -1.000000e+30 : f32
    %310 = vector.broadcast %cst_105 : f32 to vector<10x10xf32>
    %311 = arith.select %35, %309, %310 : vector<10x10xi1>, vector<10x10xf32>
    %cst_106 = arith.constant dense<0xFF800000> : vector<10xf32>
    %312 = vector.multi_reduction <maximumf>, %311, %cst_106 [1] : vector<10x10xf32> to vector<10xf32>
    %313 = vector.shape_cast %312 : vector<10xf32> to vector<10x1xf32>
    %314 = vector.broadcast %313 : vector<10x1xf32> to vector<10x10xf32>
    %315 = arith.subf %311, %314 : vector<10x10xf32>
    %316 = math.exp %315 : vector<10x10xf32>
    %cst_107 = arith.constant dense<0.000000e+00> : vector<10xf32>
    %317 = vector.multi_reduction <add>, %316, %cst_107 [1] : vector<10x10xf32> to vector<10xf32>
    %318 = vector.shape_cast %317 : vector<10xf32> to vector<10x1xf32>
    %319 = vector.broadcast %318 : vector<10x1xf32> to vector<10x10xf32>
    %320 = arith.divf %316, %319 : vector<10x10xf32>
    %321 = vector.extract_strided_slice %304 {offsets = [0, 0], sizes = [10, 16], strides = [1, 1]} : vector<10x128xf32> to vector<10x16xf32>
    %cst_108 = arith.constant dense<0.000000e+00> : vector<10x16xf32>
    %322 = tpu.matmul %320, %321, %cst_108 {dimension_numbers = #tpu.dot_dimension_numbers<[1], [0], [0], [1], [0, 0, 1, 1], [], []>} : vector<10x10xf32>, vector<10x16xf32>, vector<10x16xf32> -> vector<10x16xf32>
    %323 = vector.extract_strided_slice %302 {offsets = [0, 16], sizes = [10, 16], strides = [1, 1]} : vector<10x128xf32> to vector<10x16xf32>
    %324 = vector.extract_strided_slice %303 {offsets = [0, 16], sizes = [10, 16], strides = [1, 1]} : vector<10x128xf32> to vector<10x16xf32>
    %cst_109 = arith.constant dense<0.000000e+00> : vector<10x10xf32>
    %325 = tpu.matmul %323, %324, %cst_109 {dimension_numbers = #tpu.dot_dimension_numbers<[1], [1], [0], [0], [0, 0, 1, 0], [], []>} : vector<10x16xf32>, vector<10x16xf32>, vector<10x10xf32> -> vector<10x10xf32>
    %cst_110 = arith.constant 2.500000e-01 : f32
    %326 = vector.broadcast %cst_110 : f32 to vector<10x10xf32>
    %327 = arith.mulf %325, %326 : vector<10x10xf32>
    %cst_111 = arith.constant -1.000000e+30 : f32
    %328 = vector.broadcast %cst_111 : f32 to vector<10x10xf32>
    %329 = arith.select %35, %327, %328 : vector<10x10xi1>, vector<10x10xf32>
    %cst_112 = arith.constant dense<0xFF800000> : vector<10xf32>
    %330 = vector.multi_reduction <maximumf>, %329, %cst_112 [1] : vector<10x10xf32> to vector<10xf32>
    %331 = vector.shape_cast %330 : vector<10xf32> to vector<10x1xf32>
    %332 = vector.broadcast %331 : vector<10x1xf32> to vector<10x10xf32>
    %333 = arith.subf %329, %332 : vector<10x10xf32>
    %334 = math.exp %333 : vector<10x10xf32>
    %cst_113 = arith.constant dense<0.000000e+00> : vector<10xf32>
    %335 = vector.multi_reduction <add>, %334, %cst_113 [1] : vector<10x10xf32> to vector<10xf32>
    %336 = vector.shape_cast %335 : vector<10xf32> to vector<10x1xf32>
    %337 = vector.broadcast %336 : vector<10x1xf32> to vector<10x10xf32>
    %338 = arith.divf %334, %337 : vector<10x10xf32>
    %339 = vector.extract_strided_slice %304 {offsets = [0, 16], sizes = [10, 16], strides = [1, 1]} : vector<10x128xf32> to vector<10x16xf32>
    %cst_114 = arith.constant dense<0.000000e+00> : vector<10x16xf32>
    %340 = tpu.matmul %338, %339, %cst_114 {dimension_numbers = #tpu.dot_dimension_numbers<[1], [0], [0], [1], [0, 0, 1, 1], [], []>} : vector<10x10xf32>, vector<10x16xf32>, vector<10x16xf32> -> vector<10x16xf32>
    %341 = vector.extract_strided_slice %302 {offsets = [0, 32], sizes = [10, 16], strides = [1, 1]} : vector<10x128xf32> to vector<10x16xf32>
    %342 = vector.extract_strided_slice %303 {offsets = [0, 32], sizes = [10, 16], strides = [1, 1]} : vector<10x128xf32> to vector<10x16xf32>
    %cst_115 = arith.constant dense<0.000000e+00> : vector<10x10xf32>
    %343 = tpu.matmul %341, %342, %cst_115 {dimension_numbers = #tpu.dot_dimension_numbers<[1], [1], [0], [0], [0, 0, 1, 0], [], []>} : vector<10x16xf32>, vector<10x16xf32>, vector<10x10xf32> -> vector<10x10xf32>
    %cst_116 = arith.constant 2.500000e-01 : f32
    %344 = vector.broadcast %cst_116 : f32 to vector<10x10xf32>
    %345 = arith.mulf %343, %344 : vector<10x10xf32>
    %cst_117 = arith.constant -1.000000e+30 : f32
    %346 = vector.broadcast %cst_117 : f32 to vector<10x10xf32>
    %347 = arith.select %35, %345, %346 : vector<10x10xi1>, vector<10x10xf32>
    %cst_118 = arith.constant dense<0xFF800000> : vector<10xf32>
    %348 = vector.multi_reduction <maximumf>, %347, %cst_118 [1] : vector<10x10xf32> to vector<10xf32>
    %349 = vector.shape_cast %348 : vector<10xf32> to vector<10x1xf32>
    %350 = vector.broadcast %349 : vector<10x1xf32> to vector<10x10xf32>
    %351 = arith.subf %347, %350 : vector<10x10xf32>
    %352 = math.exp %351 : vector<10x10xf32>
    %cst_119 = arith.constant dense<0.000000e+00> : vector<10xf32>
    %353 = vector.multi_reduction <add>, %352, %cst_119 [1] : vector<10x10xf32> to vector<10xf32>
    %354 = vector.shape_cast %353 : vector<10xf32> to vector<10x1xf32>
    %355 = vector.broadcast %354 : vector<10x1xf32> to vector<10x10xf32>
    %356 = arith.divf %352, %355 : vector<10x10xf32>
    %357 = vector.extract_strided_slice %304 {offsets = [0, 32], sizes = [10, 16], strides = [1, 1]} : vector<10x128xf32> to vector<10x16xf32>
    %cst_120 = arith.constant dense<0.000000e+00> : vector<10x16xf32>
    %358 = tpu.matmul %356, %357, %cst_120 {dimension_numbers = #tpu.dot_dimension_numbers<[1], [0], [0], [1], [0, 0, 1, 1], [], []>} : vector<10x10xf32>, vector<10x16xf32>, vector<10x16xf32> -> vector<10x16xf32>
    %359 = vector.extract_strided_slice %302 {offsets = [0, 48], sizes = [10, 16], strides = [1, 1]} : vector<10x128xf32> to vector<10x16xf32>
    %360 = vector.extract_strided_slice %303 {offsets = [0, 48], sizes = [10, 16], strides = [1, 1]} : vector<10x128xf32> to vector<10x16xf32>
    %cst_121 = arith.constant dense<0.000000e+00> : vector<10x10xf32>
    %361 = tpu.matmul %359, %360, %cst_121 {dimension_numbers = #tpu.dot_dimension_numbers<[1], [1], [0], [0], [0, 0, 1, 0], [], []>} : vector<10x16xf32>, vector<10x16xf32>, vector<10x10xf32> -> vector<10x10xf32>
    %cst_122 = arith.constant 2.500000e-01 : f32
    %362 = vector.broadcast %cst_122 : f32 to vector<10x10xf32>
    %363 = arith.mulf %361, %362 : vector<10x10xf32>
    %cst_123 = arith.constant -1.000000e+30 : f32
    %364 = vector.broadcast %cst_123 : f32 to vector<10x10xf32>
    %365 = arith.select %35, %363, %364 : vector<10x10xi1>, vector<10x10xf32>
    %cst_124 = arith.constant dense<0xFF800000> : vector<10xf32>
    %366 = vector.multi_reduction <maximumf>, %365, %cst_124 [1] : vector<10x10xf32> to vector<10xf32>
    %367 = vector.shape_cast %366 : vector<10xf32> to vector<10x1xf32>
    %368 = vector.broadcast %367 : vector<10x1xf32> to vector<10x10xf32>
    %369 = arith.subf %365, %368 : vector<10x10xf32>
    %370 = math.exp %369 : vector<10x10xf32>
    %cst_125 = arith.constant dense<0.000000e+00> : vector<10xf32>
    %371 = vector.multi_reduction <add>, %370, %cst_125 [1] : vector<10x10xf32> to vector<10xf32>
    %372 = vector.shape_cast %371 : vector<10xf32> to vector<10x1xf32>
    %373 = vector.broadcast %372 : vector<10x1xf32> to vector<10x10xf32>
    %374 = arith.divf %370, %373 : vector<10x10xf32>
    %375 = vector.extract_strided_slice %304 {offsets = [0, 48], sizes = [10, 16], strides = [1, 1]} : vector<10x128xf32> to vector<10x16xf32>
    %cst_126 = arith.constant dense<0.000000e+00> : vector<10x16xf32>
    %376 = tpu.matmul %374, %375, %cst_126 {dimension_numbers = #tpu.dot_dimension_numbers<[1], [0], [0], [1], [0, 0, 1, 1], [], []>} : vector<10x10xf32>, vector<10x16xf32>, vector<10x16xf32> -> vector<10x16xf32>
    %377 = vector.extract_strided_slice %302 {offsets = [0, 64], sizes = [10, 16], strides = [1, 1]} : vector<10x128xf32> to vector<10x16xf32>
    %378 = vector.extract_strided_slice %303 {offsets = [0, 64], sizes = [10, 16], strides = [1, 1]} : vector<10x128xf32> to vector<10x16xf32>
    %cst_127 = arith.constant dense<0.000000e+00> : vector<10x10xf32>
    %379 = tpu.matmul %377, %378, %cst_127 {dimension_numbers = #tpu.dot_dimension_numbers<[1], [1], [0], [0], [0, 0, 1, 0], [], []>} : vector<10x16xf32>, vector<10x16xf32>, vector<10x10xf32> -> vector<10x10xf32>
    %cst_128 = arith.constant 2.500000e-01 : f32
    %380 = vector.broadcast %cst_128 : f32 to vector<10x10xf32>
    %381 = arith.mulf %379, %380 : vector<10x10xf32>
    %cst_129 = arith.constant -1.000000e+30 : f32
    %382 = vector.broadcast %cst_129 : f32 to vector<10x10xf32>
    %383 = arith.select %35, %381, %382 : vector<10x10xi1>, vector<10x10xf32>
    %cst_130 = arith.constant dense<0xFF800000> : vector<10xf32>
    %384 = vector.multi_reduction <maximumf>, %383, %cst_130 [1] : vector<10x10xf32> to vector<10xf32>
    %385 = vector.shape_cast %384 : vector<10xf32> to vector<10x1xf32>
    %386 = vector.broadcast %385 : vector<10x1xf32> to vector<10x10xf32>
    %387 = arith.subf %383, %386 : vector<10x10xf32>
    %388 = math.exp %387 : vector<10x10xf32>
    %cst_131 = arith.constant dense<0.000000e+00> : vector<10xf32>
    %389 = vector.multi_reduction <add>, %388, %cst_131 [1] : vector<10x10xf32> to vector<10xf32>
    %390 = vector.shape_cast %389 : vector<10xf32> to vector<10x1xf32>
    %391 = vector.broadcast %390 : vector<10x1xf32> to vector<10x10xf32>
    %392 = arith.divf %388, %391 : vector<10x10xf32>
    %393 = vector.extract_strided_slice %304 {offsets = [0, 64], sizes = [10, 16], strides = [1, 1]} : vector<10x128xf32> to vector<10x16xf32>
    %cst_132 = arith.constant dense<0.000000e+00> : vector<10x16xf32>
    %394 = tpu.matmul %392, %393, %cst_132 {dimension_numbers = #tpu.dot_dimension_numbers<[1], [0], [0], [1], [0, 0, 1, 1], [], []>} : vector<10x10xf32>, vector<10x16xf32>, vector<10x16xf32> -> vector<10x16xf32>
    %395 = vector.extract_strided_slice %302 {offsets = [0, 80], sizes = [10, 16], strides = [1, 1]} : vector<10x128xf32> to vector<10x16xf32>
    %396 = vector.extract_strided_slice %303 {offsets = [0, 80], sizes = [10, 16], strides = [1, 1]} : vector<10x128xf32> to vector<10x16xf32>
    %cst_133 = arith.constant dense<0.000000e+00> : vector<10x10xf32>
    %397 = tpu.matmul %395, %396, %cst_133 {dimension_numbers = #tpu.dot_dimension_numbers<[1], [1], [0], [0], [0, 0, 1, 0], [], []>} : vector<10x16xf32>, vector<10x16xf32>, vector<10x10xf32> -> vector<10x10xf32>
    %cst_134 = arith.constant 2.500000e-01 : f32
    %398 = vector.broadcast %cst_134 : f32 to vector<10x10xf32>
    %399 = arith.mulf %397, %398 : vector<10x10xf32>
    %cst_135 = arith.constant -1.000000e+30 : f32
    %400 = vector.broadcast %cst_135 : f32 to vector<10x10xf32>
    %401 = arith.select %35, %399, %400 : vector<10x10xi1>, vector<10x10xf32>
    %cst_136 = arith.constant dense<0xFF800000> : vector<10xf32>
    %402 = vector.multi_reduction <maximumf>, %401, %cst_136 [1] : vector<10x10xf32> to vector<10xf32>
    %403 = vector.shape_cast %402 : vector<10xf32> to vector<10x1xf32>
    %404 = vector.broadcast %403 : vector<10x1xf32> to vector<10x10xf32>
    %405 = arith.subf %401, %404 : vector<10x10xf32>
    %406 = math.exp %405 : vector<10x10xf32>
    %cst_137 = arith.constant dense<0.000000e+00> : vector<10xf32>
    %407 = vector.multi_reduction <add>, %406, %cst_137 [1] : vector<10x10xf32> to vector<10xf32>
    %408 = vector.shape_cast %407 : vector<10xf32> to vector<10x1xf32>
    %409 = vector.broadcast %408 : vector<10x1xf32> to vector<10x10xf32>
    %410 = arith.divf %406, %409 : vector<10x10xf32>
    %411 = vector.extract_strided_slice %304 {offsets = [0, 80], sizes = [10, 16], strides = [1, 1]} : vector<10x128xf32> to vector<10x16xf32>
    %cst_138 = arith.constant dense<0.000000e+00> : vector<10x16xf32>
    %412 = tpu.matmul %410, %411, %cst_138 {dimension_numbers = #tpu.dot_dimension_numbers<[1], [0], [0], [1], [0, 0, 1, 1], [], []>} : vector<10x10xf32>, vector<10x16xf32>, vector<10x16xf32> -> vector<10x16xf32>
    %413 = vector.extract_strided_slice %302 {offsets = [0, 96], sizes = [10, 16], strides = [1, 1]} : vector<10x128xf32> to vector<10x16xf32>
    %414 = vector.extract_strided_slice %303 {offsets = [0, 96], sizes = [10, 16], strides = [1, 1]} : vector<10x128xf32> to vector<10x16xf32>
    %cst_139 = arith.constant dense<0.000000e+00> : vector<10x10xf32>
    %415 = tpu.matmul %413, %414, %cst_139 {dimension_numbers = #tpu.dot_dimension_numbers<[1], [1], [0], [0], [0, 0, 1, 0], [], []>} : vector<10x16xf32>, vector<10x16xf32>, vector<10x10xf32> -> vector<10x10xf32>
    %cst_140 = arith.constant 2.500000e-01 : f32
    %416 = vector.broadcast %cst_140 : f32 to vector<10x10xf32>
    %417 = arith.mulf %415, %416 : vector<10x10xf32>
    %cst_141 = arith.constant -1.000000e+30 : f32
    %418 = vector.broadcast %cst_141 : f32 to vector<10x10xf32>
    %419 = arith.select %35, %417, %418 : vector<10x10xi1>, vector<10x10xf32>
    %cst_142 = arith.constant dense<0xFF800000> : vector<10xf32>
    %420 = vector.multi_reduction <maximumf>, %419, %cst_142 [1] : vector<10x10xf32> to vector<10xf32>
    %421 = vector.shape_cast %420 : vector<10xf32> to vector<10x1xf32>
    %422 = vector.broadcast %421 : vector<10x1xf32> to vector<10x10xf32>
    %423 = arith.subf %419, %422 : vector<10x10xf32>
    %424 = math.exp %423 : vector<10x10xf32>
    %cst_143 = arith.constant dense<0.000000e+00> : vector<10xf32>
    %425 = vector.multi_reduction <add>, %424, %cst_143 [1] : vector<10x10xf32> to vector<10xf32>
    %426 = vector.shape_cast %425 : vector<10xf32> to vector<10x1xf32>
    %427 = vector.broadcast %426 : vector<10x1xf32> to vector<10x10xf32>
    %428 = arith.divf %424, %427 : vector<10x10xf32>
    %429 = vector.extract_strided_slice %304 {offsets = [0, 96], sizes = [10, 16], strides = [1, 1]} : vector<10x128xf32> to vector<10x16xf32>
    %cst_144 = arith.constant dense<0.000000e+00> : vector<10x16xf32>
    %430 = tpu.matmul %428, %429, %cst_144 {dimension_numbers = #tpu.dot_dimension_numbers<[1], [0], [0], [1], [0, 0, 1, 1], [], []>} : vector<10x10xf32>, vector<10x16xf32>, vector<10x16xf32> -> vector<10x16xf32>
    %431 = vector.extract_strided_slice %302 {offsets = [0, 112], sizes = [10, 16], strides = [1, 1]} : vector<10x128xf32> to vector<10x16xf32>
    %432 = vector.extract_strided_slice %303 {offsets = [0, 112], sizes = [10, 16], strides = [1, 1]} : vector<10x128xf32> to vector<10x16xf32>
    %cst_145 = arith.constant dense<0.000000e+00> : vector<10x10xf32>
    %433 = tpu.matmul %431, %432, %cst_145 {dimension_numbers = #tpu.dot_dimension_numbers<[1], [1], [0], [0], [0, 0, 1, 0], [], []>} : vector<10x16xf32>, vector<10x16xf32>, vector<10x10xf32> -> vector<10x10xf32>
    %cst_146 = arith.constant 2.500000e-01 : f32
    %434 = vector.broadcast %cst_146 : f32 to vector<10x10xf32>
    %435 = arith.mulf %433, %434 : vector<10x10xf32>
    %cst_147 = arith.constant -1.000000e+30 : f32
    %436 = vector.broadcast %cst_147 : f32 to vector<10x10xf32>
    %437 = arith.select %35, %435, %436 : vector<10x10xi1>, vector<10x10xf32>
    %cst_148 = arith.constant dense<0xFF800000> : vector<10xf32>
    %438 = vector.multi_reduction <maximumf>, %437, %cst_148 [1] : vector<10x10xf32> to vector<10xf32>
    %439 = vector.shape_cast %438 : vector<10xf32> to vector<10x1xf32>
    %440 = vector.broadcast %439 : vector<10x1xf32> to vector<10x10xf32>
    %441 = arith.subf %437, %440 : vector<10x10xf32>
    %442 = math.exp %441 : vector<10x10xf32>
    %cst_149 = arith.constant dense<0.000000e+00> : vector<10xf32>
    %443 = vector.multi_reduction <add>, %442, %cst_149 [1] : vector<10x10xf32> to vector<10xf32>
    %444 = vector.shape_cast %443 : vector<10xf32> to vector<10x1xf32>
    %445 = vector.broadcast %444 : vector<10x1xf32> to vector<10x10xf32>
    %446 = arith.divf %442, %445 : vector<10x10xf32>
    %447 = vector.extract_strided_slice %304 {offsets = [0, 112], sizes = [10, 16], strides = [1, 1]} : vector<10x128xf32> to vector<10x16xf32>
    %cst_150 = arith.constant dense<0.000000e+00> : vector<10x16xf32>
    %448 = tpu.matmul %446, %447, %cst_150 {dimension_numbers = #tpu.dot_dimension_numbers<[1], [0], [0], [1], [0, 0, 1, 1], [], []>} : vector<10x10xf32>, vector<10x16xf32>, vector<10x16xf32> -> vector<10x16xf32>
    %449 = tpu.concatenate %322, %340, %358, %376, %394, %412, %430, %448 in 1 : vector<10x16xf32>, vector<10x16xf32>, vector<10x16xf32>, vector<10x16xf32>, vector<10x16xf32>, vector<10x16xf32>, vector<10x16xf32>, vector<10x16xf32> -> vector<10x128xf32>
    %c1_151 = arith.constant 1 : index
    %c0_152 = arith.constant 0 : index
    %c0_153 = arith.constant 0 : index
    %450 = vector.load %arg2[%c1_151, %c0_152, %c0_153] : memref<2x128x32xf32, #tpu.memory_space<vmem>>, vector<1x128x32xf32>
    %451 = vector.shape_cast %450 : vector<1x128x32xf32> to vector<128x32xf32>
    %cst_154 = arith.constant dense<0.000000e+00> : vector<10x32xf32>
    %452 = tpu.matmul %449, %451, %cst_154 {dimension_numbers = #tpu.dot_dimension_numbers<[1], [0], [0], [1], [0, 0, 1, 1], [], []>} : vector<10x128xf32>, vector<128x32xf32>, vector<10x32xf32> -> vector<10x32xf32>
    %453 = vector.broadcast %273 : vector<1x32xf32> to vector<10x32xf32>
    %454 = arith.addf %452, %453 : vector<10x32xf32>
    %455 = arith.addf %454, %298 : vector<10x32xf32>
    %cst_155 = arith.constant dense<0.000000e+00> : vector<10xf32>
    %456 = vector.multi_reduction <add>, %455, %cst_155 [1] : vector<10x32xf32> to vector<10xf32>
    %457 = vector.shape_cast %456 : vector<10xf32> to vector<10x1xf32>
    %cst_156 = arith.constant 3.200000e+01 : f32
    %458 = vector.broadcast %cst_156 : f32 to vector<10x1xf32>
    %459 = arith.divf %457, %458 : vector<10x1xf32>
    %460 = vector.broadcast %459 : vector<10x1xf32> to vector<10x32xf32>
    %461 = arith.subf %455, %460 : vector<10x32xf32>
    %462 = arith.mulf %461, %461 : vector<10x32xf32>
    %cst_157 = arith.constant dense<0.000000e+00> : vector<10xf32>
    %463 = vector.multi_reduction <add>, %462, %cst_157 [1] : vector<10x32xf32> to vector<10xf32>
    %464 = vector.shape_cast %463 : vector<10xf32> to vector<10x1xf32>
    %cst_158 = arith.constant 3.200000e+01 : f32
    %465 = vector.broadcast %cst_158 : f32 to vector<10x1xf32>
    %466 = arith.divf %464, %465 : vector<10x1xf32>
    %467 = vector.broadcast %459 : vector<10x1xf32> to vector<10x32xf32>
    %468 = arith.subf %455, %467 : vector<10x32xf32>
    %cst_159 = arith.constant 9.99999974E-6 : f32
    %469 = vector.broadcast %cst_159 : f32 to vector<10x1xf32>
    %470 = arith.addf %466, %469 : vector<10x1xf32>
    %471 = math.rsqrt %470 : vector<10x1xf32>
    %472 = vector.broadcast %471 : vector<10x1xf32> to vector<10x32xf32>
    %473 = arith.mulf %468, %472 : vector<10x32xf32>
    %474 = vector.broadcast %274 : vector<1x32xf32> to vector<10x32xf32>
    %475 = arith.mulf %473, %474 : vector<10x32xf32>
    %476 = vector.broadcast %275 : vector<1x32xf32> to vector<10x32xf32>
    %477 = arith.addf %475, %476 : vector<10x32xf32>
    %c1_160 = arith.constant 1 : index
    %c0_161 = arith.constant 0 : index
    %c0_162 = arith.constant 0 : index
    %478 = vector.load %arg3[%c1_160, %c0_161, %c0_162] : memref<2x32x256xf32, #tpu.memory_space<vmem>>, vector<1x32x256xf32>
    %479 = vector.shape_cast %478 : vector<1x32x256xf32> to vector<32x256xf32>
    %cst_163 = arith.constant dense<0.000000e+00> : vector<10x256xf32>
    %480 = tpu.matmul %477, %479, %cst_163 {dimension_numbers = #tpu.dot_dimension_numbers<[1], [0], [0], [1], [0, 0, 1, 1], [], []>} : vector<10x32xf32>, vector<32x256xf32>, vector<10x256xf32> -> vector<10x256xf32>
    %c1_164 = arith.constant 1 : index
    %c0_165 = arith.constant 0 : index
    %c0_166 = arith.constant 0 : index
    %481 = vector.load %arg6[%c1_164, %c0_165, %c0_166] : memref<2x1x256xf32, #tpu.memory_space<vmem>>, vector<1x1x256xf32>
    %482 = vector.shape_cast %481 : vector<1x1x256xf32> to vector<1x256xf32>
    %483 = vector.broadcast %482 : vector<1x256xf32> to vector<10x256xf32>
    %484 = arith.addf %480, %483 : vector<10x256xf32>
    %485 = vector.extract_strided_slice %484 {offsets = [0, 0], sizes = [10, 128], strides = [1, 1]} : vector<10x256xf32> to vector<10x128xf32>
    %486 = vector.extract_strided_slice %484 {offsets = [0, 128], sizes = [10, 128], strides = [1, 1]} : vector<10x256xf32> to vector<10x128xf32>
    %cst_167 = arith.constant 5.000000e-01 : f32
    %487 = vector.broadcast %cst_167 : f32 to vector<10x128xf32>
    %488 = arith.mulf %487, %486 : vector<10x128xf32>
    %cst_168 = arith.constant 0.707106769 : f32
    %489 = vector.broadcast %cst_168 : f32 to vector<10x128xf32>
    %490 = arith.mulf %486, %489 : vector<10x128xf32>
    %491 = math.erf %490 : vector<10x128xf32>
    %cst_169 = arith.constant 1.000000e+00 : f32
    %492 = vector.broadcast %cst_169 : f32 to vector<10x128xf32>
    %493 = arith.addf %492, %491 : vector<10x128xf32>
    %494 = arith.mulf %488, %493 : vector<10x128xf32>
    %495 = arith.mulf %485, %494 : vector<10x128xf32>
    %c1_170 = arith.constant 1 : index
    %c0_171 = arith.constant 0 : index
    %c0_172 = arith.constant 0 : index
    %496 = vector.load %arg4[%c1_170, %c0_171, %c0_172] : memref<2x128x32xf32, #tpu.memory_space<vmem>>, vector<1x128x32xf32>
    %497 = vector.shape_cast %496 : vector<1x128x32xf32> to vector<128x32xf32>
    %cst_173 = arith.constant dense<0.000000e+00> : vector<10x32xf32>
    %498 = tpu.matmul %495, %497, %cst_173 {dimension_numbers = #tpu.dot_dimension_numbers<[1], [0], [0], [1], [0, 0, 1, 1], [], []>} : vector<10x128xf32>, vector<128x32xf32>, vector<10x32xf32> -> vector<10x32xf32>
    %499 = vector.broadcast %276 : vector<1x32xf32> to vector<10x32xf32>
    %500 = arith.addf %498, %499 : vector<10x32xf32>
    %501 = arith.addf %500, %477 : vector<10x32xf32>
    %c0_174 = arith.constant 0 : index
    %c0_175 = arith.constant 0 : index
    %502 = vector.load %arg7[%c0_174, %c0_175] : memref<160x80xf32, #tpu.memory_space<vmem>>, vector<160x80xf32>
    %cst_176 = arith.constant 0.000000e+00 : f32
    %503 = vector.broadcast %cst_176 : f32 to vector<2x80xf32>
    %504 = vector.extract_strided_slice %501 {offsets = [0, 0], sizes = [2, 32], strides = [1, 1]} : vector<10x32xf32> to vector<2x32xf32>
    %505 = vector.extract_strided_slice %502 {offsets = [0, 0], sizes = [32, 80], strides = [1, 1]} : vector<160x80xf32> to vector<32x80xf32>
    %cst_177 = arith.constant dense<0.000000e+00> : vector<2x80xf32>
    %506 = tpu.matmul %504, %505, %cst_177 {dimension_numbers = #tpu.dot_dimension_numbers<[1], [0], [0], [1], [0, 0, 1, 1], [], []>} : vector<2x32xf32>, vector<32x80xf32>, vector<2x80xf32> -> vector<2x80xf32>
    %507 = arith.addf %503, %506 : vector<2x80xf32>
    %508 = vector.extract_strided_slice %501 {offsets = [2, 0], sizes = [2, 32], strides = [1, 1]} : vector<10x32xf32> to vector<2x32xf32>
    %509 = vector.extract_strided_slice %502 {offsets = [32, 0], sizes = [32, 80], strides = [1, 1]} : vector<160x80xf32> to vector<32x80xf32>
    %cst_178 = arith.constant dense<0.000000e+00> : vector<2x80xf32>
    %510 = tpu.matmul %508, %509, %cst_178 {dimension_numbers = #tpu.dot_dimension_numbers<[1], [0], [0], [1], [0, 0, 1, 1], [], []>} : vector<2x32xf32>, vector<32x80xf32>, vector<2x80xf32> -> vector<2x80xf32>
    %511 = arith.addf %507, %510 : vector<2x80xf32>
    %512 = vector.extract_strided_slice %501 {offsets = [4, 0], sizes = [2, 32], strides = [1, 1]} : vector<10x32xf32> to vector<2x32xf32>
    %513 = vector.extract_strided_slice %502 {offsets = [64, 0], sizes = [32, 80], strides = [1, 1]} : vector<160x80xf32> to vector<32x80xf32>
    %cst_179 = arith.constant dense<0.000000e+00> : vector<2x80xf32>
    %514 = tpu.matmul %512, %513, %cst_179 {dimension_numbers = #tpu.dot_dimension_numbers<[1], [0], [0], [1], [0, 0, 1, 1], [], []>} : vector<2x32xf32>, vector<32x80xf32>, vector<2x80xf32> -> vector<2x80xf32>
    %515 = arith.addf %511, %514 : vector<2x80xf32>
    %516 = vector.extract_strided_slice %501 {offsets = [6, 0], sizes = [2, 32], strides = [1, 1]} : vector<10x32xf32> to vector<2x32xf32>
    %517 = vector.extract_strided_slice %502 {offsets = [96, 0], sizes = [32, 80], strides = [1, 1]} : vector<160x80xf32> to vector<32x80xf32>
    %cst_180 = arith.constant dense<0.000000e+00> : vector<2x80xf32>
    %518 = tpu.matmul %516, %517, %cst_180 {dimension_numbers = #tpu.dot_dimension_numbers<[1], [0], [0], [1], [0, 0, 1, 1], [], []>} : vector<2x32xf32>, vector<32x80xf32>, vector<2x80xf32> -> vector<2x80xf32>
    %519 = arith.addf %515, %518 : vector<2x80xf32>
    %520 = vector.extract_strided_slice %501 {offsets = [8, 0], sizes = [2, 32], strides = [1, 1]} : vector<10x32xf32> to vector<2x32xf32>
    %521 = vector.extract_strided_slice %502 {offsets = [128, 0], sizes = [32, 80], strides = [1, 1]} : vector<160x80xf32> to vector<32x80xf32>
    %cst_181 = arith.constant dense<0.000000e+00> : vector<2x80xf32>
    %522 = tpu.matmul %520, %521, %cst_181 {dimension_numbers = #tpu.dot_dimension_numbers<[1], [0], [0], [1], [0, 0, 1, 1], [], []>} : vector<2x32xf32>, vector<32x80xf32>, vector<2x80xf32> -> vector<2x80xf32>
    %523 = arith.addf %519, %522 : vector<2x80xf32>
    %c0_182 = arith.constant 0 : index
    %c0_183 = arith.constant 0 : index
    %524 = vector.load %arg8[%c0_182, %c0_183] : memref<1x80xf32, #tpu.memory_space<vmem>>, vector<1x80xf32>
    %525 = vector.broadcast %524 : vector<1x80xf32> to vector<2x80xf32>
    %526 = arith.addf %523, %525 : vector<2x80xf32>
    %c0_184 = arith.constant 0 : index
    %c0_185 = arith.constant 0 : index
    %527 = vector.load %arg9[%c0_184, %c0_185] : memref<80x40xf32, #tpu.memory_space<vmem>>, vector<80x40xf32>
    %cst_186 = arith.constant dense<0.000000e+00> : vector<2x40xf32>
    %528 = tpu.matmul %526, %527, %cst_186 {dimension_numbers = #tpu.dot_dimension_numbers<[1], [0], [0], [1], [0, 0, 1, 1], [], []>} : vector<2x80xf32>, vector<80x40xf32>, vector<2x40xf32> -> vector<2x40xf32>
    %c0_187 = arith.constant 0 : index
    %c0_188 = arith.constant 0 : index
    %529 = vector.load %arg10[%c0_187, %c0_188] : memref<1x40xf32, #tpu.memory_space<vmem>>, vector<1x40xf32>
    %530 = vector.broadcast %529 : vector<1x40xf32> to vector<2x40xf32>
    %531 = arith.addf %528, %530 : vector<2x40xf32>
    %c0_189 = arith.constant 0 : index
    %c0_190 = arith.constant 0 : index
    %532 = vector.load %arg11[%c0_189, %c0_190] : memref<40x1xf32, #tpu.memory_space<vmem>>, vector<40x1xf32>
    %cst_191 = arith.constant dense<0.000000e+00> : vector<2x1xf32>
    %533 = tpu.matmul %531, %532, %cst_191 {dimension_numbers = #tpu.dot_dimension_numbers<[1], [0], [0], [1], [0, 0, 1, 1], [], []>} : vector<2x40xf32>, vector<40x1xf32>, vector<2x1xf32> -> vector<2x1xf32>
    %c0_192 = arith.constant 0 : index
    %c0_193 = arith.constant 0 : index
    %534 = vector.load %arg12[%c0_192, %c0_193] : memref<1x1xf32, #tpu.memory_space<vmem>>, vector<1x1xf32>
    %535 = vector.broadcast %534 : vector<1x1xf32> to vector<2x1xf32>
    %536 = arith.addf %533, %535 : vector<2x1xf32>
    %c0_194 = arith.constant 0 : index
    %c0_195 = arith.constant 0 : index
    %537 = vector.load %arg13[%c0_194, %c0_195] : memref<2x1xf32, #tpu.memory_space<vmem>>, vector<2x1xf32>
    tpu.vector_store %arg13[%c0_194, %c0_195], %536 {strides = array<i32>} : memref<2x1xf32, #tpu.memory_space<vmem>>, vector<2x1xf32>,
    return
  }
}

</mosaic_0001>

<bundles_post_ra>
// kernel: tpu_custom_call.1
= control target key start
LH: loop header
LB: loop body
LE: loop exit
PB: predicated region body
PF: predicated region fallthrough
CT: control target
= control target key end

     0   :  { %vm92_vm0 = vcmask 261120   ;;  %vm96_vm1 = vcmask 254976   ;;  %v3734_v4 = vmov 32.0   ;;  %s3735_s19 = smov 112   ;;  %s3736_s20 = smov 80   ;;  %vm238_vm9 = vcmask 130048   ;;  %s5223_s0 = inlined_call_operand.vmem [shape: f32[10,32], index: 0, kind: input, shape index: {}]   ;;  %s5224_s1 = inlined_call_operand.vmem [shape: f32[2,32,384], index: 1, kind: input, shape index: {}]   ;;  %s5225_s5 = inlined_call_operand.vmem [shape: f32[2,6,32], index: 5, kind: input, shape index: {}]   ;;  %s5226_s2 = inlined_call_operand.vmem [shape: f32[2,128,32], index: 2, kind: input, shape index: {}]   ;;  %s5227_s3 = inlined_call_operand.vmem [shape: f32[2,32,256], index: 3, kind: input, shape index: {}]   ;;  %s5228_s6 = inlined_call_operand.vmem [shape: f32[2,1,256], index: 6, kind: input, shape index: {}]   ;;  %s5229_s4 = inlined_call_operand.vmem [shape: f32[2,128,32], index: 4, kind: input, shape index: {}]   ;;  %s5230_s7 = inlined_call_operand.vmem [shape: f32[160,80], index: 7, kind: input, shape index: {}]   ;;  %s5231_s8 = inlined_call_operand.vmem [shape: f32[1,80], index: 8, kind: input, shape index: {}]   ;;  %s5232_s10 = inlined_call_operand.vmem [shape: f32[1,40], index: 10, kind: input, shape index: {}]   ;;  %s5233_s9 = inlined_call_operand.vmem [shape: f32[80,40], index: 9, kind: input, shape index: {}]   ;;  %s5234_s11 = inlined_call_operand.vmem [shape: f32[40,1], index: 11, kind: input, shape index: {}]   ;;  %s5235_s12 = inlined_call_operand.<no memory space> [shape: f32[1,1], index: 12, kind: input, shape index: {}]   ;;  %s5236_s13 = inlined_call_operand.vmem [shape: f32[2,1], index: 13, kind: output, shape index: {}]  }
   0x1   :  { %v46_v0 = vld [vmem:[%s5223_s0] sm:$0xff]  ;;  %v47_v2 = vld [vmem:[%s5223_s0 + $0x8] sm:$0x3]  ;;  %3578 = vrcp.f32 %v3734_v4  ;;  %v161_v22 = vld [vmem:[%s5224_s1 + $0x50] sm:$0xff]  ;;  %s3737_s21 = smov 96   ;;  %vm334_vm10 = vcmask 1041408  }
   0x2   :  { %v93_v1 = vsel %vm92_vm0, %v46_v0, 0.0  ;;  %v97_v3 = vsel %vm96_vm1, %v47_v2, 0.0  ;;  %v160_v21 = vld [vmem:[%s5224_s1 + $0x48] sm:$0xff]  ;;  %v162_v23 = vld [vmem:[%s5224_s1 + $0x58] sm:$0xff]  ;;  %204 = vmatpush.msra.mxu1 %v161_v22  ;;  %v157_v24 = vld [vmem:[%s5224_s1 + $0x30] sm:$0xff]  ;;  %s3738_s22 = smov 64  }
   0x3   :  { %94 = vadd.xlane.f32.xlu0 %v93_v1  ;;  %181 = vmatpush.msra.mxu0 %v160_v21  ;;  %v158_v25 = vld [vmem:[%s5224_s1 + $0x38] sm:$0xff]  ;;  %v159_v26 = vld [vmem:[%s5224_s1 + $0x40] sm:$0xff]  ;;  %v156_v29 = vld [vmem:[%s5224_s1 + $0x28] sm:$0xff]  ;;  %s3739_s23 = smov 48   ;;  %s3740_s24 = smov 32   ;;  %vm5237_vm13 = vcmask 74752  }
   0x4   :  { %227 = vmatpush.msra.mxu2 %v162_v23  ;;  %205 = vmatpush.msra.mxu1 %v158_v25  ;;  %v154_v27 = vld [vmem:[%s5224_s1 + $0x18] sm:$0xff]  ;;  %v155_v28 = vld [vmem:[%s5224_s1 + $0x20] sm:$0xff]  ;;  %v152_v31 = vld [vmem:[%s5224_s1 + $0x8] sm:$0xff]  ;;  %s3741_s25 = smov 16   ;;  %vm278_vm14 = vcmask 80896  }
   0x5   :  { %182 = vmatpush.msra.mxu0 %v157_v24  ;;  %v151_v30 = vld [vmem:[%s5224_s1] sm:$0xff]  ;;  %v153_v32 = vld [vmem:[%s5224_s1 + $0x10] sm:$0xff] }
   0x6   :  { %228 = vmatpush.msra.mxu2 %v159_v26  ;;  %206 = vmatpush.msra.mxu1 %v155_v28  ;;  %v91_v44 = vld [vmem:[%s5225_s5] sm:$0x3f] }
   0x7   :  { %v3579_v5 = vpop.eup %3578  ;;  %183 = vmatpush.msra.mxu0 %v154_v27  ;;  %v145_v48 = vperm.slane %v91_v44, 0  ;;  %v148_v52 = vperm.slane %v91_v44, 1 }
   0x8   :  { %v101_v6 = vmul.f32 32.0, %v3579_v5  ;;  %vm105_vm2 = vweird.f32 %v3579_v5  ;;  %229 = vmatpush.msra.mxu2 %v156_v29  ;;  %207 = vmatpush.msra.mxu1 %v152_v31 }
   0x9   :  { %184 = vmatpush.msra.mxu0 %v151_v30 }
   0xa   :  { %v102_v7 = vsub.f32 1.0, %v101_v6  ;;  %230 = vmatpush.msra.mxu2 %v153_v32 }
   0xb   :  { %98 = vadd.xlane.f32.xlu0 %v97_v3 }
   0xc   :  { %v103_v8 = vmul.f32 %v3579_v5, %v102_v7 }
   0xe   :  { %v104_v9 = vadd.f32 %v3579_v5, %v103_v8 }
  0x10   :  { %v3820_v10 = vsel %vm105_vm2, %v3579_v5, %v104_v9 }
  0x76   :  { %v95_v11 = vpop.xlane.xlu0 %94 }
  0x77   :  { %v107_v12 = vmul.f32 %v3820_v10, %v95_v11 }
  0x79   :  { %v109_v13 = vsub.f32 %v46_v0, %v107_v12 }
  0x7b   :  { %v111_v14 = vmul.f32 %v109_v13, %v109_v13 }
  0x7d   :  { %v113_v15 = vsel %vm92_vm0, %v111_v14, 0.0 }
  0x7e   :  { %114 = vadd.xlane.f32.xlu1 %v113_v15  ;;  %v99_v16 = vpop.xlane.xlu0 %98 }
  0x7f   :  { %v108_v17 = vmul.f32 %v3820_v10, %v99_v16 }
  0x81   :  { %v3825_v18 = vsub.f32 %v47_v2, %v108_v17  ;;  %v48_v17 = vlaneseq }
  0x83   :  { %v112_v19 = vmul.f32 %v3825_v18, %v3825_v18  ;;  %v52_v21 = vand.u32 127, %v48_v17 }
  0x85   :  { %v116_v20 = vsel %vm96_vm1, %v112_v19, 0.0  ;;  %v81_v24 = vand.u32 1, %v52_v21 }
  0x86   :  { %117 = vadd.xlane.f32.xlu1 %v116_v20 }
  0xf1   :  { %v115_v33 = vpop.xlane.xlu1 %114 }
  0xf2   :  { %v119_v34 = vmul.f32 %v115_v33, %v3820_v10 }
  0xf4   :  { %v121_v35 = vadd.f32 1e-05, %v119_v34 }
  0xf6   :  { %3580 = vrsqrt.f32 %v121_v35  ;;  %vm129_vm4 = vweird.f32 %v121_v35 }
  0xf9   :  { %v118_v36 = vpop.xlane.xlu1 %117 }
  0xfa   :  { %v120_v37 = vmul.f32 %v118_v36, %v3820_v10 }
  0xfc   :  { %v3581_v38 = vpop.eup %3580  ;;  %v122_v39 = vadd.f32 1e-05, %v120_v37 }
  0xfd   :  { %v124_v40 = vmul.f32 %v3581_v38, %v121_v35  ;;  %vm130_vm3 = vweird.f32 %v3581_v38 }
  0xfe   :  { %3582 = vrsqrt.f32 %v122_v39  ;;  %vm131_vm5 = vmor %vm129_vm4, %vm130_vm3  ;;  %vm139_vm7 = vweird.f32 %v122_v39 }
  0xff   :  { %v125_v41 = vmul.f32 %v3581_v38, %v124_v40 }
 0x101   :  { %v126_v42 = vmul.f32 0.5, %v125_v41 }
 0x103   :  { %v127_v43 = vsub.f32 1.5, %v126_v42 }
 0x104   :  { %v3583_v45 = vpop.eup %3582 }
 0x105   :  { %v128_v46 = vmul.f32 %v3581_v38, %v127_v43  ;;  %v134_v47 = vmul.f32 %v3583_v45, %v122_v39  ;;  %vm140_vm6 = vweird.f32 %v3583_v45 }
 0x106   :  { %vm141_vm8 = vmor %vm139_vm7, %vm140_vm6 }
 0x107   :  { %v132_v49 = vsel %vm131_vm5, %v3581_v38, %v128_v46  ;;  %v135_v50 = vmul.f32 %v3583_v45, %v134_v47 }
 0x108   :  { %v143_v51 = vmul.f32 %v132_v49, %v109_v13 }
 0x109   :  { %v136_v53 = vmul.f32 0.5, %v135_v50 }
 0x10a   :  { %v146_v54 = vmul.f32 %v145_v48, %v143_v51 }
 0x10b   :  { %v137_v55 = vsub.f32 1.5, %v136_v53 }
 0x10c   :  { %v3871_v56 = vadd.f32 %v148_v52, %v146_v54 }
 0x10d   :  { %v138_v57 = vmul.f32 %v3583_v45, %v137_v55 }
 0x10e   :  { %3348 = vmatmul.msk.f32.vlgmr.msra.gmra.mxu0 %vm92_vm0, %v3871_v56  ;;  %3350 = vmatmul.msk.f32.vlgmr.msra.gmra.mxu1 %vm92_vm0, %v3871_v56 }
 0x10f   :  { %v142_v58 = vsel %vm141_vm8, %v3583_v45, %v138_v57  ;;  %3352 = vmatmul.msk.f32.vlgmr.msra.gmra.mxu2 %vm92_vm0, %v3871_v56 }
 0x110   :  { %v144_v59 = vmul.f32 %v142_v58, %v3825_v18  ;;  %v49_v18 = vshrl.u32 %v48_v17, 7 }
 0x112   :  { %v147_v60 = vmul.f32 %v145_v48, %v144_v59  ;;  %v50_v23 = vadd.s32 8, %v49_v18  ;;  %v57_v25 = vand.u32 1, %v49_v18 }
 0x114   :  { %v3880_v61 = vadd.f32 %v148_v52, %v147_v60  ;;  %v64_v26 = vand.u32 1, %v50_v23  ;;  %vm3958_vm11 = vcmp.eq.s32.totalorder %v57_v25, %v81_v24 }
 0x116   :  { %3349 = vmatmul.msk.f32.gmra.mxu0 %vm92_vm0, %v3880_v61  ;;  %3351 = vmatmul.msk.f32.gmra.mxu1 %vm92_vm0, %v3880_v61  ;;  %vm3964_vm12 = vcmp.eq.s32.totalorder %v64_v26, %v81_v24 }
 0x117   :  { %3353 = vmatmul.msk.f32.gmra.mxu2 %vm92_vm0, %v3880_v61 }
 0x18b   :  { %v186_v62 = vpop.f32.mrf.mxu0  ;;  %v209_v63 = vpop.f32.mrf.mxu1 }
 0x18c   :  { %365 = vrot.lane.b32.xlu2 %v209_v63, %s3735_s19  ;;  %361 = vrot.lane.b32.xlu0 %v186_v62, %s3735_s19 }
 0x18d   :  { %616 = vrot.lane.b32.xlu1 %v186_v62, %s3736_s20 }
 0x192   :  { %v3891_v0 = vpop.f32.mrf.mxu2 }
 0x193   :  { %v189_v1 = vpop.f32.mrf.mxu0  ;;  %v212_v2 = vpop.f32.mrf.mxu1 }
 0x194   :  { %493 = vrot.lane.b32.xlu2 %v209_v63, %s3737_s21  ;;  %620 = vrot.lane.b32.xlu0 %v209_v63, %s3736_s20 }
 0x195   :  { %3354 = vmatpush.xpose.msk.msrb.mxu2 %vm238_vm9, %v212_v2  ;;  %3545 = vmatpush.xpose.msk.msra.mxu3 %vm238_vm9, %v212_v2 }
 0x196   :  { %363 = vrot.lane.b32.xlu1 %v189_v1, %s3735_s19 }
 0x199   :  { %3355 = vmatpush.xpose.msk.msrb.mxu2 %vm238_vm9, %v209_v63  ;;  %3546 = vmatpush.xpose.msk.msra.mxu3 %vm238_vm9, %v209_v63 }
 0x19a   :  { %v3900_v3 = vpop.f32.mrf.mxu2 }
 0x19b   :  { %3358 = vmatpush.msk.msrb.mxu0 %vm334_vm10, %v3900_v3 }
 0x19c   :  { %3356 = vmatmul.msk.f32.vlgmr.msrb.gmra.mxu2 %vm238_vm9, %v186_v62  ;;  %3357 = vmatmul.msk.f32.vlgmr.msra.gmra.mxu3 %vm238_vm9, %v189_v1 }
 0x19d   :  { %489 = vrot.lane.b32.xlu2 %v186_v62, %s3737_s21  ;;  %743 = vrot.lane.b32.xlu0 %v186_v62, %s3738_s22 }
 0x19e   :  { %353 = vmatpush.msrb.mxu0 %v3891_v0  ;;  %874 = vrot.lane.b32.xlu1 %v209_v63, %s3739_s23 }
 0x1a5   :  { %367 = vrot.lane.b32.xlu2 %v212_v2, %s3735_s19  ;;  %491 = vrot.lane.b32.xlu0 %v189_v1, %s3737_s21 }
 0x1a6   :  { %749 = vrot.lane.b32.xlu1 %v212_v2, %s3738_s22 }
 0x1ad   :  { %495 = vrot.lane.b32.xlu2 %v212_v2, %s3737_s21  ;;  %876 = vrot.lane.b32.xlu0 %v212_v2, %s3739_s23 }
 0x1ae   :  { %745 = vrot.lane.b32.xlu1 %v189_v1, %s3738_s22 }
 0x1b5   :  { %622 = vrot.lane.b32.xlu2 %v212_v2, %s3736_s20  ;;  %1001 = vrot.lane.b32.xlu0 %v209_v63, %s3740_s24 }
 0x1b6   :  { %1130 = vrot.lane.b32.xlu1 %v212_v2, %s3741_s25 }
 0x1bd   :  { %747 = vrot.lane.b32.xlu2 %v209_v63, %s3738_s22  ;;  %872 = vrot.lane.b32.xlu0 %v189_v1, %s3739_s23 }
 0x1be   :  { %997 = vrot.lane.b32.xlu1 %v186_v62, %s3740_s24 }
 0x1c5   :  { %618 = vrot.lane.b32.xlu2 %v189_v1, %s3736_s20  ;;  %1124 = vrot.lane.b32.xlu0 %v186_v62, %s3741_s25 }
 0x1c6   :  { %1126 = vrot.lane.b32.xlu1 %v189_v1, %s3741_s25 }
 0x1cd   :  { %870 = vrot.lane.b32.xlu2 %v186_v62, %s3739_s23  ;;  %580 = vrot.lane.b32.xlu0 %v3891_v0, %s3737_s21 }
 0x1ce   :  { %707 = vrot.lane.b32.xlu1 %v3891_v0, %s3736_s20 }
 0x1d5   :  { %1003 = vrot.lane.b32.xlu2 %v212_v2, %s3740_s24  ;;  %455 = vrot.lane.b32.xlu0 %v3900_v3, %s3735_s19 }
 0x1d6   :  { %961 = vrot.lane.b32.xlu1 %v3891_v0, %s3739_s23 }
 0x1dd   :  { %1128 = vrot.lane.b32.xlu2 %v209_v63, %s3741_s25 }
 0x1de   :  { %582 = vrot.lane.b32.xlu1 %v3900_v3, %s3737_s21 }
 0x1e5   :  { %999 = vrot.lane.b32.xlu2 %v189_v1, %s3740_s24 }
 0x1e6   :  { %v366_v4 = vpop.permute.xlu2 %365 }
 0x1ed   :  { %453 = vrot.lane.b32.xlu2 %v3891_v0, %s3735_s19 }
 0x1ee   :  { %v494_v5 = vpop.permute.xlu2 %493 }
 0x1f5   :  { %709 = vrot.lane.b32.xlu2 %v3900_v3, %s3736_s20 }
 0x1f7   :  { %v490_v6 = vpop.permute.xlu2 %489 }
 0x1fd   :  { %963 = vrot.lane.b32.xlu2 %v3900_v3, %s3739_s23 }
 0x1fe   :  { %v362_v7 = vpop.permute.xlu0 %361 }
 0x1ff   :  { %v368_v8 = vpop.permute.xlu2 %367  ;;  %v617_v9 = vpop.permute.xlu1 %616 }
 0x200   :  { %3361 = vmatpush.xpose.msk.msrb.mxu1 %vm238_vm9, %v368_v8 }
 0x204   :  { %3362 = vmatpush.xpose.msk.msrb.mxu1 %vm238_vm9, %v366_v4 }
 0x206   :  { %v621_v11 = vpop.permute.xlu0 %620 }
 0x207   :  { %v496_v12 = vpop.permute.xlu2 %495  ;;  %3363 = vmatmul.msk.f32.vlgmr.msrb.gmra.mxu1 %vm238_vm9, %v362_v7 }
 0x208   :  { %v364_v13 = vpop.permute.xlu1 %363  ;;  %3368 = vmatpush.xpose.msk.msrb.mxu3 %vm238_vm9, %v496_v12 }
 0x20c   :  { %3369 = vmatpush.xpose.msk.msrb.mxu3 %vm238_vm9, %v494_v5 }
 0x20f   :  { %v623_v14 = vpop.permute.xlu2 %622  ;;  %3370 = vmatmul.msk.f32.vlgmr.msrb.gmra.mxu3 %vm238_vm9, %v490_v6  ;;  %3364 = vmatmul.msk.f32.gmra.mxu1 %vm238_vm9, %v364_v13  ;;  %v744_v15 = vpop.permute.xlu0 %743 }
 0x210   :  { %v875_v16 = vpop.permute.xlu1 %874  ;;  %3375 = vmatpush.xpose.msk.msra.mxu1 %vm238_vm9, %v623_v14 }
 0x214   :  { %3376 = vmatpush.xpose.msk.msra.mxu1 %vm238_vm9, %v621_v11 }
 0x217   :  { %v748_v19 = vpop.permute.xlu2 %747  ;;  %3377 = vmatmul.msk.f32.vlgmr.msra.gmra.mxu1 %vm238_vm9, %v617_v9  ;;  %v492_v20 = vpop.permute.xlu0 %491 }
 0x218   :  { %v750_v22 = vpop.permute.xlu1 %749  ;;  %3371 = vmatmul.msk.f32.gmra.mxu3 %vm238_vm9, %v492_v20 }
 0x219   :  { %3382 = vmatpush.xpose.msk.msra.mxu3 %vm238_vm9, %v750_v22 }
 0x21d   :  { %3383 = vmatpush.xpose.msk.msra.mxu3 %vm238_vm9, %v748_v19 }
 0x21f   :  { %v268_v27 = vpop.f32.mrf.mxu2  ;;  %v619_v28 = vpop.permute.xlu2 %618 }
 0x220   :  { %v274_v30 = vmul.f32 0.25, %v268_v27  ;;  %v271_v31 = vpop.f32.mrf.mxu3  ;;  %v746_v32 = vpop.permute.xlu1 %745  ;;  %3378 = vmatmul.msk.f32.gmra.mxu1 %vm238_vm9, %v619_v28  ;;  %3384 = vmatmul.msk.f32.vlgmr.msra.gmra.mxu3 %vm238_vm9, %v744_v15 }
 0x221   :  { %v275_v34 = vmul.f32 0.25, %v271_v31  ;;  %v877_v35 = vpop.permute.xlu0 %876 }
 0x222   :  { %3389 = vmatpush.xpose.msk.msrb.mxu1 %vm238_vm9, %v877_v35  ;;  %v3971_v36 = vsel %vm3958_vm11, %v274_v30, -1e+30 }
 0x223   :  { %v3975_v37 = vsel %vm3964_vm12, %v275_v34, -1e+30  ;;  %v279_v39 = vsel %vm278_vm14, %v3971_v36, -inf }
 0x224   :  { %v283_v38 = vsel %vm5237_vm13, %v3975_v37, -inf }
 0x225   :  { %284 = vmax.xlane.f32.xlu0 %v283_v38 }
 0x226   :  { %3390 = vmatpush.xpose.msk.msrb.mxu1 %vm238_vm9, %v875_v16  ;;  %280 = vmax.xlane.f32.xlu2 %v279_v39 }
 0x227   :  { %v871_v40 = vpop.permute.xlu2 %870 }
 0x228   :  { %v1131_v41 = vpop.permute.xlu1 %1130  ;;  %3385 = vmatmul.msk.f32.gmra.mxu3 %vm238_vm9, %v746_v32 }
 0x229   :  { %v1002_v42 = vpop.permute.xlu0 %1001  ;;  %3391 = vmatmul.msk.f32.vlgmr.msrb.gmra.mxu1 %vm238_vm9, %v871_v40 }
 0x22a   :  { %3403 = vmatpush.xpose.msk.msra.mxu1 %vm238_vm9, %v1131_v41 }
 0x22f   :  { %v1004_v43 = vpop.permute.xlu2 %1003 }
 0x230   :  { %v998_v44 = vpop.permute.xlu1 %997  ;;  %3396 = vmatpush.xpose.msk.msrb.mxu3 %vm238_vm9, %v1004_v43 }
 0x231   :  { %v873_v45 = vpop.permute.xlu0 %872 }
 0x232   :  { %3392 = vmatmul.msk.f32.gmra.mxu1 %vm238_vm9, %v873_v45 }
 0x234   :  { %3397 = vmatpush.xpose.msk.msrb.mxu3 %vm238_vm9, %v1002_v42 }
 0x237   :  { %v1129_v46 = vpop.permute.xlu2 %1128  ;;  %3398 = vmatmul.msk.f32.vlgmr.msrb.gmra.mxu3 %vm238_vm9, %v998_v44 }
 0x238   :  { %v1127_v47 = vpop.permute.xlu1 %1126  ;;  %3404 = vmatpush.xpose.msk.msra.mxu1 %vm238_vm9, %v1129_v46 }
 0x239   :  { %v1125_v48 = vpop.permute.xlu0 %1124 }
 0x23b   :  { %3405 = vmatmul.msk.f32.vlgmr.msra.gmra.mxu1 %vm238_vm9, %v1125_v48 }
 0x23f   :  { %v1000_v49 = vpop.permute.xlu2 %999 }
 0x240   :  { %v708_v50 = vpop.permute.xlu1 %707  ;;  %3399 = vmatmul.msk.f32.gmra.mxu3 %vm238_vm9, %v1000_v49 }
 0x241   :  { %v581_v51 = vpop.permute.xlu0 %580 }
 0x243   :  { %3406 = vmatmul.msk.f32.gmra.mxu1 %vm238_vm9, %v1127_v47 }
 0x247   :  { %v454_v52 = vpop.permute.xlu2 %453 }
 0x248   :  { %v3993_v53 = vpop.permute.xlu1 %961 }
 0x249   :  { %v456_v54 = vpop.permute.xlu0 %455 }
 0x24a   :  { %3365 = vmatpush.msk.msra.mxu2 %vm334_vm10, %v456_v54 }
 0x24c   :  { %481 = vmatpush.msra.mxu2 %v454_v52 }
 0x24f   :  { %v710_v55 = vpop.permute.xlu2 %709 }
 0x250   :  { %v583_v57 = vpop.permute.xlu1 %582  ;;  %3379 = vmatpush.msk.msrb.mxu2 %vm334_vm10, %v710_v55 }
 0x251   :  { %3372 = vmatpush.msk.msra.mxu0 %vm334_vm10, %v583_v57 }
 0x252   :  { %735 = vmatpush.msrb.mxu2 %v708_v50 }
 0x253   :  { %608 = vmatpush.msra.mxu0 %v581_v51 }
 0x257   :  { %v4004_v4 = vpop.permute.xlu2 %963 }
 0x284   :  { %v394_v58 = vpop.f32.mrf.mxu1 }
 0x285   :  { %v400_v59 = vmul.f32 0.25, %v394_v58 }
 0x287   :  { %v4000_v60 = vsel %vm3958_vm11, %v400_v59, -1e+30 }
 0x288   :  { %v404_v62 = vsel %vm278_vm14, %v4000_v60, -inf }
 0x289   :  { %405 = vmax.xlane.f32.xlu0 %v404_v62 }
 0x28c   :  { %v397_v63 = vpop.f32.mrf.mxu1 }
 0x28d   :  { %v401_v7 = vmul.f32 0.25, %v397_v63 }
 0x28f   :  { %v4014_v11 = vsel %vm3964_vm12, %v401_v7, -1e+30 }
 0x290   :  { %v407_v14 = vsel %vm5237_vm13, %v4014_v11, -inf }
 0x292   :  { %v522_v1 = vpop.f32.mrf.mxu3 }
 0x293   :  { %v528_v2 = vmul.f32 0.25, %v522_v1 }
 0x294   :  { %v649_v8 = vpop.f32.mrf.mxu1 }
 0x295   :  { %v4008_v5 = vsel %vm3958_vm11, %v528_v2, -1e+30  ;;  %v655_v18 = vmul.f32 0.25, %v649_v8 }
 0x296   :  { %v532_v6 = vsel %vm278_vm14, %v4008_v5, -inf }
 0x297   :  { %533 = vmax.xlane.f32.xlu1 %v532_v6  ;;  %v4027_v24 = vsel %vm3958_vm11, %v655_v18, -1e+30 }
 0x298   :  { %v285_v22 = vpop.xlane.xlu0 %284  ;;  %v659_v28 = vsel %vm278_vm14, %v4027_v24, -inf }
 0x299   :  { %v281_v12 = vpop.xlane.xlu2 %280  ;;  %v287_v26 = vsub.f32 %v3975_v37, %v285_v22 }
 0x29a   :  { %v286_v16 = vsub.f32 %v3971_v36, %v281_v12 }
 0x29b   :  { %v525_v9 = vpop.f32.mrf.mxu3  ;;  %v290_v31 = vmul.f32 1.442695, %v287_v26 }
 0x29c   :  { %v529_v13 = vmul.f32 0.25, %v525_v9  ;;  %v288_v20 = vmul.f32 1.442695, %v286_v16 }
 0x29d   :  { %v652_v19 = vpop.f32.mrf.mxu1 }
 0x29e   :  { %v4020_v15 = vsel %vm3964_vm12, %v529_v13, -1e+30  ;;  %3584 = vpow2.f32 %v288_v20  ;;  %v656_v30 = vmul.f32 0.25, %v652_v19 }
 0x29f   :  { %408 = vmax.xlane.f32.xlu1 %v407_v14  ;;  %v535_v17 = vsel %vm5237_vm13, %v4020_v15, -inf  ;;  %3586 = vpow2.f32 %v290_v31 }
 0x2a0   :  { %536 = vmax.xlane.f32.xlu2 %v535_v17  ;;  %v4040_v36 = vsel %vm3964_vm12, %v656_v30, -1e+30 }
 0x2a1   :  { %v662_v39 = vsel %vm5237_vm13, %v4040_v36, -inf }
 0x2a3   :  { %v776_v21 = vpop.f32.mrf.mxu3 }
 0x2a4   :  { %v782_v23 = vmul.f32 0.25, %v776_v21  ;;  %v4042_v38 = vpop.eup %3584 }
 0x2a5   :  { %v292_v42 = vsel %vm278_vm14, %v4042_v38, 0.0  ;;  %v4058_v44 = vpop.eup %3586 }
 0x2a6   :  { %v4031_v25 = vsel %vm3958_vm11, %v782_v23, -1e+30  ;;  %v903_v34 = vpop.f32.mrf.mxu1  ;;  %v295_v47 = vsel %vm5237_vm13, %v4058_v44, 0.0 }
 0x2a7   :  { %v786_v27 = vsel %vm278_vm14, %v4031_v25, -inf  ;;  %v909_v41 = vmul.f32 0.25, %v903_v34 }
 0x2a8   :  { %787 = vmax.xlane.f32.xlu0 %v786_v27  ;;  %660 = vmax.xlane.f32.xlu2 %v659_v28 }
 0x2a9   :  { %v4056_v43 = vsel %vm3958_vm11, %v909_v41, -1e+30 }
 0x2aa   :  { %v913_v46 = vsel %vm278_vm14, %v4056_v43, -inf }
 0x2ab   :  { %v779_v32 = vpop.f32.mrf.mxu3 }
 0x2ac   :  { %v783_v35 = vmul.f32 0.25, %v779_v32 }
 0x2ae   :  { %v4046_v37 = vsel %vm3964_vm12, %v783_v35, -1e+30 }
 0x2af   :  { %v789_v40 = vsel %vm5237_vm13, %v4046_v37, -inf  ;;  %v906_v45 = vpop.f32.mrf.mxu1 }
 0x2b0   :  { %663 = vmax.xlane.f32.xlu0 %v662_v39  ;;  %790 = vmax.xlane.f32.xlu1 %v789_v40  ;;  %v910_v48 = vmul.f32 0.25, %v906_v45 }
 0x2b1   :  { %293 = vadd.xlane.f32.xlu2 %v292_v42 }
 0x2b2   :  { %v4070_v52 = vsel %vm3964_vm12, %v910_v48, -1e+30 }
 0x2b3   :  { %v916_v55 = vsel %vm5237_vm13, %v4070_v52, -inf }
 0x2b8   :  { %914 = vmax.xlane.f32.xlu1 %v913_v46  ;;  %v1157_v57 = vpop.f32.mrf.mxu1 }
 0x2b9   :  { %296 = vadd.xlane.f32.xlu2 %v295_v47  ;;  %v1163_v1 = vmul.f32 0.25, %v1157_v57 }
 0x2ba   :  { %v1030_v49 = vpop.f32.mrf.mxu3 }
 0x2bb   :  { %v1036_v50 = vmul.f32 0.25, %v1030_v49  ;;  %v4084_v2 = vsel %vm3958_vm11, %v1163_v1, -1e+30 }
 0x2bc   :  { %v1167_v7 = vsel %vm278_vm14, %v4084_v2, -inf }
 0x2bd   :  { %v4066_v51 = vsel %vm3958_vm11, %v1036_v50, -1e+30 }
 0x2be   :  { %v1040_v54 = vsel %vm278_vm14, %v4066_v51, -inf }
 0x2c0   :  { %1041 = vmax.xlane.f32.xlu1 %v1040_v54  ;;  %v1160_v6 = vpop.f32.mrf.mxu1 }
 0x2c1   :  { %917 = vmax.xlane.f32.xlu2 %v916_v55  ;;  %v1164_v8 = vmul.f32 0.25, %v1160_v6 }
 0x2c3   :  { %v1033_v58 = vpop.f32.mrf.mxu3  ;;  %v4090_v9 = vsel %vm3964_vm12, %v1164_v8, -1e+30 }
 0x2c4   :  { %v1037_v59 = vmul.f32 0.25, %v1033_v58  ;;  %v1170_v12 = vsel %vm5237_vm13, %v4090_v9, -inf }
 0x2c6   :  { %v4078_v62 = vsel %vm3964_vm12, %v1037_v59, -1e+30 }
 0x2c7   :  { %v1043_v63 = vsel %vm5237_vm13, %v4078_v62, -inf }
 0x2c8   :  { %1044 = vmax.xlane.f32.xlu0 %v1043_v63 }
 0x2d0   :  { %1168 = vmax.xlane.f32.xlu0 %v1167_v7 }
 0x2d8   :  { %1171 = vmax.xlane.f32.xlu0 %v1170_v12 }
 0x2fc   :  { %v406_v13 = vpop.xlane.xlu0 %405 }
 0x2fd   :  { %v410_v14 = vsub.f32 %v4000_v60, %v406_v13 }
 0x2ff   :  { %v412_v16 = vmul.f32 1.442695, %v410_v14 }
 0x301   :  { %3588 = vpow2.f32 %v412_v16 }
 0x307   :  { %v4095_v17 = vpop.eup %3588 }
 0x308   :  { %v416_v18 = vsel %vm278_vm14, %v4095_v17, 0.0 }
 0x309   :  { %417 = vadd.xlane.f32.xlu2 %v416_v18 }
 0x30a   :  { %v534_v19 = vpop.xlane.xlu1 %533 }
 0x30b   :  { %v538_v20 = vsub.f32 %v4008_v5, %v534_v19 }
 0x30d   :  { %v540_v21 = vmul.f32 1.442695, %v538_v20 }
 0x30f   :  { %3590 = vpow2.f32 %v540_v21 }
 0x312   :  { %v409_v22 = vpop.xlane.xlu1 %408 }
 0x313   :  { %v411_v23 = vsub.f32 %v4014_v11, %v409_v22  ;;  %v537_v26 = vpop.xlane.xlu2 %536 }
 0x314   :  { %v539_v27 = vsub.f32 %v4020_v15, %v537_v26 }
 0x315   :  { %v4102_v60 = vpop.eup %3590  ;;  %v414_v28 = vmul.f32 1.442695, %v411_v23 }
 0x316   :  { %v542_v30 = vmul.f32 1.442695, %v539_v27  ;;  %v544_v31 = vsel %vm278_vm14, %v4102_v60, 0.0 }
 0x317   :  { %3592 = vpow2.f32 %v414_v28  ;;  %545 = vadd.xlane.f32.xlu1 %v544_v31 }
 0x318   :  { %3594 = vpow2.f32 %v542_v30 }
 0x31b   :  { %v661_v32 = vpop.xlane.xlu2 %660  ;;  %v788_v5 = vpop.xlane.xlu0 %787 }
 0x31c   :  { %v665_v34 = vsub.f32 %v4027_v24, %v661_v32  ;;  %v792_v35 = vsub.f32 %v4031_v25, %v788_v5 }
 0x31d   :  { %v4108_v11 = vpop.eup %3592 }
 0x31e   :  { %v4110_v39 = vpop.eup %3594  ;;  %v667_v15 = vmul.f32 1.442695, %v665_v34  ;;  %v794_v40 = vmul.f32 1.442695, %v792_v35  ;;  %v419_v41 = vsel %vm5237_vm13, %v4108_v11, 0.0 }
 0x31f   :  { %420 = vadd.xlane.f32.xlu1 %v419_v41  ;;  %v547_v42 = vsel %vm5237_vm13, %v4110_v39, 0.0 }
 0x320   :  { %3596 = vpow2.f32 %v667_v15  ;;  %548 = vadd.xlane.f32.xlu0 %v547_v42 }
 0x321   :  { %3598 = vpow2.f32 %v794_v40 }
 0x323   :  { %v791_v45 = vpop.xlane.xlu1 %790  ;;  %v664_v24 = vpop.xlane.xlu0 %663 }
 0x324   :  { %v793_v25 = vsub.f32 %v4046_v37, %v791_v45  ;;  %v294_v46 = vpop.xlane.xlu2 %293  ;;  %v666_v47 = vsub.f32 %v4040_v36, %v664_v24 }
 0x325   :  { %3600 = vrcp.f32 %v294_v46  ;;  %v307_v12 = vand.u32 2147483647, %v294_v46  ;;  %v309_v13 = vand.u32 2147483648, %v294_v46  ;;  %vm303_vm2 = vweird.f32 %v294_v46 }
 0x326   :  { %v4118_v48 = vpop.eup %3596  ;;  %v796_v49 = vmul.f32 1.442695, %v793_v25  ;;  %v669_v50 = vmul.f32 1.442695, %v666_v47 }
 0x327   :  { %v4120_v54 = vpop.eup %3598  ;;  %v671_v55 = vsel %vm278_vm14, %v4118_v48, 0.0  ;;  %v310_v20 = vor.u32 1.1754944e-38, %v309_v13  ;;  %vm308_vm4 = vcmp.eq.f32.partialorder %v307_v12, 8.507059e+37 }
 0x328   :  { %3602 = vpow2.f32 %v796_v49  ;;  %672 = vadd.xlane.f32.xlu1 %v671_v55  ;;  %v798_v57 = vsel %vm278_vm14, %v4120_v54, 0.0 }
 0x329   :  { %3604 = vpow2.f32 %v669_v50  ;;  %799 = vadd.xlane.f32.xlu2 %v798_v57 }
 0x32b   :  { %v3601_v37 = vpop.eup %3600  ;;  %v915_v58 = vpop.xlane.xlu1 %914 }
 0x32c   :  { %v299_v36 = vmul.f32 %v3601_v37, %v294_v46  ;;  %v919_v59 = vsub.f32 %v4056_v43, %v915_v58  ;;  %v297_v63 = vpop.xlane.xlu2 %296  ;;  %vm304_vm15 = vweird.f32 %v3601_v37 }
 0x32d   :  { %3606 = vrcp.f32 %v297_v63  ;;  %vm305_vm3 = vmor %vm303_vm2, %vm304_vm15  ;;  %v324_v35 = vand.u32 2147483648, %v297_v63  ;;  %vm318_vm6 = vweird.f32 %v297_v63 }
 0x32e   :  { %v4127_v1 = vpop.eup %3602  ;;  %v300_v6 = vsub.f32 1.0, %v299_v36  ;;  %v921_v7 = vmul.f32 1.442695, %v919_v59 }
 0x32f   :  { %v4129_v8 = vpop.eup %3604  ;;  %v801_v14 = vsel %vm5237_vm13, %v4127_v1, 0.0  ;;  %v325_v42 = vor.u32 1.1754944e-38, %v324_v35 }
 0x330   :  { %v301_v16 = vmul.f32 %v3601_v37, %v300_v6  ;;  %3608 = vpow2.f32 %v921_v7  ;;  %v674_v18 = vsel %vm5237_vm13, %v4129_v8, 0.0 }
 0x331   :  { %802 = vadd.xlane.f32.xlu2 %v801_v14  ;;  %675 = vadd.xlane.f32.xlu1 %v674_v18 }
 0x332   :  { %v302_v43 = vadd.f32 %v3601_v37, %v301_v16 }
 0x333   :  { %v3607_v19 = vpop.eup %3606  ;;  %v1042_v21 = vpop.xlane.xlu1 %1041 }
 0x334   :  { %v314_v22 = vmul.f32 %v3607_v19, %v297_v63  ;;  %v1046_v23 = vsub.f32 %v4066_v51, %v1042_v21  ;;  %v918_v26 = vpop.xlane.xlu2 %917  ;;  %v306_v27 = vsel %vm305_vm3, %v3601_v37, %v302_v43  ;;  %vm319_vm5 = vweird.f32 %v3607_v19 }
 0x335   :  { %v920_v28 = vsub.f32 %v4070_v52, %v918_v26  ;;  %v311_v30 = vsel %vm308_vm4, %v310_v20, %v306_v27  ;;  %v322_v51 = vand.u32 2147483647, %v297_v63  ;;  %vm320_vm7 = vmor %vm318_vm6, %vm319_vm5 }
 0x336   :  { %v4137_v31 = vpop.eup %3608  ;;  %v315_v32 = vsub.f32 1.0, %v314_v22  ;;  %v1048_v5 = vmul.f32 1.442695, %v1046_v23  ;;  %v312_v34 = vmul.f32 %v4042_v38, %v311_v30 }
 0x337   :  { %v923_v15 = vmul.f32 1.442695, %v920_v28  ;;  %v925_v40 = vsel %vm278_vm14, %v4137_v31, 0.0  ;;  %vm323_vm8 = vcmp.eq.f32.partialorder %v322_v51, 8.507059e+37 }
 0x338   :  { %v316_v41 = vmul.f32 %v3607_v19, %v315_v32  ;;  %3610 = vpow2.f32 %v1048_v5  ;;  %3359 = vmatmul.msk.f32.vlgmr.msrb.gmra.mxu0 %vm278_vm14, %v312_v34 }
 0x339   :  { %3612 = vpow2.f32 %v923_v15  ;;  %926 = vadd.xlane.f32.xlu1 %v925_v40 }
 0x33a   :  { %v317_v52 = vadd.f32 %v3607_v19, %v316_v41 }
 0x33b   :  { %v1045_v45 = vpop.xlane.xlu0 %1044 }
 0x33c   :  { %v321_v24 = vsel %vm320_vm7, %v3607_v19, %v317_v52  ;;  %v1047_v63 = vsub.f32 %v4078_v62, %v1045_v45 }
 0x33d   :  { %v326_v38 = vsel %vm323_vm8, %v325_v42, %v321_v24 }
 0x33e   :  { %v4143_v25 = vpop.eup %3610  ;;  %v327_v46 = vmul.f32 %v4058_v44, %v326_v38  ;;  %v1050_v12 = vmul.f32 1.442695, %v1047_v63 }
 0x33f   :  { %v4146_v47 = vpop.eup %3612  ;;  %v1052_v49 = vsel %vm278_vm14, %v4143_v25, 0.0 }
 0x340   :  { %3360 = vmatmul.msk.f32.gmra.mxu0 %vm278_vm14, %v327_v46  ;;  %1053 = vadd.xlane.f32.xlu2 %v1052_v49  ;;  %v928_v50 = vsel %vm5237_vm13, %v4146_v47, 0.0 }
 0x341   :  { %929 = vadd.xlane.f32.xlu1 %v928_v50 }
 0x343   :  { %v1169_v55 = vpop.xlane.xlu0 %1168 }
 0x344   :  { %v1173_v57 = vsub.f32 %v4084_v2, %v1169_v55 }
 0x346   :  { %v1175_v37 = vmul.f32 1.442695, %v1173_v57 }
 0x348   :  { %3614 = vpow2.f32 %v1175_v37 }
 0x34b   :  { %v1172_v2 = vpop.xlane.xlu0 %1171 }
 0x34c   :  { %v1174_v36 = vsub.f32 %v4090_v9, %v1172_v2 }
 0x34e   :  { %v4154_v58 = vpop.eup %3614  ;;  %v1177_v59 = vmul.f32 1.442695, %v1174_v36 }
 0x34f   :  { %v1179_v44 = vsel %vm278_vm14, %v4154_v58, 0.0 }
 0x350   :  { %1180 = vadd.xlane.f32.xlu0 %v1179_v44  ;;  %3616 = vpow2.f32 %v1177_v59 }
 0x356   :  { %v4170_v7 = vpop.eup %3616 }
 0x357   :  { %v1182_v14 = vsel %vm5237_vm13, %v4170_v7, 0.0 }
 0x358   :  { %1217 = vrot.lane.b32.xlu2 %v3900_v3, %s3741_s25 }
 0x35a   :  { %834 = vrot.lane.b32.xlu1 %v3891_v0, %s3738_s22 }
 0x360   :  { %1215 = vrot.lane.b32.xlu2 %v3891_v0, %s3741_s25 }
 0x364   :  { %836 = vrot.lane.b32.xlu0 %v3900_v3, %s3738_s22 }
 0x368   :  { %1088 = vrot.lane.b32.xlu2 %v3891_v0, %s3740_s24 }
 0x37c   :  { %v418_v6 = vpop.xlane.xlu2 %417 }
 0x37d   :  { %3618 = vrcp.f32 %v418_v6  ;;  %v433_v18 = vand.u32 2147483648, %v418_v6  ;;  %v431_v9 = vand.u32 2147483647, %v418_v6  ;;  %vm427_vm2 = vweird.f32 %v418_v6 }
 0x37e   :  { %3620 = vpow2.f32 %v1050_v12 }
 0x37f   :  { %v434_v21 = vor.u32 1.1754944e-38, %v433_v18  ;;  %vm432_vm4 = vcmp.eq.f32.partialorder %v431_v9, 8.507059e+37 }
 0x383   :  { %v3619_v13 = vpop.eup %3618 }
 0x384   :  { %v423_v16 = vmul.f32 %v3619_v13, %v418_v6  ;;  %1183 = vadd.xlane.f32.xlu1 %v1182_v14  ;;  %vm428_vm15 = vweird.f32 %v3619_v13  ;;  %v4174_v19 = vpop.eup %3620 }
 0x385   :  { %vm429_vm3 = vmor %vm427_vm2, %vm428_vm15  ;;  %v1055_v26 = vsel %vm5237_vm13, %v4174_v19, 0.0 }
 0x386   :  { %v424_v0 = vsub.f32 1.0, %v423_v16 }
 0x388   :  { %v425_v43 = vmul.f32 %v3619_v13, %v424_v0 }
 0x38a   :  { %v426_v62 = vadd.f32 %v3619_v13, %v425_v43  ;;  %v546_v20 = vpop.xlane.xlu1 %545 }
 0x38b   :  { %3622 = vrcp.f32 %v546_v20  ;;  %v561_v15 = vand.u32 2147483648, %v546_v20  ;;  %v559_v40 = vand.u32 2147483647, %v546_v20  ;;  %vm555_vm6 = vweird.f32 %v546_v20 }
 0x38c   :  { %v430_v22 = vsel %vm429_vm3, %v3619_v13, %v426_v62 }
 0x38d   :  { %v435_v23 = vsel %vm432_vm4, %v434_v21, %v430_v22  ;;  %v562_v42 = vor.u32 1.1754944e-38, %v561_v15  ;;  %vm560_vm8 = vcmp.eq.f32.partialorder %v559_v40, 8.507059e+37 }
 0x38e   :  { %1056 = vadd.xlane.f32.xlu0 %v1055_v26  ;;  %v436_v27 = vmul.f32 %v4095_v17, %v435_v23 }
 0x390   :  { %3366 = vmatmul.msk.f32.vlgmr.msra.gmra.mxu2 %vm278_vm14, %v436_v27 }
 0x391   :  { %v3623_v28 = vpop.eup %3622  ;;  %3393 = vmatpush.msk.msra.mxu2 %vm334_vm10, %v4004_v4 }
 0x392   :  { %v551_v30 = vmul.f32 %v3623_v28, %v546_v20  ;;  %v421_v32 = vpop.xlane.xlu1 %420  ;;  %vm556_vm5 = vweird.f32 %v3623_v28 }
 0x393   :  { %3624 = vrcp.f32 %v421_v32  ;;  %989 = vmatpush.msra.mxu2 %v3993_v53  ;;  %v549_v5 = vpop.xlane.xlu0 %548  ;;  %vm557_vm7 = vmor %vm555_vm6, %vm556_vm5  ;;  %v448_v46 = vand.u32 2147483648, %v421_v32  ;;  %v446_v57 = vand.u32 2147483647, %v421_v32  ;;  %vm442_vm3 = vweird.f32 %v421_v32 }
 0x394   :  { %v552_v34 = vsub.f32 1.0, %v551_v30  ;;  %3626 = vrcp.f32 %v549_v5  ;;  %v576_v55 = vand.u32 2147483648, %v549_v5  ;;  %v574_v2 = vand.u32 2147483647, %v549_v5 }
 0x395   :  { %v449_v59 = vor.u32 1.1754944e-38, %v448_v46  ;;  %vm570_vm4 = vweird.f32 %v549_v5  ;;  %vm447_vm6 = vcmp.eq.f32.partialorder %v446_v57, 8.507059e+37 }
 0x396   :  { %v553_v35 = vmul.f32 %v3623_v28, %v552_v34  ;;  %v577_v12 = vor.u32 1.1754944e-38, %v576_v55 }
 0x398   :  { %v554_v41 = vadd.f32 %v3623_v28, %v553_v35 }
 0x399   :  { %v3625_v17 = vpop.eup %3624 }
 0x39a   :  { %v3627_v51 = vpop.eup %3626  ;;  %v558_v52 = vsel %vm557_vm7, %v3623_v28, %v554_v41  ;;  %v438_v4 = vmul.f32 %v3625_v17, %v421_v32  ;;  %vm443_vm15 = vweird.f32 %v3625_v17 }
 0x39b   :  { %v566_v45 = vmul.f32 %v3627_v51, %v549_v5  ;;  %v673_v24 = vpop.xlane.xlu1 %672  ;;  %v563_v38 = vsel %vm560_vm8, %v562_v42, %v558_v52  ;;  %vm571_vm2 = vweird.f32 %v3627_v51  ;;  %vm444_vm5 = vmor %vm442_vm3, %vm443_vm15  ;;  %vm575_vm8 = vcmp.eq.f32.partialorder %v574_v2, 8.507059e+37 }
 0x39c   :  { %v439_v53 = vsub.f32 1.0, %v438_v4  ;;  %3628 = vrcp.f32 %v673_v24  ;;  %v564_v44 = vmul.f32 %v4102_v60, %v563_v38  ;;  %v4186_v63 = vpop.xlane.xlu2 %799  ;;  %vm572_vm7 = vmor %vm570_vm4, %vm571_vm2  ;;  %v688_v62 = vand.u32 2147483648, %v673_v24 }
 0x39d   :  { %v567_v49 = vsub.f32 1.0, %v566_v45  ;;  %1090 = vrot.lane.b32.xlu1 %v3900_v3, %s3740_s24  ;;  %v686_v21 = vand.u32 2147483647, %v673_v24  ;;  %vm682_vm2 = vweird.f32 %v673_v24 }
 0x39e   :  { %v440_v50 = vmul.f32 %v3625_v17, %v439_v53  ;;  %3373 = vmatmul.msk.f32.vlgmr.msra.gmra.mxu0 %vm278_vm14, %v564_v44  ;;  %v689_v26 = vor.u32 1.1754944e-38, %v688_v62 }
 0x39f   :  { %v568_v37 = vmul.f32 %v3627_v51, %v567_v49  ;;  %vm687_vm4 = vcmp.eq.f32.partialorder %v686_v21, 8.507059e+37 }
 0x3a0   :  { %v441_v36 = vadd.f32 %v3625_v17, %v440_v50 }
 0x3a1   :  { %v569_v6 = vadd.f32 %v3627_v51, %v568_v37 }
 0x3a2   :  { %v3629_v3 = vpop.eup %3628  ;;  %v445_v13 = vsel %vm444_vm5, %v3625_v17, %v441_v36 }
 0x3a3   :  { %v678_v14 = vmul.f32 %v3629_v3, %v673_v24  ;;  %v450_v16 = vsel %vm447_vm6, %v449_v59, %v445_v13  ;;  %v573_v60 = vsel %vm572_vm7, %v3627_v51, %v569_v6  ;;  %vm683_vm15 = vweird.f32 %v3629_v3 }
 0x3a4   :  { %v676_v0 = vpop.xlane.xlu1 %675  ;;  %v451_v18 = vmul.f32 %v4108_v11, %v450_v16  ;;  %v578_v43 = vsel %vm575_vm8, %v577_v12, %v573_v60  ;;  %vm684_vm3 = vmor %vm682_vm2, %vm683_vm15  ;;  %v4193_v11 = vpop.xlane.xlu2 %802 }
 0x3a5   :  { %v679_v9 = vsub.f32 1.0, %v678_v14  ;;  %3630 = vrcp.f32 %v676_v0  ;;  %v579_v22 = vmul.f32 %v4110_v39, %v578_v43  ;;  %v703_v15 = vand.u32 2147483648, %v676_v0 }
 0x3a6   :  { %3367 = vmatmul.msk.f32.gmra.mxu2 %vm278_vm14, %v451_v18  ;;  %v701_v40 = vand.u32 2147483647, %v676_v0  ;;  %vm697_vm6 = vweird.f32 %v676_v0 }
 0x3a7   :  { %v680_v20 = vmul.f32 %v3629_v3, %v679_v9  ;;  %3374 = vmatmul.msk.f32.gmra.mxu0 %vm278_vm14, %v579_v22  ;;  %v704_v4 = vor.u32 1.1754944e-38, %v703_v15 }
 0x3a8   :  { %vm702_vm8 = vcmp.eq.f32.partialorder %v701_v40, 8.507059e+37 }
 0x3a9   :  { %v681_v23 = vadd.f32 %v3629_v3, %v680_v20 }
 0x3ab   :  { %v685_v27 = vsel %vm684_vm3, %v3629_v3, %v681_v23  ;;  %v3631_v28 = vpop.eup %3630 }
 0x3ac   :  { %v690_v30 = vsel %vm687_vm4, %v689_v26, %v685_v27  ;;  %v927_v32 = vpop.xlane.xlu1 %926  ;;  %v693_v5 = vmul.f32 %v3631_v28, %v676_v0  ;;  %vm698_vm5 = vweird.f32 %v3631_v28 }
 0x3ad   :  { %3632 = vrcp.f32 %v927_v32  ;;  %v691_v34 = vmul.f32 %v4118_v48, %v690_v30  ;;  %vm699_vm7 = vmor %vm697_vm6, %vm698_vm5  ;;  %v942_v48 = vand.u32 2147483648, %v927_v32  ;;  %v940_v46 = vand.u32 2147483647, %v927_v32 }
 0x3ae   :  { %v694_v35 = vsub.f32 1.0, %v693_v5  ;;  %vm936_vm2 = vweird.f32 %v927_v32  ;;  %v815_v5 = vand.u32 2147483648, %v4186_v63 }
 0x3af   :  { %3380 = vmatmul.msk.f32.vlgmr.msrb.gmra.mxu2 %vm278_vm14, %v691_v34  ;;  %v943_v57 = vor.u32 1.1754944e-38, %v942_v48  ;;  %vm941_vm4 = vcmp.eq.f32.partialorder %v940_v46, 8.507059e+37  ;;  %v828_v46 = vand.u32 2147483647, %v4193_v11 }
 0x3b0   :  { %v695_v39 = vmul.f32 %v3631_v28, %v694_v35 }
 0x3b2   :  { %v696_v51 = vadd.f32 %v3631_v28, %v695_v39 }
 0x3b3   :  { %v3633_v41 = vpop.eup %3632  ;;  %v4197_v17 = vpop.xlane.xlu2 %1053 }
 0x3b4   :  { %v932_v52 = vmul.f32 %v3633_v41, %v927_v32  ;;  %v930_v42 = vpop.xlane.xlu1 %929  ;;  %v700_v24 = vsel %vm699_vm7, %v3631_v28, %v696_v51  ;;  %vm937_vm15 = vweird.f32 %v3633_v41  ;;  %v816_v51 = vor.u32 1.1754944e-38, %v815_v5 }
 0x3b5   :  { %3634 = vrcp.f32 %v930_v42  ;;  %v705_v38 = vsel %vm702_vm8, %v704_v4, %v700_v24  ;;  %vm938_vm3 = vmor %vm936_vm2, %vm937_vm15  ;;  %v957_v12 = vand.u32 2147483648, %v930_v42  ;;  %v955_v13 = vand.u32 2147483647, %v930_v42 }
 0x3b6   :  { %v933_v45 = vsub.f32 1.0, %v932_v52  ;;  %v706_v49 = vmul.f32 %v4129_v8, %v705_v38  ;;  %3636 = vrcp.f32 %v4186_v63  ;;  %vm951_vm6 = vweird.f32 %v930_v42 }
 0x3b7   :  { %3638 = vrcp.f32 %v4193_v11  ;;  %v958_v18 = vor.u32 1.1754944e-38, %v957_v12  ;;  %vm956_vm8 = vcmp.eq.f32.partialorder %v955_v13, 8.507059e+37 }
 0x3b8   :  { %v934_v53 = vmul.f32 %v3633_v41, %v933_v45  ;;  %3381 = vmatmul.msk.f32.gmra.mxu2 %vm278_vm14, %v706_v49 }
 0x3ba   :  { %v935_v50 = vadd.f32 %v3633_v41, %v934_v53 }
 0x3bb   :  { %v3635_v55 = vpop.eup %3634  ;;  %v1218_v37 = vpop.permute.xlu2 %1217 }
 0x3bc   :  { %v939_v44 = vsel %vm938_vm3, %v3633_v41, %v935_v50  ;;  %v947_v2 = vmul.f32 %v3635_v55, %v930_v42  ;;  %3407 = vmatpush.msk.msrb.mxu2 %vm334_vm10, %v1218_v37  ;;  %v3637_v8 = vpop.eup %3636  ;;  %vm952_vm5 = vweird.f32 %v3635_v55  ;;  %vm809_vm3 = vweird.f32 %v4186_v63 }
 0x3bd   :  { %v944_v36 = vsel %vm941_vm4, %v943_v57, %v939_v44  ;;  %v805_v14 = vmul.f32 %v3637_v8, %v4186_v63  ;;  %vm953_vm7 = vmor %vm951_vm6, %vm952_vm5  ;;  %v3639_v62 = vpop.eup %3638  ;;  %vm810_vm15 = vweird.f32 %v3637_v8 }
 0x3be   :  { %v948_v59 = vsub.f32 1.0, %v947_v2  ;;  %v945_v6 = vmul.f32 %v4137_v31, %v944_v36  ;;  %v820_v23 = vmul.f32 %v3639_v62, %v4193_v11  ;;  %vm811_vm4 = vmor %vm809_vm3, %vm810_vm15  ;;  %vm825_vm13 = vweird.f32 %v3639_v62 }
 0x3bf   :  { %v806_v43 = vsub.f32 1.0, %v805_v14  ;;  %vm824_vm15 = vweird.f32 %v4193_v11  ;;  %vm829_vm3 = vcmp.eq.f32.partialorder %v828_v46, 8.507059e+37 }
 0x3c0   :  { %v949_v3 = vmul.f32 %v3635_v55, %v948_v59  ;;  %3394 = vmatmul.msk.f32.vlgmr.msra.gmra.mxu2 %vm278_vm14, %v945_v6  ;;  %v821_v30 = vsub.f32 1.0, %v820_v23 }
 0x3c1   :  { %v807_v22 = vmul.f32 %v3637_v8, %v806_v43 }
 0x3c2   :  { %v950_v16 = vadd.f32 %v3635_v55, %v949_v3  ;;  %v822_v40 = vmul.f32 %v3639_v62, %v821_v30 }
 0x3c3   :  { %v1216_v60 = vpop.permute.xlu2 %1215  ;;  %v1181_v0 = vpop.xlane.xlu0 %1180  ;;  %v808_v28 = vadd.f32 %v3637_v8, %v807_v22 }
 0x3c4   :  { %3640 = vrcp.f32 %v1181_v0  ;;  %1243 = vmatpush.msrb.mxu2 %v1216_v60  ;;  %v954_v31 = vsel %vm953_vm7, %v3635_v55, %v950_v16  ;;  %v1196_v32 = vand.u32 2147483648, %v1181_v0  ;;  %v1194_v35 = vand.u32 2147483647, %v1181_v0  ;;  %v4230_v22 = vpop.f32.mrf.mxu0 }
 0x3c5   :  { %v959_v9 = vsel %vm956_vm8, %v958_v18, %v954_v31  ;;  %vm1190_vm5 = vweird.f32 %v1181_v0  ;;  %v812_v15 = vsel %vm811_vm4, %v3637_v8, %v808_v28  ;;  %v823_v48 = vadd.f32 %v3639_v62, %v822_v40 }
 0x3c6   :  { %v960_v20 = vmul.f32 %v4146_v47, %v959_v9  ;;  %v813_v47 = vand.u32 2147483647, %v4186_v63  ;;  %v1197_v41 = vor.u32 1.1754944e-38, %v1196_v32  ;;  %vm1195_vm7 = vcmp.eq.f32.partialorder %v1194_v35, 8.507059e+37 }
 0x3c7   :  { %v830_v63 = vand.u32 2147483648, %v4193_v11  ;;  %3642 = vrcp.f32 %v4197_v17  ;;  %v1067_v31 = vand.u32 2147483647, %v4197_v17 }
 0x3c8   :  { %3395 = vmatmul.msk.f32.gmra.mxu2 %vm278_vm14, %v960_v20  ;;  %vm814_vm8 = vcmp.eq.f32.partialorder %v813_v47, 8.507059e+37 }
 0x3c9   :  { %v817_v4 = vsel %vm814_vm8, %v816_v51, %v812_v15  ;;  %v831_v49 = vor.u32 1.1754944e-38, %v830_v63  ;;  %vm1063_vm8 = vweird.f32 %v4197_v17 }
 0x3ca   :  { %v3641_v21 = vpop.eup %3640  ;;  %v818_v53 = vmul.f32 %v4120_v54, %v817_v4 }
 0x3cb   :  { %v1186_v26 = vmul.f32 %v3641_v21, %v1181_v0  ;;  %vm1191_vm2 = vweird.f32 %v3641_v21  ;;  %v1069_v0 = vand.u32 2147483648, %v4197_v17 }
 0x3cc   :  { %vm1192_vm6 = vmor %vm1190_vm5, %vm1191_vm2  ;;  %v835_v38 = vpop.permute.xlu1 %834  ;;  %v4235_v35 = vpop.f32.mrf.mxu0 }
 0x3cd   :  { %v1187_v27 = vsub.f32 1.0, %v1186_v26  ;;  %vm826_vm2 = vmor %vm824_vm15, %vm825_vm13  ;;  %v3643_v37 = vpop.eup %3642 }
 0x3ce   :  { %v1059_v54 = vmul.f32 %v3643_v37, %v4197_v17  ;;  %v1089_v17 = vpop.permute.xlu2 %1088 }
 0x3cf   :  { %v1188_v34 = vmul.f32 %v3641_v21, %v1187_v27 }
 0x3d0   :  { %v1060_v44 = vsub.f32 1.0, %v1059_v54  ;;  %v1337_v54 = vld [vmem:[%s5226_s2 + $0x58] sm:$0xff] }
 0x3d1   :  { %v1189_v39 = vadd.f32 %v3641_v21, %v1188_v34 }
 0x3d2   :  { %v1061_v8 = vmul.f32 %v3643_v37, %v1060_v44  ;;  %v1335_v44 = vld [vmem:[%s5226_s2 + $0x48] sm:$0xff] }
 0x3d3   :  { %v1193_v52 = vsel %vm1192_vm6, %v3641_v21, %v1189_v39  ;;  %vm1064_vm6 = vweird.f32 %v3643_v37  ;;  %v1070_v21 = vor.u32 1.1754944e-38, %v1069_v0 }
 0x3d4   :  { %v1198_v42 = vsel %vm1195_vm7, %v1197_v41, %v1193_v52  ;;  %v1062_v14 = vadd.f32 %v3643_v37, %v1061_v8  ;;  %vm1065_vm15 = vmor %vm1063_vm8, %vm1064_vm6  ;;  %v1330_v8 = vld [vmem:[%s5226_s2 + $0x20] sm:$0xff]  ;;  %vm1311_vm6 = vcmask 392192   ;;  %vm1317_vm8 = vcmask 654336  }
 0x3d5   :  { %v1199_v45 = vmul.f32 %v4154_v58, %v1198_v42  ;;  %v827_v58 = vsel %vm826_vm2, %v3639_v62, %v823_v48  ;;  %vm1068_vm2 = vcmp.eq.f32.partialorder %v1067_v31, 8.507059e+37 }
 0x3d6   :  { %v837_v24 = vpop.permute.xlu0 %836  ;;  %v832_v50 = vsel %vm829_vm3, %v831_v49, %v827_v58  ;;  %v1066_v62 = vsel %vm1065_vm15, %v3643_v37, %v1062_v14  ;;  %v1338_v37 = vld [vmem:[%s5226_s2 + $0x60] sm:$0xff]  ;;  %vm5239_vm15 = vcmask 785408  }
 0x3d7   :  { %3386 = vmatpush.msk.msrb.mxu0 %vm334_vm10, %v837_v24  ;;  %3408 = vmatmul.msk.f32.vlgmr.msrb.gmra.mxu2 %vm278_vm14, %v1199_v45  ;;  %v833_v55 = vmul.f32 %v4127_v1, %v832_v50  ;;  %v1071_v26 = vsel %vm1068_vm2, %v1070_v21, %v1066_v62  ;;  %v1341_v50 = vld [vmem:[%s5226_s2 + $0x78] sm:$0xff]  ;;  %vm5238_vm2 = vcmask 916480  }
 0x3d8   :  { %1343 = vmatpush.msra.mxu3 %v1341_v50 }
 0x3d9   :  { %862 = vmatpush.msrb.mxu0 %v835_v38 }
 0x3da   :  { %3387 = vmatmul.msk.f32.vlgmr.msrb.gmra.mxu0 %vm278_vm14, %v818_v53 }
 0x3e2   :  { %3388 = vmatmul.msk.f32.gmra.mxu0 %vm278_vm14, %v833_v55  ;;  %v1340_v55 = vld [vmem:[%s5226_s2 + $0x70] sm:$0xff] }
 0x3e3   :  { %1344 = vmatpush.msra.mxu3 %v1340_v55 }
 0x3f7   :  { %v1184_v57 = vpop.xlane.xlu1 %1183 }
 0x3f8   :  { %3644 = vrcp.f32 %v1184_v57  ;;  %v1211_v6 = vand.u32 2147483648, %v1184_v57  ;;  %v1209_v1 = vand.u32 2147483647, %v1184_v57  ;;  %vm1205_vm4 = vweird.f32 %v1184_v57 }
 0x3fa   :  { %v1212_v13 = vor.u32 1.1754944e-38, %v1211_v6  ;;  %vm1210_vm7 = vcmp.eq.f32.partialorder %v1209_v1, 8.507059e+37  ;;  %v1331_v6 = vld [vmem:[%s5226_s2 + $0x28] sm:$0xff]  ;;  %v1328_v1 = vld [vmem:[%s5226_s2 + $0x10] sm:$0xff] }
 0x3fe   :  { %v3645_v11 = vpop.eup %3644 }
 0x3ff   :  { %v1201_v2 = vmul.f32 %v3645_v11, %v1184_v57  ;;  %vm1206_vm13 = vweird.f32 %v3645_v11  ;;  %v1339_v57 = vld [vmem:[%s5226_s2 + $0x68] sm:$0xff] }
 0x400   :  { %vm1207_vm5 = vmor %vm1205_vm4, %vm1206_vm13  ;;  %1345 = vmatpush.msra.mxu3 %v1339_v57 }
 0x401   :  { %v1202_v36 = vsub.f32 1.0, %v1201_v2  ;;  %v1057_v59 = vpop.xlane.xlu0 %1056  ;;  %v1334_v2 = vld [vmem:[%s5226_s2 + $0x40] sm:$0xff] }
 0x402   :  { %3646 = vrcp.f32 %v1057_v59  ;;  %v1084_v30 = vand.u32 2147483648, %v1057_v59  ;;  %vm1078_vm13 = vweird.f32 %v1057_v59  ;;  %v1082_v32 = vand.u32 2147483647, %v1057_v59  ;;  %1346 = vmatpush.msra.mxu3 %v1338_v37 }
 0x403   :  { %v1203_v3 = vmul.f32 %v3645_v11, %v1202_v36  ;;  %v1333_v36 = vld [vmem:[%s5226_s2 + $0x38] sm:$0xff] }
 0x404   :  { %v1085_v34 = vor.u32 1.1754944e-38, %v1084_v30  ;;  %1347 = vmatpush.msra.mxu3 %v1337_v54 }
 0x405   :  { %v1204_v12 = vadd.f32 %v3645_v11, %v1203_v3  ;;  %v1329_v3 = vld [vmem:[%s5226_s2 + $0x18] sm:$0xff] }
 0x407   :  { %v1208_v16 = vsel %vm1207_vm5, %v3645_v11, %v1204_v12  ;;  %vm1083_vm5 = vcmp.eq.f32.partialorder %v1082_v32, 8.507059e+37  ;;  %v1336_v11 = vld [vmem:[%s5226_s2 + $0x50] sm:$0xff]  ;;  %v1327_v12 = vld [vmem:[%s5226_s2 + $0x8] sm:$0xff] }
 0x408   :  { %v3647_v60 = vpop.eup %3646  ;;  %v1213_v18 = vsel %vm1210_vm7, %v1212_v13, %v1208_v16  ;;  %1348 = vmatpush.msra.mxu3 %v1336_v11  ;;  %v1326_v13 = vld [vmem:[%s5226_s2] sm:$0xff]  ;;  %vm1314_vm7 = vcmask 523264  }
 0x409   :  { %v1074_v43 = vmul.f32 %v3647_v60, %v1057_v59  ;;  %v1214_v9 = vmul.f32 %v4170_v7, %v1213_v18  ;;  %vm1079_vm3 = vweird.f32 %v3647_v60  ;;  %v1072_v7 = vmul.f32 %v4143_v25, %v1071_v26  ;;  %v1332_v59 = vld [vmem:[%s5226_s2 + $0x30] sm:$0xff] }
 0x40a   :  { %vm1080_vm4 = vmor %vm1078_vm13, %vm1079_vm3  ;;  %1349 = vmatpush.msra.mxu3 %v1335_v44 }
 0x40b   :  { %v1075_v20 = vsub.f32 1.0, %v1074_v43  ;;  %3409 = vmatmul.msk.f32.gmra.mxu2 %vm278_vm14, %v1214_v9 }
 0x40c   :  { %1350 = vmatpush.msra.mxu3 %v1334_v2 }
 0x40d   :  { %v1076_v23 = vmul.f32 %v3647_v60, %v1075_v20 }
 0x40e   :  { %1351 = vmatpush.msra.mxu3 %v1333_v36  ;;  %v1425_v36 = vld [vmem:[%s5227_s3 + $0x38] sm:$0xff] }
 0x40f   :  { %v1091_v27 = vpop.permute.xlu1 %1090  ;;  %v1077_v28 = vadd.f32 %v3647_v60, %v1076_v23  ;;  %1473 = vmatpush.msrb.mxu1 %v1425_v36 }
 0x410   :  { %3400 = vmatpush.msk.msra.mxu0 %vm334_vm10, %v1091_v27  ;;  %1352 = vmatpush.msra.mxu3 %v1332_v59  ;;  %v1422_v59 = vld [vmem:[%s5227_s3 + $0x20] sm:$0xff] }
 0x411   :  { %v1081_v5 = vsel %vm1080_vm4, %v3647_v60, %v1077_v28 }
 0x412   :  { %1116 = vmatpush.msra.mxu0 %v1089_v17  ;;  %v1086_v47 = vsel %vm1083_vm5, %v1085_v34, %v1081_v5  ;;  %1353 = vmatpush.msra.mxu3 %v1331_v6  ;;  %v1423_v6 = vld [vmem:[%s5227_s3 + $0x28] sm:$0xff] }
 0x413   :  { %3401 = vmatmul.msk.f32.vlgmr.msra.gmra.mxu0 %vm278_vm14, %v1072_v7  ;;  %v1087_v39 = vmul.f32 %v4174_v19, %v1086_v47  ;;  %v483_v40 = vpop.f32.mrf.mxu2  ;;  %1474 = vmatpush.msrb.mxu1 %v1423_v6 }
 0x414   :  { %1354 = vmatpush.msra.mxu3 %v1330_v8  ;;  %v1420_v8 = vld [vmem:[%s5227_s3 + $0x10] sm:$0xff] }
 0x416   :  { %1355 = vmatpush.msra.mxu3 %v1329_v3  ;;  %v1421_v3 = vld [vmem:[%s5227_s3 + $0x18] sm:$0xff] }
 0x417   :  { %1475 = vmatpush.msrb.mxu1 %v1421_v3 }
 0x418   :  { %1356 = vmatpush.msra.mxu3 %v1328_v1  ;;  %v1418_v1 = vld [vmem:[%s5227_s3] sm:$0xff] }
 0x41a   :  { %1357 = vmatpush.msra.mxu3 %v1327_v12  ;;  %v1419_v12 = vld [vmem:[%s5227_s3 + $0x8] sm:$0xff] }
 0x41b   :  { %3402 = vmatmul.msk.f32.gmra.mxu0 %vm278_vm14, %v1087_v39  ;;  %v610_v15 = vpop.f32.mrf.mxu0  ;;  %1476 = vmatpush.msrb.mxu1 %v1419_v12 }
 0x41c   :  { %1358 = vmatpush.msra.mxu3 %v1326_v13 }
 0x424   :  { %v613_v41 = vpop.f32.mrf.mxu0 }
 0x425   :  { %v3560_v51 = vpack.i.bf16 %v613_v41, %v610_v15 }
 0x427   :  { %3561 = vrot.lane.b32.xlu2 %v3560_v51, %s3740_s24 }
 0x429   :  { %v486_v25 = vpop.f32.mrf.mxu2 }
 0x42a   :  { %v3555_v52 = vpack.i.bf16 %v486_v25, %v483_v40 }
 0x42c   :  { %3556 = vrot.lane.b32.xlu0 %v3555_v52, %s3741_s25 }
 0x432   :  { %v737_v42 = vpop.f32.mrf.mxu2 }
 0x43b   :  { %v740_v4 = vpop.f32.mrf.mxu2 }
 0x43c   :  { %v3565_v45 = vpack.i.bf16 %v740_v4, %v737_v42  ;;  %v4316_v4 = vld [vmem:[%s5225_s5] sm:$0x3f] }
 0x43e   :  { %3566 = vrot.lane.b32.xlu2 %v3565_v45, %s3739_s23  ;;  %v1342_v45 = vperm.slane %v4316_v4, 2 }
 0x443   :  { %v991_v24 = vpop.f32.mrf.mxu2 }
 0x446   :  { %1285 = vrot.lane.b32.xlu2 %v991_v24, %s3736_s20 }
 0x44b   :  { %v994_v19 = vpop.f32.mrf.mxu2 }
 0x44e   :  { %1287 = vrot.lane.b32.xlu2 %v994_v19, %s3736_s20 }
 0x457   :  { %v864_v48 = vpop.f32.mrf.mxu0 }
 0x45a   :  { %v1245_v53 = vpop.f32.mrf.mxu2 }
 0x45f   :  { %v867_v63 = vpop.f32.mrf.mxu0 }
 0x460   :  { %v3570_v38 = vpack.i.bf16 %v867_v63, %v864_v48 }
 0x462   :  { %3571 = vrot.lane.b32.xlu1 %v3570_v38, %s3738_s22 }
 0x46a   :  { %1301 = vrot.lane.b32.xlu1 %v1245_v53, %s3735_s19 }
 0x481   :  { %v3562_v14 = vpop.permute.xlu2 %3561 }
 0x482   :  { %v3563_v43 = vunpack.i.l.bf16 %v3562_v14 }
 0x48e   :  { %v1248_v46 = vpop.f32.mrf.mxu2 }
 0x48f   :  { %1303 = vrot.lane.b32.xlu1 %v1248_v46, %s3735_s19 }
 0x490   :  { %v1118_v58 = vpop.f32.mrf.mxu0 }
 0x491   :  { %1293 = vrot.lane.b32.xlu0 %v1118_v58, %s3737_s21 }
 0x498   :  { %v1121_v49 = vpop.f32.mrf.mxu0  ;;  %v3567_v0 = vpop.permute.xlu2 %3566 }
 0x499   :  { %1295 = vrot.lane.b32.xlu0 %v1121_v49, %s3737_s21  ;;  %v3568_v20 = vunpack.i.l.bf16 %v3567_v0  ;;  %v3569_v47 = vunpack.i.h.bf16 %v3567_v0 }
 0x49e   :  { %v3557_v16 = vpop.permute.xlu0 %3556 }
 0x49f   :  { %v3558_v60 = vunpack.i.l.bf16 %v3557_v16  ;;  %v3559_v21 = vunpack.i.h.bf16 %v3557_v16 }
 0x4a0   :  { %v1286_v26 = vpop.permute.xlu2 %1285 }
 0x4a1   :  { %v1307_v18 = vsel %vm238_vm9, %v4230_v22, %v3558_v60  ;;  %v1308_v28 = vsel %vm238_vm9, %v4235_v35, %v3559_v21  ;;  %v3564_v22 = vunpack.i.h.bf16 %v3562_v14 }
 0x4a2   :  { %v1309_v9 = vsel %vm92_vm0, %v1307_v18, %v3563_v43 }
 0x4a3   :  { %v1312_v23 = vsel %vm1311_vm6, %v1309_v9, %v3568_v20  ;;  %v1310_v7 = vsel %vm92_vm0, %v1308_v28, %v3564_v22 }
 0x4a4   :  { %v1313_v15 = vsel %vm1311_vm6, %v1310_v7, %v3569_v47 }
 0x4a8   :  { %v1288_v40 = vpop.permute.xlu2 %1287 }
 0x4d4   :  { %v3572_v31 = vpop.permute.xlu1 %3571 }
 0x4d5   :  { %v3573_v62 = vunpack.i.l.bf16 %v3572_v31  ;;  %v3574_v32 = vunpack.i.h.bf16 %v3572_v31 }
 0x4d7   :  { %v1315_v27 = vsel %vm1314_vm7, %v1312_v23, %v3573_v62  ;;  %v1316_v35 = vsel %vm1314_vm7, %v1313_v15, %v3574_v32 }
 0x4d8   :  { %v1318_v17 = vsel %vm1317_vm8, %v1315_v27, %v1286_v26  ;;  %v1319_v51 = vsel %vm1317_vm8, %v1316_v35, %v1288_v40  ;;  %v1412_v27 = vperm.slane %v4316_v4, 3 }
 0x4dc   :  { %v1302_v5 = vpop.permute.xlu1 %1301 }
 0x501   :  { %v1304_v25 = vpop.permute.xlu1 %1303 }
 0x503   :  { %v1294_v30 = vpop.permute.xlu0 %1293 }
 0x504   :  { %v1321_v34 = vsel %vm5239_vm15, %v1318_v17, %v1294_v30  ;;  %v1415_v17 = vperm.slane %v4316_v4, 4 }
 0x505   :  { %v1324_v39 = vsel %vm5238_vm2, %v1321_v34, %v1302_v5 }
 0x506   :  { %1359 = vmatmul.f32.vlgmr.msra.gmra.mxu3 %v1324_v39 }
 0x50b   :  { %v1296_v41 = vpop.permute.xlu0 %1295 }
 0x50c   :  { %v1322_v52 = vsel %vm5239_vm15, %v1319_v51, %v1296_v41  ;;  %v4370_v41 = vld [vmem:[%s5228_s6] sm:$0x3]  ;;  %v1589_v51 = vld [vmem:[%s5229_s4 + $0x78] sm:$0xff] }
 0x50d   :  { %v1325_v42 = vsel %vm5238_vm2, %v1322_v52, %v1304_v25  ;;  %v1429_v25 = vperm.slane %v4370_v41, 1  ;;  %1591 = vmatpush.msra.mxu2 %v1589_v51  ;;  %v1588_v52 = vld [vmem:[%s5229_s4 + $0x70] sm:$0xff] }
 0x50e   :  { %1362 = vmatmul.f32.gmra.mxu3 %v1325_v42 }
 0x50f   :  { %1592 = vmatpush.msra.mxu2 %v1588_v52 }
 0x589   :  { %v1360_v24 = vpop.f32.mrf.mxu3 }
 0x58a   :  { %v1361_v19 = vadd.f32 %v1360_v24, %v1342_v45 }
 0x58c   :  { %v1366_v48 = vadd.f32 %v1361_v19, %v3871_v56  ;;  %v1586_v19 = vld [vmem:[%s5229_s4 + $0x60] sm:$0xff] }
 0x58e   :  { %v1368_v63 = vsel %vm92_vm0, %v1366_v48, 0.0 }
 0x58f   :  { %1369 = vadd.xlane.f32.xlu2 %v1368_v63  ;;  %v1585_v63 = vld [vmem:[%s5229_s4 + $0x58] sm:$0xff] }
 0x591   :  { %v1363_v38 = vpop.f32.mrf.mxu3 }
 0x592   :  { %v1364_v53 = vadd.f32 %v1363_v38, %v1342_v45  ;;  %v1587_v45 = vld [vmem:[%s5229_s4 + $0x68] sm:$0xff] }
 0x593   :  { %1593 = vmatpush.msra.mxu2 %v1587_v45 }
 0x594   :  { %v1367_v46 = vadd.f32 %v1364_v53, %v3880_v61  ;;  %v1424_v61 = vld [vmem:[%s5227_s3 + $0x30] sm:$0xff] }
 0x595   :  { %1450 = vmatpush.msrb.mxu0 %v1424_v61  ;;  %1594 = vmatpush.msra.mxu2 %v1586_v19  ;;  %v1584_v53 = vld [vmem:[%s5229_s4 + $0x50] sm:$0xff] }
 0x596   :  { %v1371_v58 = vsel %vm96_vm1, %v1367_v46, 0.0 }
 0x597   :  { %1372 = vadd.xlane.f32.xlu0 %v1371_v58  ;;  %1451 = vmatpush.msrb.mxu0 %v1422_v59  ;;  %v1580_v59 = vld [vmem:[%s5229_s4 + $0x30] sm:$0xff] }
 0x598   :  { %1595 = vmatpush.msra.mxu2 %v1585_v63 }
 0x599   :  { %1452 = vmatpush.msrb.mxu0 %v1420_v8 }
 0x59a   :  { %1596 = vmatpush.msra.mxu2 %v1584_v53 }
 0x59b   :  { %1453 = vmatpush.msrb.mxu0 %v1418_v1  ;;  %v1579_v1 = vld [vmem:[%s5229_s4 + $0x28] sm:$0xff] }
 0x602   :  { %v1370_v49 = vpop.xlane.xlu2 %1369 }
 0x603   :  { %v1374_v50 = vmul.f32 %v1370_v49, %v3820_v10  ;;  %v1583_v49 = vld [vmem:[%s5229_s4 + $0x48] sm:$0xff] }
 0x604   :  { %1597 = vmatpush.msra.mxu2 %v1583_v49 }
 0x605   :  { %v1376_v55 = vsub.f32 %v1366_v48, %v1374_v50 }
 0x607   :  { %v1378_v57 = vmul.f32 %v1376_v55, %v1376_v55 }
 0x609   :  { %v1380_v37 = vsel %vm92_vm0, %v1378_v57, 0.0 }
 0x60a   :  { %v1373_v54 = vpop.xlane.xlu0 %1372  ;;  %1381 = vadd.xlane.f32.xlu1 %v1380_v37  ;;  %v1582_v37 = vld [vmem:[%s5229_s4 + $0x40] sm:$0xff] }
 0x60b   :  { %v1375_v56 = vmul.f32 %v1373_v54, %v3820_v10  ;;  %1598 = vmatpush.msra.mxu2 %v1582_v37 }
 0x60d   :  { %v1377_v11 = vsub.f32 %v1367_v46, %v1375_v56 }
 0x60f   :  { %v1379_v44 = vmul.f32 %v1377_v11, %v1377_v11 }
 0x611   :  { %v1383_v2 = vsel %vm96_vm1, %v1379_v44, 0.0  ;;  %v1581_v44 = vld [vmem:[%s5229_s4 + $0x38] sm:$0xff] }
 0x612   :  { %1384 = vadd.xlane.f32.xlu2 %v1383_v2  ;;  %1599 = vmatpush.msra.mxu2 %v1581_v44 }
 0x614   :  { %1600 = vmatpush.msra.mxu2 %v1580_v59 }
 0x616   :  { %1601 = vmatpush.msra.mxu2 %v1579_v1  ;;  %v1428_v1 = vperm.slane %v4370_v41, 0 }
 0x67d   :  { %v1382_v13 = vpop.xlane.xlu1 %1381 }
 0x67e   :  { %v1386_v14 = vmul.f32 %v1382_v13, %v3820_v10 }
 0x680   :  { %v1388_v16 = vadd.f32 1e-05, %v1386_v14  ;;  %v1578_v14 = vld [vmem:[%s5229_s4 + $0x20] sm:$0xff] }
 0x681   :  { %1602 = vmatpush.msra.mxu2 %v1578_v14 }
 0x682   :  { %3648 = vrsqrt.f32 %v1388_v16  ;;  %vm1396_vm13 = vweird.f32 %v1388_v16 }
 0x685   :  { %v1385_v60 = vpop.xlane.xlu2 %1384 }
 0x686   :  { %v1387_v0 = vmul.f32 %v1385_v60, %v3820_v10 }
 0x688   :  { %v3649_v18 = vpop.eup %3648  ;;  %v1389_v31 = vadd.f32 1e-05, %v1387_v0 }
 0x689   :  { %v1391_v43 = vmul.f32 %v3649_v18, %v1388_v16  ;;  %vm1397_vm3 = vweird.f32 %v3649_v18 }
 0x68a   :  { %3650 = vrsqrt.f32 %v1389_v31  ;;  %vm1398_vm4 = vmor %vm1396_vm13, %vm1397_vm3  ;;  %vm1406_vm2 = vweird.f32 %v1389_v31 }
 0x68b   :  { %v1392_v9 = vmul.f32 %v3649_v18, %v1391_v43 }
 0x68d   :  { %v1393_v62 = vmul.f32 0.5, %v1392_v9 }
 0x68f   :  { %v1394_v20 = vsub.f32 1.5, %v1393_v62 }
 0x690   :  { %v3651_v21 = vpop.eup %3650 }
 0x691   :  { %v1395_v23 = vmul.f32 %v3649_v18, %v1394_v20  ;;  %v1401_v26 = vmul.f32 %v3651_v21, %v1389_v31  ;;  %vm1407_vm5 = vweird.f32 %v3651_v21  ;;  %v1577_v31 = vld [vmem:[%s5229_s4 + $0x18] sm:$0xff]  ;;  %v1576_v20 = vld [vmem:[%s5229_s4 + $0x10] sm:$0xff] }
 0x692   :  { %vm1408_vm15 = vmor %vm1406_vm2, %vm1407_vm5  ;;  %1603 = vmatpush.msra.mxu2 %v1577_v31 }
 0x693   :  { %v1399_v28 = vsel %vm1398_vm4, %v3649_v18, %v1395_v23  ;;  %v1402_v22 = vmul.f32 %v3651_v21, %v1401_v26 }
 0x694   :  { %v1410_v30 = vmul.f32 %v1399_v28, %v1376_v55  ;;  %1604 = vmatpush.msra.mxu2 %v1576_v20  ;;  %v1574_v28 = vld [vmem:[%s5229_s4] sm:$0xff] }
 0x695   :  { %v1403_v7 = vmul.f32 0.5, %v1402_v22 }
 0x696   :  { %v1413_v32 = vmul.f32 %v1412_v27, %v1410_v30 }
 0x697   :  { %v1404_v5 = vsub.f32 1.5, %v1403_v7 }
 0x698   :  { %v4355_v34 = vadd.f32 %v1415_v17, %v1413_v32 }
 0x699   :  { %v1405_v47 = vmul.f32 %v3651_v21, %v1404_v5 }
 0x69a   :  { %3410 = vmatmul.msk.f32.vlgmr.msrb.gmra.mxu0 %vm92_vm0, %v4355_v34  ;;  %3412 = vmatmul.msk.f32.vlgmr.msrb.gmra.mxu1 %vm92_vm0, %v4355_v34 }
 0x69b   :  { %v1409_v39 = vsel %vm1408_vm15, %v3651_v21, %v1405_v47  ;;  %v1575_v21 = vld [vmem:[%s5229_s4 + $0x8] sm:$0xff] }
 0x69c   :  { %v1411_v15 = vmul.f32 %v1409_v39, %v1377_v11  ;;  %1605 = vmatpush.msra.mxu2 %v1575_v21 }
 0x69e   :  { %v1414_v35 = vmul.f32 %v1412_v27, %v1411_v15  ;;  %1606 = vmatpush.msra.mxu2 %v1574_v28 }
 0x6a0   :  { %v4361_v40 = vadd.f32 %v1415_v17, %v1414_v35 }
 0x6a2   :  { %3411 = vmatmul.msk.f32.gmra.mxu0 %vm92_vm0, %v4361_v40  ;;  %3413 = vmatmul.msk.f32.gmra.mxu1 %vm92_vm0, %v4361_v40 }
 0x717   :  { %v1478_v42 = vpop.f32.mrf.mxu1 }
 0x718   :  { %v4382_v24 = vadd.f32 %v1478_v42, %v1429_v25 }
 0x71a   :  { %v4388_v48 = vmul.f32 0.70710677, %v4382_v24 }
 0x71c   :  { %v1488_v38 = vmul.f32 %v4388_v48, %v4388_v48 }
 0x71e   :  { %v1489_v46 = vmin.f32 %v1488_v38, 16.0 }
 0x71f   :  { %v1481_v58 = vpop.f32.mrf.mxu1 }
 0x720   :  { %v1490_v50 = vmul.f32 2.1237322e-06, %v1489_v46  ;;  %v1501_v55 = vmul.f32 3.8918573e-05, %v1489_v46  ;;  %v4401_v57 = vadd.f32 %v1481_v58, %v1429_v25 }
 0x722   :  { %v1491_v54 = vadd.f32 0.00028619796, %v1490_v50  ;;  %v1502_v56 = vadd.f32 0.001143296, %v1501_v55  ;;  %v4407_v11 = vmul.f32 0.70710677, %v4401_v57 }
 0x723   :  { %v1485_v28 = vmul.f32 0.5, %v4401_v57 }
 0x724   :  { %v1492_v2 = vmul.f32 %v1491_v54, %v1489_v46  ;;  %v1503_v61 = vmul.f32 %v1502_v56, %v1489_v46  ;;  %v1528_v36 = vmul.f32 %v4407_v11, %v4407_v11 }
 0x726   :  { %v1504_v6 = vadd.f32 0.014752088, %v1503_v61  ;;  %v1493_v8 = vadd.f32 0.0036580483, %v1492_v2  ;;  %v1529_v3 = vmin.f32 %v1528_v36, 16.0 }
 0x728   :  { %v1505_v12 = vmul.f32 %v1504_v6, %v1489_v46  ;;  %v1530_v13 = vmul.f32 2.1237322e-06, %v1529_v3  ;;  %v1541_v16 = vmul.f32 3.8918573e-05, %v1529_v3  ;;  %v1494_v0 = vmul.f32 %v1493_v8, %v1489_v46 }
 0x72a   :  { %v1506_v60 = vadd.f32 0.112945676, %v1505_v12  ;;  %v1531_v18 = vadd.f32 0.00028619796, %v1530_v13  ;;  %v1542_v43 = vadd.f32 0.001143296, %v1541_v16  ;;  %v1455_v12 = vpop.f32.mrf.mxu0 }
 0x72b   :  { %v1495_v27 = vadd.f32 0.05243302, %v1494_v0 }
 0x72c   :  { %v1507_v9 = vmul.f32 %v1506_v60, %v1489_v46  ;;  %v1532_v62 = vmul.f32 %v1531_v18, %v1529_v3  ;;  %v1543_v23 = vmul.f32 %v1542_v43, %v1529_v3  ;;  %v1484_v18 = vmul.f32 0.5, %v4382_v24 }
 0x72d   :  { %v1496_v5 = vmul.f32 %v1495_v27, %v1489_v46  ;;  %v1456_v43 = vadd.f32 %v1455_v12, %v1428_v1 }
 0x72e   :  { %v1508_v26 = vadd.f32 0.4994258, %v1507_v9  ;;  %v1544_v22 = vadd.f32 0.014752088, %v1543_v23  ;;  %v1533_v17 = vadd.f32 0.0036580483, %v1532_v62 }
 0x72f   :  { %v1497_v35 = vadd.f32 0.18741608, %v1496_v5 }
 0x730   :  { %v1509_v30 = vmul.f32 %v1508_v26, %v1489_v46  ;;  %v1545_v7 = vmul.f32 %v1544_v22, %v1529_v3  ;;  %v1534_v39 = vmul.f32 %v1533_v17, %v1529_v3 }
 0x731   :  { %v1498_v45 = vmul.f32 %v1497_v35, %v1489_v46 }
 0x732   :  { %v1510_v32 = vadd.f32 1.0, %v1509_v30  ;;  %v1546_v47 = vadd.f32 0.112945676, %v1545_v7  ;;  %v1535_v25 = vadd.f32 0.05243302, %v1534_v39  ;;  %v1458_v27 = vpop.f32.mrf.mxu0  ;;  %v1590_v7 = vperm.slane %v4316_v4, 5 }
 0x733   :  { %v1499_v49 = vadd.f32 1.1283791, %v1498_v45  ;;  %v1459_v22 = vadd.f32 %v1458_v27, %v1428_v1 }
 0x734   :  { %3652 = vrcp.f32 %v1510_v32  ;;  %v1547_v15 = vmul.f32 %v1546_v47, %v1529_v3  ;;  %v1536_v38 = vmul.f32 %v1535_v25, %v1529_v3  ;;  %v1522_v58 = vand.u32 2147483648, %v1510_v32 }
 0x735   :  { %v1520_v55 = vand.u32 2147483647, %v1510_v32  ;;  %vm1516_vm2 = vweird.f32 %v1510_v32  ;;  %v1500_v2 = vmul.f32 %v1499_v49, %v4388_v48  ;;  %v3423_v49 = vld [vmem:[%s5224_s1 + $0x90] sm:$0xff] }
 0x736   :  { %v1548_v51 = vadd.f32 0.4994258, %v1547_v15  ;;  %v1537_v37 = vadd.f32 0.18741608, %v1536_v38  ;;  %v1523_v56 = vor.u32 1.1754944e-38, %v1522_v58  ;;  %v3426_v38 = vld [vmem:[%s5224_s1 + $0xa8] sm:$0xff] }
 0x737   :  { %vm1521_vm13 = vcmp.eq.f32.partialorder %v1520_v55, 8.507059e+37  ;;  %v3428_v58 = vld [vmem:[%s5224_s1 + $0xb8] sm:$0xff]  ;;  %1699 = vmatpush.msra.mxu0 %v3426_v38  ;;  %v3425_v55 = vld [vmem:[%s5224_s1 + $0xa0] sm:$0xff] }
 0x738   :  { %v1549_v52 = vmul.f32 %v1548_v51, %v1529_v3  ;;  %v1538_v36 = vmul.f32 %v1537_v37, %v1529_v3  ;;  %1745 = vmatpush.msrb.mxu3 %v3428_v58  ;;  %v3420_v37 = vld [vmem:[%s5224_s1 + $0x78] sm:$0xff] }
 0x739   :  { %1700 = vmatpush.msra.mxu0 %v3423_v49 }
 0x73a   :  { %v3653_v42 = vpop.eup %3652  ;;  %v1550_v63 = vadd.f32 1.0, %v1549_v52  ;;  %v1539_v16 = vadd.f32 1.1283791, %v1538_v36  ;;  %1746 = vmatpush.msrb.mxu3 %v3425_v55 }
 0x73b   :  { %v1512_v19 = vmul.f32 %v3653_v42, %v1510_v32  ;;  %vm1517_vm15 = vweird.f32 %v3653_v42  ;;  %1701 = vmatpush.msra.mxu0 %v3420_v37 }
 0x73c   :  { %3654 = vrcp.f32 %v1550_v63  ;;  %vm1518_vm3 = vmor %vm1516_vm2, %vm1517_vm15  ;;  %v1562_v14 = vand.u32 2147483648, %v1550_v63  ;;  %v1560_v0 = vand.u32 2147483647, %v1550_v63  ;;  %vm1556_vm5 = vweird.f32 %v1550_v63 }
 0x73d   :  { %v1513_v53 = vsub.f32 1.0, %v1512_v19  ;;  %v1540_v62 = vmul.f32 %v1539_v16, %v4407_v11 }
 0x73e   :  { %v1563_v3 = vor.u32 1.1754944e-38, %v1562_v14  ;;  %vm1561_vm2 = vcmp.eq.f32.partialorder %v1560_v0, 8.507059e+37 }
 0x73f   :  { %v1514_v50 = vmul.f32 %v3653_v42, %v1513_v53  ;;  %v3427_v53 = vld [vmem:[%s5224_s1 + $0xb0] sm:$0xff] }
 0x740   :  { %1722 = vmatpush.msra.mxu1 %v3427_v53 }
 0x741   :  { %v1515_v54 = vadd.f32 %v3653_v42, %v1514_v50  ;;  %v3424_v50 = vld [vmem:[%s5224_s1 + $0x98] sm:$0xff] }
 0x742   :  { %v3655_v44 = vpop.eup %3654  ;;  %1723 = vmatpush.msra.mxu1 %v3424_v50 }
 0x743   :  { %v1519_v61 = vsel %vm1518_vm3, %v3653_v42, %v1515_v54  ;;  %v1552_v59 = vmul.f32 %v3655_v44, %v1550_v63  ;;  %vm1557_vm4 = vweird.f32 %v3655_v44  ;;  %v3421_v54 = vld [vmem:[%s5224_s1 + $0x80] sm:$0xff] }
 0x744   :  { %v1524_v46 = vsel %vm1521_vm13, %v1523_v56, %v1519_v61  ;;  %vm1558_vm15 = vmor %vm1556_vm5, %vm1557_vm4  ;;  %v3422_v56 = vld [vmem:[%s5224_s1 + $0x88] sm:$0xff]  ;;  %1724 = vmatpush.msra.mxu1 %v3421_v54  ;;  %v3419_v61 = vld [vmem:[%s5224_s1 + $0x70] sm:$0xff] }
 0x745   :  { %v1525_v6 = vmul.f32 %v1524_v46, %v1500_v2  ;;  %v1553_v8 = vsub.f32 1.0, %v1552_v59  ;;  %1747 = vmatpush.msrb.mxu3 %v3422_v56  ;;  %v3418_v2 = vld [vmem:[%s5224_s1 + $0x68] sm:$0xff] }
 0x746   :  { %1725 = vmatpush.msra.mxu1 %v3418_v2 }
 0x747   :  { %v3414_v13 = vclamps-f32 %v1525_v6, 1.0  ;;  %v1554_v60 = vmul.f32 %v3655_v44, %v1553_v8  ;;  %1748 = vmatpush.msrb.mxu3 %v3419_v61 }
 0x749   :  { %v1568_v31 = vadd.f32 1.0, %v3414_v13  ;;  %v1555_v48 = vadd.f32 %v3655_v44, %v1554_v60  ;;  %v3416_v60 = vld [vmem:[%s5225_s5 + $0x8] sm:$0x3f] }
 0x74b   :  { %v1570_v9 = vmul.f32 %v1568_v31, %v1484_v18  ;;  %v1559_v20 = vsel %vm1558_vm15, %v3655_v44, %v1555_v48  ;;  %v3417_v44 = vld [vmem:[%s5224_s1 + $0x60] sm:$0xff]  ;;  %v1662_v48 = vperm.slane %v3416_v60, 0 }
 0x74c   :  { %v1564_v21 = vsel %vm1561_vm2, %v1563_v3, %v1559_v20  ;;  %1702 = vmatpush.msra.mxu0 %v3417_v44  ;;  %v1665_v20 = vperm.slane %v3416_v60, 1 }
 0x74d   :  { %v1572_v41 = vmul.f32 %v1570_v9, %v1456_v43  ;;  %v1565_v23 = vmul.f32 %v1564_v21, %v1540_v62 }
 0x74f   :  { %1607 = vmatmul.f32.vlgmr.msra.gmra.mxu2 %v1572_v41  ;;  %v3415_v26 = vclamps-f32 %v1565_v23, 1.0 }
 0x751   :  { %v1569_v24 = vadd.f32 1.0, %v3415_v26 }
 0x753   :  { %v1571_v30 = vmul.f32 %v1569_v24, %v1485_v28 }
 0x755   :  { %v1573_v17 = vmul.f32 %v1571_v30, %v1459_v22 }
 0x757   :  { %1610 = vmatmul.f32.gmra.mxu2 %v1573_v17 }
 0x7d2   :  { %v1608_v32 = vpop.f32.mrf.mxu2 }
 0x7d3   :  { %v1609_v5 = vadd.f32 %v1608_v32, %v1590_v7 }
 0x7d5   :  { %v1614_v11 = vadd.f32 %v1609_v5, %v4355_v34 }
 0x7d7   :  { %v1618_v47 = vsel %vm92_vm0, %v1614_v11, 0.0 }
 0x7d8   :  { %1619 = vadd.xlane.f32.xlu0 %v1618_v47 }
 0x7da   :  { %v1611_v39 = vpop.f32.mrf.mxu2 }
 0x7db   :  { %v1612_v15 = vadd.f32 %v1611_v39, %v1590_v7 }
 0x7dd   :  { %v1615_v35 = vadd.f32 %v1612_v15, %v4361_v40 }
 0x7df   :  { %v1621_v57 = vsel %vm96_vm1, %v1615_v35, 0.0 }
 0x7e0   :  { %1622 = vadd.xlane.f32.xlu1 %v1621_v57 }
 0x84b   :  { %v1620_v51 = vpop.xlane.xlu0 %1619 }
 0x84c   :  { %v1624_v25 = vmul.f32 %v1620_v51, %v3820_v10 }
 0x84e   :  { %v1626_v52 = vsub.f32 %v1614_v11, %v1624_v25 }
 0x850   :  { %v1628_v42 = vmul.f32 %v1626_v52, %v1626_v52 }
 0x852   :  { %v1630_v4 = vsel %vm92_vm0, %v1628_v42, 0.0 }
 0x853   :  { %1631 = vadd.xlane.f32.xlu2 %v1630_v4  ;;  %v1623_v45 = vpop.xlane.xlu1 %1622 }
 0x854   :  { %v1625_v34 = vmul.f32 %v1623_v45, %v3820_v10 }
 0x856   :  { %v4448_v19 = vsub.f32 %v1615_v35, %v1625_v34 }
 0x858   :  { %v1629_v63 = vmul.f32 %v4448_v19, %v4448_v19 }
 0x85a   :  { %v1633_v40 = vsel %vm96_vm1, %v1629_v63, 0.0 }
 0x85b   :  { %1634 = vadd.xlane.f32.xlu0 %v1633_v40 }
 0x8c6   :  { %v1632_v46 = vpop.xlane.xlu2 %1631 }
 0x8c7   :  { %v1636_v36 = vmul.f32 %v1632_v46, %v3820_v10 }
 0x8c9   :  { %v1638_v59 = vadd.f32 1e-05, %v1636_v36 }
 0x8cb   :  { %3656 = vrsqrt.f32 %v1638_v59  ;;  %vm1646_vm13 = vweird.f32 %v1638_v59 }
 0x8ce   :  { %v1635_v6 = vpop.xlane.xlu0 %1634 }
 0x8cf   :  { %v1637_v8 = vmul.f32 %v1635_v6, %v3820_v10 }
 0x8d1   :  { %v3657_v1 = vpop.eup %3656  ;;  %v1639_v13 = vadd.f32 1e-05, %v1637_v8 }
 0x8d2   :  { %v1641_v12 = vmul.f32 %v3657_v1, %v1638_v59  ;;  %vm1647_vm3 = vweird.f32 %v3657_v1 }
 0x8d3   :  { %3658 = vrsqrt.f32 %v1639_v13  ;;  %vm1648_vm4 = vmor %vm1646_vm13, %vm1647_vm3  ;;  %vm1656_vm15 = vweird.f32 %v1639_v13  ;;  %vm5244_vm3 = vcmask 74752  }
 0x8d4   :  { %v1642_v14 = vmul.f32 %v3657_v1, %v1641_v12  ;;  %vm5245_vm13 = vmmov %vm5244_vm3 }
 0x8d6   :  { %v1643_v16 = vmul.f32 0.5, %v1642_v14 }
 0x8d8   :  { %v1644_v0 = vsub.f32 1.5, %v1643_v16 }
 0x8d9   :  { %v3659_v18 = vpop.eup %3658 }
 0x8da   :  { %v1645_v31 = vmul.f32 %v3657_v1, %v1644_v0  ;;  %v1651_v43 = vmul.f32 %v3659_v18, %v1639_v13  ;;  %vm1657_vm5 = vweird.f32 %v3659_v18 }
 0x8db   :  { %vm1658_vm2 = vmor %vm1656_vm15, %vm1657_vm5 }
 0x8dc   :  { %v1649_v9 = vsel %vm1648_vm4, %v3657_v1, %v1645_v31  ;;  %v1652_v62 = vmul.f32 %v3659_v18, %v1651_v43  ;;  %vm5246_vm4 = vmmov %vm5244_vm3 }
 0x8dd   :  { %v1660_v3 = vmul.f32 %v1649_v9, %v1626_v52  ;;  %vm5247_vm5 = vmmov %vm5244_vm3 }
 0x8de   :  { %v1653_v21 = vmul.f32 0.5, %v1652_v62  ;;  %vm5248_vm15 = vmmov %vm5244_vm3 }
 0x8df   :  { %v1663_v41 = vmul.f32 %v1662_v48, %v1660_v3 }
 0x8e0   :  { %v1654_v23 = vsub.f32 1.5, %v1653_v21 }
 0x8e1   :  { %v4494_v26 = vadd.f32 %v1665_v20, %v1663_v41 }
 0x8e2   :  { %v1655_v27 = vmul.f32 %v3659_v18, %v1654_v23 }
 0x8e3   :  { %3429 = vmatmul.msk.f32.vlgmr.msra.gmra.mxu0 %vm92_vm0, %v4494_v26  ;;  %3431 = vmatmul.msk.f32.vlgmr.msra.gmra.mxu1 %vm92_vm0, %v4494_v26 }
 0x8e4   :  { %3433 = vmatmul.msk.f32.vlgmr.msrb.gmra.mxu3 %vm92_vm0, %v4494_v26  ;;  %v1659_v28 = vsel %vm1658_vm2, %v3659_v18, %v1655_v27  ;;  %vm5249_vm2 = vmmov %vm5244_vm3 }
 0x8e5   :  { %v1661_v24 = vmul.f32 %v1659_v28, %v4448_v19 }
 0x8e7   :  { %v1664_v22 = vmul.f32 %v1662_v48, %v1661_v24 }
 0x8e9   :  { %v4503_v30 = vadd.f32 %v1665_v20, %v1664_v22 }
 0x8eb   :  { %3430 = vmatmul.msk.f32.gmra.mxu0 %vm92_vm0, %v4503_v30  ;;  %3432 = vmatmul.msk.f32.gmra.mxu1 %vm92_vm0, %v4503_v30 }
 0x8ec   :  { %3434 = vmatmul.msk.f32.gmra.mxu3 %vm92_vm0, %v4503_v30 }
 0x960   :  { %v1704_v17 = vpop.f32.mrf.mxu0  ;;  %v1727_v7 = vpop.f32.mrf.mxu1 }
 0x961   :  { %1879 = vrot.lane.b32.xlu2 %v1727_v7, %s3735_s19  ;;  %1875 = vrot.lane.b32.xlu0 %v1704_v17, %s3735_s19 }
 0x967   :  { %v4513_v32 = vpop.f32.mrf.mxu3 }
 0x968   :  { %v1730_v5 = vpop.f32.mrf.mxu1  ;;  %v1707_v47 = vpop.f32.mrf.mxu0 }
 0x969   :  { %2384 = vrot.lane.b32.xlu2 %v1704_v17, %s3739_s23  ;;  %2130 = vrot.lane.b32.xlu0 %v1704_v17, %s3736_s20 }
 0x96a   :  { %1881 = vrot.lane.b32.xlu1 %v1730_v5, %s3735_s19  ;;  %3435 = vmatpush.xpose.msk.msrb.mxu0 %vm238_vm9, %v1730_v5 }
 0x96e   :  { %3436 = vmatpush.xpose.msk.msrb.mxu0 %vm238_vm9, %v1727_v7 }
 0x96f   :  { %v4520_v11 = vpop.f32.mrf.mxu3 }
 0x970   :  { %3439 = vmatpush.msk.msrb.mxu1 %vm334_vm10, %v4520_v11 }
 0x971   :  { %3437 = vmatmul.msk.f32.vlgmr.msrb.gmra.mxu0 %vm238_vm9, %v1704_v17  ;;  %2261 = vrot.lane.b32.xlu2 %v1727_v7, %s3738_s22 }
 0x972   :  { %2134 = vrot.lane.b32.xlu1 %v1727_v7, %s3736_s20  ;;  %1867 = vmatpush.msrb.mxu1 %v4513_v32 }
 0x973   :  { %1877 = vrot.lane.b32.xlu0 %v1707_v47, %s3735_s19 }
 0x979   :  { %3438 = vmatmul.msk.f32.gmra.mxu0 %vm238_vm9, %v1707_v47  ;;  %2257 = vrot.lane.b32.xlu2 %v1704_v17, %s3738_s22 }
 0x97a   :  { %2007 = vrot.lane.b32.xlu1 %v1727_v7, %s3737_s21 }
 0x97b   :  { %2388 = vrot.lane.b32.xlu0 %v1727_v7, %s3739_s23 }
 0x981   :  { %2136 = vrot.lane.b32.xlu2 %v1730_v5, %s3736_s20 }
 0x982   :  { %2003 = vrot.lane.b32.xlu1 %v1704_v17, %s3737_s21 }
 0x983   :  { %2132 = vrot.lane.b32.xlu0 %v1707_v47, %s3736_s20 }
 0x989   :  { %2009 = vrot.lane.b32.xlu2 %v1730_v5, %s3737_s21 }
 0x98a   :  { %2005 = vrot.lane.b32.xlu1 %v1707_v47, %s3737_s21 }
 0x98b   :  { %2263 = vrot.lane.b32.xlu0 %v1730_v5, %s3738_s22 }
 0x991   :  { %2390 = vrot.lane.b32.xlu2 %v1730_v5, %s3739_s23 }
 0x992   :  { %2386 = vrot.lane.b32.xlu1 %v1707_v47, %s3739_s23 }
 0x993   :  { %2644 = vrot.lane.b32.xlu0 %v1730_v5, %s3741_s25 }
 0x999   :  { %2259 = vrot.lane.b32.xlu2 %v1707_v47, %s3738_s22 }
 0x99a   :  { %2642 = vrot.lane.b32.xlu1 %v1727_v7, %s3741_s25 }
 0x99b   :  { %2638 = vrot.lane.b32.xlu0 %v1704_v17, %s3741_s25 }
 0x9a1   :  { %2511 = vrot.lane.b32.xlu2 %v1704_v17, %s3740_s24 }
 0x9a2   :  { %2517 = vrot.lane.b32.xlu1 %v1730_v5, %s3740_s24 }
 0x9a3   :  { %2515 = vrot.lane.b32.xlu0 %v1727_v7, %s3740_s24 }
 0x9a9   :  { %2221 = vrot.lane.b32.xlu2 %v4513_v32, %s3736_s20 }
 0x9aa   :  { %2640 = vrot.lane.b32.xlu1 %v1707_v47, %s3741_s25 }
 0x9ab   :  { %2513 = vrot.lane.b32.xlu0 %v1707_v47, %s3740_s24 }
 0x9b1   :  { %2096 = vrot.lane.b32.xlu2 %v4520_v11, %s3737_s21 }
 0x9b2   :  { %1967 = vrot.lane.b32.xlu1 %v4513_v32, %s3735_s19 }
 0x9b3   :  { %2094 = vrot.lane.b32.xlu0 %v4513_v32, %s3737_s21 }
 0x9ba   :  { %2223 = vrot.lane.b32.xlu1 %v4520_v11, %s3736_s20 }
 0x9bb   :  { %1969 = vrot.lane.b32.xlu0 %v4520_v11, %s3735_s19  ;;  %v1880_v39 = vpop.permute.xlu2 %1879 }
 0x9c3   :  { %v2385_v15 = vpop.permute.xlu2 %2384 }
 0x9cb   :  { %v2262_v35 = vpop.permute.xlu2 %2261 }
 0x9d3   :  { %v1876_v57 = vpop.permute.xlu0 %1875  ;;  %v2258_v51 = vpop.permute.xlu2 %2257 }
 0x9db   :  { %v2131_v25 = vpop.permute.xlu0 %2130  ;;  %v2137_v42 = vpop.permute.xlu2 %2136 }
 0x9dc   :  { %v1882_v52 = vpop.permute.xlu1 %1881 }
 0x9dd   :  { %3442 = vmatpush.xpose.msk.msrb.mxu2 %vm238_vm9, %v1882_v52 }
 0x9e1   :  { %3443 = vmatpush.xpose.msk.msrb.mxu2 %vm238_vm9, %v1880_v39 }
 0x9e3   :  { %v2010_v45 = vpop.permute.xlu2 %2009 }
 0x9e4   :  { %v2135_v4 = vpop.permute.xlu1 %2134  ;;  %3444 = vmatmul.msk.f32.vlgmr.msrb.gmra.mxu2 %vm238_vm9, %v1876_v57  ;;  %3449 = vmatpush.xpose.msk.msra.mxu0 %vm238_vm9, %v2010_v45 }
 0x9e5   :  { %3456 = vmatpush.xpose.msk.msra.mxu2 %vm238_vm9, %v2137_v42  ;;  %v1878_v34 = vpop.permute.xlu0 %1877 }
 0x9e9   :  { %3457 = vmatpush.xpose.msk.msra.mxu2 %vm238_vm9, %v2135_v4 }
 0x9eb   :  { %v2391_v63 = vpop.permute.xlu2 %2390 }
 0x9ec   :  { %v2008_v19 = vpop.permute.xlu1 %2007  ;;  %3445 = vmatmul.msk.f32.gmra.mxu2 %vm238_vm9, %v1878_v34 }
 0x9ed   :  { %v2389_v40 = vpop.permute.xlu0 %2388  ;;  %3450 = vmatpush.xpose.msk.msra.mxu0 %vm238_vm9, %v2008_v19  ;;  %3470 = vmatpush.xpose.msk.msrb.mxu2 %vm238_vm9, %v2391_v63 }
 0x9ee   :  { %v1785_v38 = vpop.f32.mrf.mxu0 }
 0x9ef   :  { %v1791_v53 = vmul.f32 0.25, %v1785_v38 }
 0x9f1   :  { %3471 = vmatpush.xpose.msk.msrb.mxu2 %vm238_vm9, %v2389_v40  ;;  %v1793_v58 = vsel %vm3958_vm11, %v1791_v53, -1e+30 }
 0x9f2   :  { %v1795_v49 = vsel %vm278_vm14, %v1793_v58, -inf }
 0x9f3   :  { %1796 = vmax.xlane.f32.xlu1 %v1795_v49  ;;  %v2260_v55 = vpop.permute.xlu2 %2259 }
 0x9f4   :  { %v2004_v50 = vpop.permute.xlu1 %2003  ;;  %3458 = vmatmul.msk.f32.vlgmr.msra.gmra.mxu2 %vm238_vm9, %v2131_v25 }
 0x9f5   :  { %v2133_v37 = vpop.permute.xlu0 %2132  ;;  %3451 = vmatmul.msk.f32.vlgmr.msra.gmra.mxu0 %vm238_vm9, %v2004_v50 }
 0x9f6   :  { %v1788_v54 = vpop.f32.mrf.mxu0 }
 0x9f7   :  { %v1792_v56 = vmul.f32 0.25, %v1788_v54 }
 0x9f9   :  { %v4579_v44 = vsel %vm3964_vm12, %v1792_v56, -1e+30 }
 0x9fa   :  { %v1798_v2 = vsel %vm5244_vm3, %v4579_v44, -inf  ;;  %vm5250_vm3 = vmmov %vm5249_vm2 }
 0x9fb   :  { %1799 = vmax.xlane.f32.xlu2 %v1798_v2  ;;  %v2512_v61 = vpop.permute.xlu2 %2511 }
 0x9fc   :  { %v2006_v46 = vpop.permute.xlu1 %2005  ;;  %3459 = vmatmul.msk.f32.gmra.mxu2 %vm238_vm9, %v2133_v37 }
 0x9fd   :  { %v2264_v36 = vpop.permute.xlu0 %2263  ;;  %3452 = vmatmul.msk.f32.gmra.mxu0 %vm238_vm9, %v2006_v46 }
 0x9fe   :  { %3463 = vmatpush.xpose.msk.msrb.mxu0 %vm238_vm9, %v2264_v36 }
 0xa02   :  { %3464 = vmatpush.xpose.msk.msrb.mxu0 %vm238_vm9, %v2262_v35 }
 0xa03   :  { %v2222_v59 = vpop.permute.xlu2 %2221 }
 0xa04   :  { %v2387_v6 = vpop.permute.xlu1 %2386  ;;  %3472 = vmatmul.msk.f32.vlgmr.msrb.gmra.mxu2 %vm238_vm9, %v2385_v15 }
 0xa05   :  { %v2645_v8 = vpop.permute.xlu0 %2644  ;;  %3465 = vmatmul.msk.f32.vlgmr.msrb.gmra.mxu0 %vm238_vm9, %v2258_v51 }
 0xa06   :  { %3484 = vmatpush.xpose.msk.msra.mxu2 %vm238_vm9, %v2645_v8 }
 0xa0b   :  { %v2097_v1 = vpop.permute.xlu2 %2096 }
 0xa0c   :  { %v2643_v12 = vpop.permute.xlu1 %2642  ;;  %3473 = vmatmul.msk.f32.gmra.mxu2 %vm238_vm9, %v2387_v6  ;;  %3453 = vmatpush.msk.msra.mxu1 %vm334_vm10, %v2097_v1 }
 0xa0d   :  { %v2639_v13 = vpop.permute.xlu0 %2638  ;;  %3466 = vmatmul.msk.f32.gmra.mxu0 %vm238_vm9, %v2260_v55  ;;  %3485 = vmatpush.xpose.msk.msra.mxu2 %vm238_vm9, %v2643_v12 }
 0xa14   :  { %v2518_v14 = vpop.permute.xlu1 %2517  ;;  %3486 = vmatmul.msk.f32.vlgmr.msra.gmra.mxu2 %vm238_vm9, %v2639_v13 }
 0xa15   :  { %v2516_v16 = vpop.permute.xlu0 %2515  ;;  %3477 = vmatpush.xpose.msk.msra.mxu0 %vm238_vm9, %v2518_v14 }
 0xa19   :  { %3478 = vmatpush.xpose.msk.msra.mxu0 %vm238_vm9, %v2516_v16 }
 0xa1c   :  { %v2641_v60 = vpop.permute.xlu1 %2640  ;;  %3479 = vmatmul.msk.f32.vlgmr.msra.gmra.mxu0 %vm238_vm9, %v2512_v61 }
 0xa1d   :  { %v2514_v0 = vpop.permute.xlu0 %2513  ;;  %3487 = vmatmul.msk.f32.gmra.mxu2 %vm238_vm9, %v2641_v60 }
 0xa24   :  { %3480 = vmatmul.msk.f32.gmra.mxu0 %vm238_vm9, %v2514_v0  ;;  %v1968_v31 = vpop.permute.xlu1 %1967 }
 0xa25   :  { %v2095_v18 = vpop.permute.xlu0 %2094 }
 0xa26   :  { %2122 = vmatpush.msra.mxu1 %v2095_v18 }
 0xa2c   :  { %v2224_v43 = vpop.permute.xlu1 %2223 }
 0xa2d   :  { %v1970_v48 = vpop.permute.xlu0 %1969 }
 0xa2e   :  { %3446 = vmatpush.msk.msra.mxu3 %vm334_vm10, %v1970_v48 }
 0xa30   :  { %1995 = vmatpush.msra.mxu3 %v1968_v31 }
 0xa32   :  { %3460 = vmatpush.msk.msrb.mxu3 %vm334_vm10, %v2224_v43 }
 0xa34   :  { %2249 = vmatpush.msrb.mxu3 %v2222_v59 }
 0xa66   :  { %v1797_v9 = vpop.xlane.xlu1 %1796 }
 0xa67   :  { %v1801_v3 = vsub.f32 %v1793_v58, %v1797_v9  ;;  %v1908_v62 = vpop.f32.mrf.mxu2 }
 0xa68   :  { %v1914_v20 = vmul.f32 0.25, %v1908_v62 }
 0xa69   :  { %v1803_v41 = vmul.f32 1.442695, %v1801_v3 }
 0xa6a   :  { %v4604_v21 = vsel %vm3958_vm11, %v1914_v20, -1e+30 }
 0xa6b   :  { %3660 = vpow2.f32 %v1803_v41  ;;  %v1918_v23 = vsel %vm278_vm14, %v4604_v21, -inf }
 0xa6c   :  { %1919 = vmax.xlane.f32.xlu2 %v1918_v23 }
 0xa6e   :  { %v1800_v39 = vpop.xlane.xlu2 %1799 }
 0xa6f   :  { %v1911_v28 = vpop.f32.mrf.mxu2  ;;  %v1802_v25 = vsub.f32 %v4579_v44, %v1800_v39 }
 0xa70   :  { %v1915_v47 = vmul.f32 0.25, %v1911_v28 }
 0xa71   :  { %v4608_v27 = vpop.eup %3660  ;;  %v1805_v34 = vmul.f32 1.442695, %v1802_v25 }
 0xa72   :  { %v2036_v24 = vpop.f32.mrf.mxu0  ;;  %v1807_v22 = vsel %vm278_vm14, %v4608_v27, 0.0  ;;  %v4620_v57 = vsel %vm3964_vm12, %v1915_v47, -1e+30 }
 0xa73   :  { %v2042_v17 = vmul.f32 0.25, %v2036_v24  ;;  %v1921_v42 = vsel %vm5245_vm13, %v4620_v57, -inf  ;;  %3662 = vpow2.f32 %v1805_v34  ;;  %vm5251_vm13 = vmmov %vm5249_vm2 }
 0xa74   :  { %1808 = vadd.xlane.f32.xlu2 %v1807_v22 }
 0xa75   :  { %v4614_v7 = vsel %vm3958_vm11, %v2042_v17, -1e+30 }
 0xa76   :  { %v2046_v5 = vsel %vm278_vm14, %v4614_v7, -inf }
 0xa77   :  { %2047 = vmax.xlane.f32.xlu0 %v2046_v5  ;;  %v2163_v51 = vpop.f32.mrf.mxu2 }
 0xa78   :  { %v2169_v45 = vmul.f32 0.25, %v2163_v51 }
 0xa79   :  { %v4643_v50 = vpop.eup %3662 }
 0xa7a   :  { %v2039_v15 = vpop.f32.mrf.mxu0  ;;  %v4633_v40 = vsel %vm3958_vm11, %v2169_v45, -1e+30  ;;  %v1810_v56 = vsel %vm5248_vm15, %v4643_v50, 0.0 }
 0xa7b   :  { %v2043_v35 = vmul.f32 0.25, %v2039_v15  ;;  %v2173_v53 = vsel %vm278_vm14, %v4633_v40, -inf }
 0xa7d   :  { %v4625_v52 = vsel %vm3964_vm12, %v2043_v35, -1e+30 }
 0xa7e   :  { %v2049_v4 = vsel %vm5246_vm4, %v4625_v52, -inf  ;;  %vm5252_vm4 = vmmov %vm5249_vm2 }
 0xa7f   :  { %1922 = vmax.xlane.f32.xlu0 %v1921_v42  ;;  %2050 = vmax.xlane.f32.xlu1 %v2049_v4  ;;  %v2166_v44 = vpop.f32.mrf.mxu2 }
 0xa80   :  { %v2170_v16 = vmul.f32 0.25, %v2166_v44 }
 0xa82   :  { %v2290_v19 = vpop.f32.mrf.mxu0  ;;  %v4679_v0 = vsel %vm3964_vm12, %v2170_v16, -1e+30 }
 0xa83   :  { %v2296_v63 = vmul.f32 0.25, %v2290_v19  ;;  %v2176_v48 = vsel %vm5250_vm3, %v4679_v0, -inf  ;;  %vm5253_vm3 = vmmov %vm5249_vm2 }
 0xa85   :  { %v4637_v38 = vsel %vm3958_vm11, %v2296_v63, -1e+30 }
 0xa86   :  { %v2300_v58 = vsel %vm278_vm14, %v4637_v38, -inf }
 0xa87   :  { %2174 = vmax.xlane.f32.xlu1 %v2173_v53  ;;  %2301 = vmax.xlane.f32.xlu2 %v2300_v58  ;;  %v2417_v46 = vpop.f32.mrf.mxu2 }
 0xa88   :  { %v2423_v6 = vmul.f32 0.25, %v2417_v46 }
 0xa8a   :  { %v2293_v49 = vpop.f32.mrf.mxu0  ;;  %v4663_v8 = vsel %vm3958_vm11, %v2423_v6, -1e+30 }
 0xa8b   :  { %v2297_v55 = vmul.f32 0.25, %v2293_v49  ;;  %v2427_v1 = vsel %vm278_vm14, %v4663_v8, -inf }
 0xa8d   :  { %v4647_v37 = vsel %vm3964_vm12, %v2297_v55, -1e+30 }
 0xa8e   :  { %v2303_v54 = vsel %vm5247_vm5, %v4647_v37, -inf }
 0xa8f   :  { %2304 = vmax.xlane.f32.xlu0 %v2303_v54  ;;  %1811 = vadd.xlane.f32.xlu2 %v1810_v56  ;;  %v2420_v12 = vpop.f32.mrf.mxu2 }
 0xa90   :  { %v2424_v13 = vmul.f32 0.25, %v2420_v12 }
 0xa92   :  { %v4673_v14 = vsel %vm3964_vm12, %v2424_v13, -1e+30 }
 0xa93   :  { %v2430_v60 = vsel %vm5249_vm2, %v4673_v14, -inf }
 0xa97   :  { %v2671_v31 = vpop.f32.mrf.mxu2 }
 0xa98   :  { %v2677_v62 = vmul.f32 0.25, %v2671_v31 }
 0xa99   :  { %v2544_v2 = vpop.f32.mrf.mxu0 }
 0xa9a   :  { %v2550_v61 = vmul.f32 0.25, %v2544_v2  ;;  %v4691_v41 = vsel %vm3958_vm11, %v2677_v62, -1e+30 }
 0xa9b   :  { %v2681_v24 = vsel %vm278_vm14, %v4691_v41, -inf }
 0xa9c   :  { %v4655_v36 = vsel %vm3958_vm11, %v2550_v61, -1e+30 }
 0xa9d   :  { %v2554_v59 = vsel %vm278_vm14, %v4655_v36, -inf }
 0xa9e   :  { %2555 = vmax.xlane.f32.xlu0 %v2554_v59 }
 0xaa0   :  { %2477 = vrot.lane.b32.xlu1 %v4520_v11, %s3739_s23  ;;  %v2674_v20 = vpop.f32.mrf.mxu2 }
 0xaa1   :  { %v2547_v18 = vpop.f32.mrf.mxu0  ;;  %v2678_v23 = vmul.f32 0.25, %v2674_v20 }
 0xaa2   :  { %v2551_v43 = vmul.f32 0.25, %v2547_v18 }
 0xaa3   :  { %v4698_v17 = vsel %vm3964_vm12, %v2678_v23, -1e+30 }
 0xaa4   :  { %v4685_v9 = vsel %vm3964_vm12, %v2551_v43, -1e+30  ;;  %v2684_v47 = vsel %vm5252_vm4, %v4698_v17, -inf }
 0xaa5   :  { %v2557_v3 = vsel %vm5251_vm13, %v4685_v9, -inf }
 0xaa6   :  { %2428 = vmax.xlane.f32.xlu0 %v2427_v1 }
 0xaa7   :  { %2475 = vrot.lane.b32.xlu2 %v4513_v32, %s3739_s23 }
 0xaba   :  { %2350 = vrot.lane.b32.xlu0 %v4520_v11, %s3738_s22 }
 0xaca   :  { %2431 = vmax.xlane.f32.xlu1 %v2430_v60 }
 0xad0   :  { %2177 = vmax.xlane.f32.xlu2 %v2176_v48 }
 0xad8   :  { %2558 = vmax.xlane.f32.xlu2 %v2557_v3 }
 0xadf   :  { %v1920_v28 = vpop.xlane.xlu2 %1919 }
 0xae0   :  { %v1924_v22 = vsub.f32 %v4604_v21, %v1920_v28  ;;  %2682 = vmax.xlane.f32.xlu2 %v2681_v24 }
 0xae2   :  { %v1926_v5 = vmul.f32 1.442695, %v1924_v22 }
 0xae4   :  { %3664 = vpow2.f32 %v1926_v5  ;;  %2685 = vmax.xlane.f32.xlu0 %v2684_v47 }
 0xae7   :  { %v1809_v29 = vpop.xlane.xlu2 %1808 }
 0xae8   :  { %3666 = vrcp.f32 %v1809_v29  ;;  %v1822_v4 = vand.u32 2147483647, %v1809_v29  ;;  %v1824_v45 = vand.u32 2147483648, %v1809_v29  ;;  %vm1818_vm12 = vweird.f32 %v1809_v29 }
 0xaea   :  { %v4702_v39 = vpop.eup %3664  ;;  %v2048_v15 = vpop.xlane.xlu0 %2047  ;;  %v1825_v56 = vor.u32 1.1754944e-38, %v1824_v45  ;;  %vm1823_vm15 = vcmp.eq.f32.partialorder %v1822_v4, 8.507059e+37 }
 0xaeb   :  { %v2052_v35 = vsub.f32 %v4614_v7, %v2048_v15  ;;  %v1930_v21 = vsel %vm278_vm14, %v4702_v39, 0.0 }
 0xaec   :  { %1931 = vadd.xlane.f32.xlu1 %v1930_v21 }
 0xaed   :  { %v2054_v33 = vmul.f32 1.442695, %v2052_v35 }
 0xaee   :  { %v3667_v51 = vpop.eup %3666 }
 0xaef   :  { %v1814_v25 = vmul.f32 %v3667_v51, %v1809_v29  ;;  %3668 = vpow2.f32 %v2054_v33  ;;  %vm1819_vm11 = vweird.f32 %v3667_v51 }
 0xaf0   :  { %vm1820_vm5 = vmor %vm1818_vm12, %vm1819_vm11 }
 0xaf1   :  { %v1815_v42 = vsub.f32 1.0, %v1814_v25 }
 0xaf2   :  { %v1923_v34 = vpop.xlane.xlu0 %1922  ;;  %v2051_v19 = vpop.xlane.xlu1 %2050 }
 0xaf3   :  { %v1816_v63 = vmul.f32 %v3667_v51, %v1815_v42  ;;  %v1925_v53 = vsub.f32 %v4620_v57, %v1923_v34  ;;  %v2053_v58 = vsub.f32 %v4625_v52, %v2051_v19 }
 0xaf5   :  { %v4709_v7 = vpop.eup %3668  ;;  %v1817_v49 = vadd.f32 %v3667_v51, %v1816_v63  ;;  %v1928_v55 = vmul.f32 1.442695, %v1925_v53  ;;  %v2056_v54 = vmul.f32 1.442695, %v2053_v58 }
 0xaf6   :  { %v2058_v44 = vsel %vm278_vm14, %v4709_v7, 0.0 }
 0xaf7   :  { %v1821_v2 = vsel %vm1820_vm5, %v3667_v51, %v1817_v49  ;;  %3670 = vpow2.f32 %v1928_v55  ;;  %2059 = vadd.xlane.f32.xlu2 %v2058_v44  ;;  %vm5254_vm5 = vmmov %vm5249_vm2 }
 0xaf8   :  { %v1826_v61 = vsel %vm1823_vm15, %v1825_v56, %v1821_v2  ;;  %3672 = vpow2.f32 %v2056_v54  ;;  %vm5255_vm15 = vmmov %vm5249_vm2 }
 0xaf9   :  { %v1827_v57 = vmul.f32 %v4608_v27, %v1826_v61 }
 0xafa   :  { %v2302_v52 = vpop.xlane.xlu2 %2301  ;;  %v2175_v46 = vpop.xlane.xlu1 %2174 }
 0xafb   :  { %v2306_v59 = vsub.f32 %v4637_v38, %v2302_v52  ;;  %3440 = vmatmul.msk.f32.vlgmr.msrb.gmra.mxu1 %vm278_vm14, %v1827_v57  ;;  %v2179_v13 = vsub.f32 %v4633_v40, %v2175_v46 }
 0xafd   :  { %v4716_v6 = vpop.eup %3670  ;;  %v2308_v1 = vmul.f32 1.442695, %v2306_v59  ;;  %v2181_v27 = vmul.f32 1.442695, %v2179_v13 }
 0xafe   :  { %v4718_v12 = vpop.eup %3672  ;;  %v1933_v16 = vsel %vm5249_vm2, %v4716_v6, 0.0 }
 0xaff   :  { %v2061_v60 = vsel %vm5253_vm3, %v4718_v12, 0.0  ;;  %1934 = vadd.xlane.f32.xlu1 %v1933_v16  ;;  %3674 = vpow2.f32 %v2308_v1  ;;  %vm5256_vm3 = vmmov %vm5249_vm2 }
 0xb00   :  { %2062 = vadd.xlane.f32.xlu0 %v2061_v60 }
 0xb02   :  { %v1812_v38 = vpop.xlane.xlu2 %1811  ;;  %v2305_v18 = vpop.xlane.xlu0 %2304 }
 0xb03   :  { %3676 = vrcp.f32 %v1812_v38  ;;  %v2307_v48 = vsub.f32 %v4647_v37, %v2305_v18  ;;  %v1839_v28 = vand.u32 2147483648, %v1812_v38  ;;  %v1837_v22 = vand.u32 2147483647, %v1812_v38 }
 0xb04   :  { %3678 = vpow2.f32 %v2181_v27  ;;  %vm1833_vm4 = vweird.f32 %v1812_v38 }
 0xb05   :  { %v4725_v31 = vpop.eup %3674  ;;  %v2310_v3 = vmul.f32 1.442695, %v2307_v48  ;;  %v1840_v47 = vor.u32 1.1754944e-38, %v1839_v28  ;;  %vm1838_vm12 = vcmp.eq.f32.partialorder %v1837_v22, 8.507059e+37 }
 0xb06   :  { %v2312_v40 = vsel %vm278_vm14, %v4725_v31, 0.0 }
 0xb07   :  { %2313 = vadd.xlane.f32.xlu1 %v2312_v40  ;;  %3680 = vpow2.f32 %v2310_v3 }
 0xb09   :  { %v3677_v43 = vpop.eup %3676 }
 0xb0a   :  { %v1829_v62 = vmul.f32 %v3677_v43, %v1812_v38  ;;  %v4730_v20 = vpop.eup %3678  ;;  %vm1834_vm13 = vweird.f32 %v3677_v43  ;;  %v4746_v19 = vpop.permute.xlu2 %2475 }
 0xb0b   :  { %v2185_v5 = vsel %vm278_vm14, %v4730_v20, 0.0  ;;  %vm1835_vm11 = vmor %vm1833_vm4, %vm1834_vm13 }
 0xb0c   :  { %v1830_v23 = vsub.f32 1.0, %v1829_v62 }
 0xb0d   :  { %v4735_v33 = vpop.eup %3680 }
 0xb0e   :  { %v1831_v24 = vmul.f32 %v3677_v43, %v1830_v23  ;;  %v2315_v42 = vsel %vm5254_vm5, %v4735_v33, 0.0 }
 0xb0f   :  { %2186 = vadd.xlane.f32.xlu1 %v2185_v5 }
 0xb10   :  { %v1832_v37 = vadd.f32 %v3677_v43, %v1831_v24 }
 0xb11   :  { %v2556_v29 = vpop.xlane.xlu0 %2555 }
 0xb12   :  { %v2560_v15 = vsub.f32 %v4655_v36, %v2556_v29  ;;  %v1836_v35 = vsel %vm1835_vm11, %v3677_v43, %v1832_v37 }
 0xb13   :  { %v1841_v21 = vsel %vm1838_vm12, %v1840_v47, %v1836_v35 }
 0xb14   :  { %v2562_v51 = vmul.f32 1.442695, %v2560_v15  ;;  %v1842_v25 = vmul.f32 %v4643_v50, %v1841_v21  ;;  %v4748_v50 = vpop.permute.xlu1 %2477 }
 0xb16   :  { %3682 = vpow2.f32 %v2562_v51  ;;  %3441 = vmatmul.msk.f32.gmra.mxu1 %vm278_vm14, %v1842_v25 }
 0xb17   :  { %2316 = vadd.xlane.f32.xlu1 %v2315_v42 }
 0xb19   :  { %v2429_v45 = vpop.xlane.xlu0 %2428 }
 0xb1a   :  { %v2433_v58 = vsub.f32 %v4663_v8, %v2429_v45 }
 0xb1c   :  { %v4741_v4 = vpop.eup %3682  ;;  %v2435_v55 = vmul.f32 1.442695, %v2433_v58 }
 0xb1d   :  { %v2566_v36 = vsel %vm278_vm14, %v4741_v4, 0.0 }
 0xb1f   :  { %2567 = vadd.xlane.f32.xlu1 %v2566_v36 }
 0xb2c   :  { %v2351_v34 = vpop.permute.xlu0 %2350 }
 0xb2d   :  { %3467 = vmatpush.msk.msrb.mxu1 %vm334_vm10, %v2351_v34 }
 0xb3d   :  { %v2432_v54 = vpop.xlane.xlu1 %2431 }
 0xb3e   :  { %v2434_v61 = vsub.f32 %v4673_v14, %v2432_v54 }
 0xb43   :  { %v2178_v63 = vpop.xlane.xlu2 %2177 }
 0xb44   :  { %v2180_v53 = vsub.f32 %v4679_v0, %v2178_v63  ;;  %v2437_v0 = vmul.f32 1.442695, %v2434_v61 }
 0xb46   :  { %v2183_v49 = vmul.f32 1.442695, %v2180_v53 }
 0xb48   :  { %3684 = vpow2.f32 %v2183_v49 }
 0xb49   :  { %3686 = vpow2.f32 %v2435_v55 }
 0xb4b   :  { %v2559_v56 = vpop.xlane.xlu2 %2558 }
 0xb4c   :  { %v2561_v44 = vsub.f32 %v4685_v9, %v2559_v56 }
 0xb4e   :  { %v4753_v2 = vpop.eup %3684  ;;  %v2564_v57 = vmul.f32 1.442695, %v2561_v44 }
 0xb4f   :  { %v2188_v52 = vsel %vm5255_vm15, %v4753_v2, 0.0  ;;  %v4758_v46 = vpop.eup %3686 }
 0xb50   :  { %3688 = vpow2.f32 %v2564_v57  ;;  %2189 = vadd.xlane.f32.xlu2 %v2188_v52  ;;  %v2439_v13 = vsel %vm278_vm14, %v4758_v46, 0.0 }
 0xb51   :  { %3690 = vpow2.f32 %v2437_v0 }
 0xb53   :  { %v2683_v8 = vpop.xlane.xlu2 %2682 }
 0xb54   :  { %v2687_v59 = vsub.f32 %v4691_v41, %v2683_v8 }
 0xb56   :  { %v4761_v1 = vpop.eup %3688  ;;  %v2689_v9 = vmul.f32 1.442695, %v2687_v59 }
 0xb57   :  { %v2569_v14 = vsel %vm5249_vm2, %v4761_v1, 0.0  ;;  %v4767_v16 = vpop.eup %3690  ;;  %v4775_v62 = vpop.xlane.xlu0 %2685 }
 0xb58   :  { %3692 = vpow2.f32 %v2689_v9  ;;  %2440 = vadd.xlane.f32.xlu2 %v2439_v13  ;;  %2570 = vadd.xlane.f32.xlu1 %v2569_v14  ;;  %v2442_v41 = vsel %vm5256_vm3, %v4767_v16, 0.0 }
 0xb5e   :  { %v4769_v60 = vpop.eup %3692 }
 0xb5f   :  { %v1932_v27 = vpop.xlane.xlu1 %1931  ;;  %v2693_v38 = vsel %vm278_vm14, %v4769_v60, 0.0 }
 0xb60   :  { %3694 = vrcp.f32 %v1932_v27  ;;  %2443 = vadd.xlane.f32.xlu2 %v2442_v41  ;;  %2694 = vadd.xlane.f32.xlu0 %v2693_v38  ;;  %v1947_v43 = vand.u32 2147483648, %v1932_v27  ;;  %v1945_v28 = vand.u32 2147483647, %v1932_v27  ;;  %vm1941_vm4 = vweird.f32 %v1932_v27 }
 0xb62   :  { %v1948_v22 = vor.u32 1.1754944e-38, %v1947_v43  ;;  %vm1946_vm12 = vcmp.eq.f32.partialorder %v1945_v28, 8.507059e+37  ;;  %v2688_v28 = vsub.f32 %v4698_v17, %v4775_v62 }
 0xb66   :  { %v3695_v18 = vpop.eup %3694 }
 0xb67   :  { %v1937_v48 = vmul.f32 %v3695_v18, %v1932_v27  ;;  %vm1942_vm13 = vweird.f32 %v3695_v18 }
 0xb68   :  { %vm1943_vm11 = vmor %vm1941_vm4, %vm1942_vm13 }
 0xb69   :  { %v1938_v40 = vsub.f32 1.0, %v1937_v48 }
 0xb6a   :  { %v2060_v3 = vpop.xlane.xlu2 %2059 }
 0xb6b   :  { %v1939_v23 = vmul.f32 %v3695_v18, %v1938_v40  ;;  %3696 = vrcp.f32 %v2060_v3  ;;  %v2075_v25 = vand.u32 2147483648, %v2060_v3  ;;  %v2073_v36 = vand.u32 2147483647, %v2060_v3 }
 0xb6c   :  { %vm2069_vm15 = vweird.f32 %v2060_v3 }
 0xb6d   :  { %v1940_v24 = vadd.f32 %v3695_v18, %v1939_v23  ;;  %v2076_v34 = vor.u32 1.1754944e-38, %v2075_v25  ;;  %vm2074_vm3 = vcmp.eq.f32.partialorder %v2073_v36, 8.507059e+37 }
 0xb6f   :  { %v1944_v5 = vsel %vm1943_vm11, %v3695_v18, %v1940_v24 }
 0xb70   :  { %v1949_v37 = vsel %vm1946_vm12, %v1948_v22, %v1944_v5  ;;  %v2691_v5 = vmul.f32 1.442695, %v2688_v28 }
 0xb71   :  { %v3697_v47 = vpop.eup %3696  ;;  %2602 = vrot.lane.b32.xlu1 %v4513_v32, %s3740_s24  ;;  %v1950_v29 = vmul.f32 %v4702_v39, %v1949_v37 }
 0xb72   :  { %v2065_v15 = vmul.f32 %v3697_v47, %v2060_v3  ;;  %v1935_v35 = vpop.xlane.xlu1 %1934  ;;  %vm2070_vm5 = vweird.f32 %v3697_v47 }
 0xb73   :  { %v2063_v21 = vpop.xlane.xlu0 %2062  ;;  %3698 = vrcp.f32 %v1935_v35  ;;  %3447 = vmatmul.msk.f32.vlgmr.msra.gmra.mxu3 %vm278_vm14, %v1950_v29  ;;  %vm2071_vm2 = vmor %vm2069_vm15, %vm2070_vm5  ;;  %v1962_v56 = vand.u32 2147483648, %v1935_v35  ;;  %v1960_v57 = vand.u32 2147483647, %v1935_v35  ;;  %vm1956_vm11 = vweird.f32 %v1935_v35 }
 0xb74   :  { %v2066_v51 = vsub.f32 1.0, %v2065_v15  ;;  %3700 = vrcp.f32 %v2063_v21  ;;  %3474 = vmatpush.msk.msra.mxu3 %vm334_vm10, %v4748_v50  ;;  %2731 = vrot.lane.b32.xlu0 %v4520_v11, %s3741_s25  ;;  %v2090_v0 = vand.u32 2147483648, %v2063_v21  ;;  %v2088_v59 = vand.u32 2147483647, %v2063_v21 }
 0xb75   :  { %vm2084_vm12 = vweird.f32 %v2063_v21  ;;  %v1963_v9 = vor.u32 1.1754944e-38, %v1962_v56  ;;  %vm1961_vm15 = vcmp.eq.f32.partialorder %v1960_v57, 8.507059e+37 }
 0xb76   :  { %v2067_v42 = vmul.f32 %v3697_v47, %v2066_v51  ;;  %2503 = vmatpush.msra.mxu3 %v4746_v19  ;;  %v2091_v14 = vor.u32 1.1754944e-38, %v2090_v0 }
 0xb78   :  { %v2068_v39 = vadd.f32 %v3697_v47, %v2067_v42  ;;  %2348 = vrot.lane.b32.xlu2 %v4513_v32, %s3738_s22 }
 0xb79   :  { %v3699_v45 = vpop.eup %3698 }
 0xb7a   :  { %v3701_v63 = vpop.eup %3700  ;;  %v2072_v53 = vsel %vm2071_vm2, %v3697_v47, %v2068_v39  ;;  %v1952_v50 = vmul.f32 %v3699_v45, %v1935_v35  ;;  %v4788_v55 = vpop.xlane.xlu1 %2313  ;;  %vm1957_vm13 = vweird.f32 %v3699_v45 }
 0xb7b   :  { %v2077_v58 = vsel %vm2074_vm3, %v2076_v34, %v2072_v53  ;;  %v2080_v49 = vmul.f32 %v3701_v63, %v2063_v21  ;;  %vm2085_vm4 = vweird.f32 %v3701_v63  ;;  %vm1958_vm5 = vmor %vm1956_vm11, %vm1957_vm13  ;;  %vm2089_vm3 = vcmp.eq.f32.partialorder %v2088_v59, 8.507059e+37 }
 0xb7c   :  { %v1953_v54 = vsub.f32 1.0, %v1952_v50  ;;  %2729 = vrot.lane.b32.xlu0 %v4513_v32, %s3741_s25  ;;  %v2078_v44 = vmul.f32 %v4709_v7, %v2077_v58  ;;  %vm2086_vm2 = vmor %vm2084_vm12, %vm2085_vm4 }
 0xb7d   :  { %v2081_v19 = vsub.f32 1.0, %v2080_v49 }
 0xb7e   :  { %v1954_v61 = vmul.f32 %v3699_v45, %v1953_v54  ;;  %3454 = vmatmul.msk.f32.vlgmr.msra.gmra.mxu1 %vm278_vm14, %v2078_v44 }
 0xb7f   :  { %v2082_v52 = vmul.f32 %v3701_v63, %v2081_v19  ;;  %v2329_v19 = vand.u32 2147483648, %v4788_v55 }
 0xb80   :  { %v1955_v8 = vadd.f32 %v3699_v45, %v1954_v61  ;;  %v2327_v61 = vand.u32 2147483647, %v4788_v55 }
 0xb81   :  { %v2083_v13 = vadd.f32 %v3701_v63, %v2082_v52 }
 0xb82   :  { %v1959_v32 = vsel %vm1958_vm5, %v3699_v45, %v1955_v8  ;;  %v2187_v7 = vpop.xlane.xlu1 %2186  ;;  %vm5257_vm5 = vcmask 74752  }
 0xb83   :  { %v1964_v27 = vsel %vm1961_vm15, %v1963_v9, %v1959_v32  ;;  %v2087_v41 = vsel %vm2086_vm2, %v3701_v63, %v2083_v13  ;;  %3702 = vrcp.f32 %v2187_v7  ;;  %v2202_v23 = vand.u32 2147483648, %v2187_v7 }
 0xb84   :  { %2604 = vrot.lane.b32.xlu0 %v4520_v11, %s3740_s24  ;;  %v1965_v38 = vmul.f32 %v4716_v6, %v1964_v27  ;;  %v2092_v18 = vsel %vm2089_vm3, %v2091_v14, %v2087_v41  ;;  %v2200_v11 = vand.u32 2147483647, %v2187_v7  ;;  %vm2196_vm4 = vweird.f32 %v2187_v7 }
 0xb85   :  { %v2093_v48 = vmul.f32 %v4718_v12, %v2092_v18  ;;  %v2203_v6 = vor.u32 1.1754944e-38, %v2202_v23  ;;  %3704 = vpow2.f32 %v2691_v5  ;;  %v2330_v32 = vor.u32 1.1754944e-38, %v2329_v19 }
 0xb86   :  { %3448 = vmatmul.msk.f32.gmra.mxu3 %vm278_vm14, %v1965_v38  ;;  %vm2201_vm12 = vcmp.eq.f32.partialorder %v2200_v11, 8.507059e+37  ;;  %3706 = vrcp.f32 %v4788_v55 }
 0xb87   :  { %3455 = vmatmul.msk.f32.gmra.mxu1 %vm278_vm14, %v2093_v48 }
 0xb89   :  { %v3703_v40 = vpop.eup %3702 }
 0xb8a   :  { %v2192_v43 = vmul.f32 %v3703_v40, %v2187_v7  ;;  %vm2197_vm13 = vweird.f32 %v3703_v40  ;;  %v4809_v62 = vpop.xlane.xlu1 %2316 }
 0xb8b   :  { %vm2198_vm11 = vmor %vm2196_vm4, %vm2197_vm13  ;;  %v4804_v29 = vpop.eup %3704  ;;  %3708 = vrcp.f32 %v4809_v62  ;;  %vm2323_vm4 = vweird.f32 %v4788_v55  ;;  %v2344_v23 = vand.u32 2147483648, %v4809_v62  ;;  %v2342_v5 = vand.u32 2147483647, %v4809_v62 }
 0xb8c   :  { %v2193_v3 = vsub.f32 1.0, %v2192_v43  ;;  %v2696_v17 = vsel %vm5257_vm5, %v4804_v29, 0.0  ;;  %v3707_v15 = vpop.eup %3706  ;;  %vm2328_vm5 = vcmp.eq.f32.partialorder %v2327_v61, 8.507059e+37 }
 0xb8d   :  { %v2319_v21 = vmul.f32 %v3707_v15, %v4788_v55  ;;  %vm2324_vm2 = vweird.f32 %v3707_v15 }
 0xb8e   :  { %v2194_v24 = vmul.f32 %v3703_v40, %v2193_v3 }
 0xb90   :  { %v2195_v22 = vadd.f32 %v3703_v40, %v2194_v24 }
 0xb91   :  { %v4813_v51 = vpop.eup %3708 }
 0xb92   :  { %v2199_v12 = vsel %vm2198_vm11, %v3703_v40, %v2195_v22  ;;  %v2334_v45 = vmul.f32 %v4813_v51, %v4809_v62  ;;  %vm4830_vm11 = vmor %vm2323_vm4, %vm2324_vm2  ;;  %v4839_v14 = vpop.xlane.xlu1 %2567  ;;  %vm2339_vm2 = vweird.f32 %v4813_v51 }
 0xb93   :  { %v2204_v37 = vsel %vm2201_vm12, %v2203_v6, %v2199_v12 }
 0xb94   :  { %v2205_v47 = vmul.f32 %v4730_v20, %v2204_v37  ;;  %v2320_v20 = vsub.f32 1.0, %v2319_v21  ;;  %v2335_v58 = vsub.f32 1.0, %v2334_v45 }
 0xb96   :  { %3461 = vmatmul.msk.f32.vlgmr.msrb.gmra.mxu3 %vm278_vm14, %v2205_v47  ;;  %v2321_v39 = vmul.f32 %v3707_v15, %v2320_v20  ;;  %v2336_v55 = vmul.f32 %v4813_v51, %v2335_v58 }
 0xb98   :  { %v2322_v53 = vadd.f32 %v3707_v15, %v2321_v39  ;;  %v2337_v43 = vadd.f32 %v4813_v51, %v2336_v55 }
 0xb9a   :  { %v2326_v13 = vsel %vm4830_vm11, %v3707_v15, %v2322_v53 }
 0xb9b   :  { %v2331_v18 = vsel %vm2328_vm5, %v2330_v32, %v2326_v13  ;;  %vm2343_vm5 = vcmp.eq.f32.partialorder %v2342_v5, 8.507059e+37 }
 0xb9c   :  { %v2332_v6 = vmul.f32 %v4725_v31, %v2331_v18 }
 0xba1   :  { %2697 = vadd.xlane.f32.xlu2 %v2696_v17 }
 0xbc3   :  { %v2190_v35 = vpop.xlane.xlu2 %2189 }
 0xbc4   :  { %3710 = vrcp.f32 %v2190_v35  ;;  %v2217_v50 = vand.u32 2147483648, %v2190_v35  ;;  %vm2211_vm3 = vweird.f32 %v2190_v35  ;;  %v2215_v54 = vand.u32 2147483647, %v2190_v35 }
 0xbc6   :  { %v2218_v59 = vor.u32 1.1754944e-38, %v2217_v50  ;;  %vm2216_vm12 = vcmp.eq.f32.partialorder %v2215_v54, 8.507059e+37 }
 0xbca   :  { %v3711_v25 = vpop.eup %3710 }
 0xbcb   :  { %v2207_v42 = vmul.f32 %v3711_v25, %v2190_v35  ;;  %v2441_v36 = vpop.xlane.xlu2 %2440  ;;  %vm2212_vm15 = vweird.f32 %v3711_v25  ;;  %v2345_v35 = vor.u32 1.1754944e-38, %v2344_v23  ;;  %v4861_v31 = vpop.xlane.xlu1 %2570 }
 0xbcc   :  { %3712 = vrcp.f32 %v2441_v36  ;;  %vm4818_vm13 = vmor %vm2211_vm3, %vm2212_vm15  ;;  %v2456_v41 = vand.u32 2147483648, %v2441_v36  ;;  %v2454_v40 = vand.u32 2147483647, %v2441_v36  ;;  %vm2338_vm3 = vweird.f32 %v4809_v62 }
 0xbcd   :  { %v2208_v34 = vsub.f32 1.0, %v2207_v42  ;;  %v2596_v23 = vand.u32 2147483647, %v4861_v31 }
 0xbce   :  { %v2457_v24 = vor.u32 1.1754944e-38, %v2456_v41  ;;  %vm2455_vm11 = vcmp.eq.f32.partialorder %v2454_v40, 8.507059e+37 }
 0xbcf   :  { %v2209_v63 = vmul.f32 %v3711_v25, %v2208_v34 }
 0xbd1   :  { %v2210_v49 = vadd.f32 %v3711_v25, %v2209_v63 }
 0xbd2   :  { %v3713_v44 = vpop.eup %3712 }
 0xbd3   :  { %v4824_v57 = vpop.xlane.xlu0 %2694  ;;  %v4826_v52 = vpop.xlane.xlu2 %2443  ;;  %v2214_v0 = vsel %vm4818_vm13, %v3711_v25, %v2210_v49  ;;  %v2446_v9 = vmul.f32 %v3713_v44, %v2441_v36  ;;  %vm2451_vm15 = vweird.f32 %v3713_v44  ;;  %vm2450_vm13 = vweird.f32 %v2441_v36 }
 0xbd4   :  { %3714 = vrcp.f32 %v4824_v57  ;;  %v2219_v27 = vsel %vm2216_vm12, %v2218_v59, %v2214_v0  ;;  %vm2452_vm4 = vmor %vm2450_vm13, %vm2451_vm15  ;;  %v2471_v42 = vand.u32 2147483648, %v4826_v52  ;;  %v2469_v62 = vand.u32 2147483647, %v4826_v52  ;;  %v4883_v59 = vpop.f32.mrf.mxu1 }
 0xbd5   :  { %3716 = vrcp.f32 %v4826_v52  ;;  %v2447_v7 = vsub.f32 1.0, %v2446_v9  ;;  %v2220_v38 = vmul.f32 %v4753_v2, %v2219_v27  ;;  %vm2340_vm12 = vmor %vm2338_vm3, %vm2339_vm2  ;;  %vm2465_vm2 = vweird.f32 %v4826_v52 }
 0xbd6   :  { %3718 = vrcp.f32 %v4839_v14  ;;  %v2341_v15 = vsel %vm2340_vm12, %v4813_v51, %v2337_v43  ;;  %v2472_v34 = vor.u32 1.1754944e-38, %v2471_v42  ;;  %vm2470_vm13 = vcmp.eq.f32.partialorder %v2469_v62, 8.507059e+37 }
 0xbd7   :  { %v2448_v48 = vmul.f32 %v3713_v44, %v2447_v7  ;;  %3462 = vmatmul.msk.f32.gmra.mxu3 %vm278_vm14, %v2220_v38  ;;  %v2346_v39 = vsel %vm2343_vm5, %v2345_v35, %v2341_v15  ;;  %3720 = vrcp.f32 %v4861_v31  ;;  %v2710_v54 = vand.u32 2147483648, %v4824_v57 }
 0xbd8   :  { %v2347_v63 = vmul.f32 %v4735_v33, %v2346_v39  ;;  %v2708_v33 = vand.u32 2147483647, %v4824_v57  ;;  %v2581_v7 = vand.u32 2147483647, %v4839_v14 }
 0xbd9   :  { %v2449_v28 = vadd.f32 %v3713_v44, %v2448_v48  ;;  %v2711_v8 = vor.u32 1.1754944e-38, %v2710_v54  ;;  %v3503_v54 = vld [vmem:[%s5226_s2 + $0xe0] sm:$0xff] }
 0xbda   :  { %v4846_v3 = vpop.eup %3714  ;;  %vm2709_vm5 = vcmp.eq.f32.partialorder %v2708_v33, 8.507059e+37  ;;  %v3499_v33 = vld [vmem:[%s5226_s2 + $0xc0] sm:$0xff] }
 0xbdb   :  { %v3717_v2 = vpop.eup %3716  ;;  %v2700_v11 = vmul.f32 %v4846_v3, %v4824_v57  ;;  %v2349_v22 = vpop.permute.xlu2 %2348  ;;  %v2453_v12 = vsel %vm2452_vm4, %v3713_v44, %v2449_v28  ;;  %vm2705_vm4 = vweird.f32 %v4846_v3 }
 0xbdc   :  { %v2461_v37 = vmul.f32 %v3717_v2, %v4826_v52  ;;  %2376 = vmatpush.msrb.mxu1 %v2349_v22  ;;  %v2458_v47 = vsel %vm2455_vm11, %v2457_v24, %v2453_v12  ;;  %v3719_v25 = vpop.eup %3718  ;;  %vm2466_vm15 = vweird.f32 %v3717_v2  ;;  %vm2704_vm11 = vweird.f32 %v4824_v57  ;;  %v4890_v18 = vpop.f32.mrf.mxu1 }
 0xbdd   :  { %v2701_v17 = vsub.f32 1.0, %v2700_v11  ;;  %3468 = vmatmul.msk.f32.vlgmr.msrb.gmra.mxu1 %vm278_vm14, %v2332_v6  ;;  %v2459_v20 = vmul.f32 %v4758_v46, %v2458_v47  ;;  %v2573_v51 = vmul.f32 %v3719_v25, %v4839_v14  ;;  %vm2467_vm3 = vmor %vm2465_vm2, %vm2466_vm15  ;;  %v3721_v44 = vpop.eup %3720  ;;  %vm2578_vm15 = vweird.f32 %v3719_v25 }
 0xbde   :  { %v2462_v21 = vsub.f32 1.0, %v2461_v37  ;;  %vm2706_vm12 = vmor %vm2704_vm11, %vm2705_vm4  ;;  %v2588_v0 = vmul.f32 %v3721_v44, %v4861_v31  ;;  %v2583_v57 = vand.u32 2147483648, %v4839_v14  ;;  %vm2577_vm2 = vweird.f32 %v4839_v14 }
 0xbdf   :  { %v2702_v45 = vmul.f32 %v4846_v3, %v2701_v17  ;;  %3475 = vmatmul.msk.f32.vlgmr.msra.gmra.mxu3 %vm278_vm14, %v2459_v20  ;;  %v2574_v49 = vsub.f32 1.0, %v2573_v51  ;;  %vm2593_vm4 = vweird.f32 %v3721_v44  ;;  %vm2592_vm11 = vweird.f32 %v4861_v31 }
 0xbe0   :  { %v2463_v36 = vmul.f32 %v3717_v2, %v2462_v21  ;;  %v2589_v13 = vsub.f32 1.0, %v2588_v0  ;;  %v2584_v38 = vor.u32 1.1754944e-38, %v2583_v57  ;;  %v3496_v0 = vld [vmem:[%s5226_s2 + $0xa8] sm:$0xff] }
 0xbe1   :  { %v2703_v50 = vadd.f32 %v4846_v3, %v2702_v45  ;;  %v2575_v52 = vmul.f32 %v3719_v25, %v2574_v49  ;;  %v3504_v49 = vld [vmem:[%s5226_s2 + $0xe8] sm:$0xff] }
 0xbe2   :  { %v2464_v46 = vadd.f32 %v3717_v2, %v2463_v36  ;;  %v2590_v41 = vmul.f32 %v3721_v44, %v2589_v13  ;;  %v3492_v13 = vld [vmem:[%s5226_s2 + $0x88] sm:$0xff] }
 0xbe3   :  { %v2707_v61 = vsel %vm2706_vm12, %v4846_v3, %v2703_v50  ;;  %v2576_v9 = vadd.f32 %v3719_v25, %v2575_v52  ;;  %v2598_v3 = vand.u32 2147483648, %v4861_v31  ;;  %vm2594_vm12 = vmor %vm2592_vm11, %vm2593_vm4  ;;  %v3506_v50 = vld [vmem:[%s5226_s2 + $0xf8] sm:$0xff]  ;;  %v3497_v52 = vld [vmem:[%s5226_s2 + $0xb0] sm:$0xff] }
 0xbe4   :  { %v2468_v53 = vsel %vm2467_vm3, %v3717_v2, %v2464_v46  ;;  %vm2579_vm3 = vmor %vm2577_vm2, %vm2578_vm15  ;;  %v2591_v43 = vadd.f32 %v3721_v44, %v2590_v41  ;;  %2853 = vmatpush.msrb.mxu0 %v3506_v50 }
 0xbe5   :  { %3469 = vmatmul.msk.f32.gmra.mxu1 %vm278_vm14, %v2347_v63  ;;  %v2473_v58 = vsel %vm2470_vm13, %v2472_v34, %v2468_v53  ;;  %v2580_v27 = vsel %vm2579_vm3, %v3719_v25, %v2576_v9  ;;  %vm2582_vm13 = vcmp.eq.f32.partialorder %v2581_v7, 8.507059e+37  ;;  %v2599_v2 = vor.u32 1.1754944e-38, %v2598_v3  ;;  %v3493_v9 = vld [vmem:[%s5226_s2 + $0x90] sm:$0xff] }
 0xbe6   :  { %v2732_v19 = vpop.permute.xlu0 %2731  ;;  %v2474_v56 = vmul.f32 %v4767_v16, %v2473_v58  ;;  %v2712_v16 = vsel %vm2709_vm5, %v2711_v8, %v2707_v61  ;;  %v2585_v48 = vsel %vm2582_vm13, %v2584_v38, %v2580_v27  ;;  %v2595_v28 = vsel %vm2594_vm12, %v3721_v44, %v2591_v43  ;;  %v3505_v58 = vld [vmem:[%s5226_s2 + $0xf0] sm:$0xff]  ;;  %v3500_v44 = vld [vmem:[%s5226_s2 + $0xc8] sm:$0xff]  ;;  %v3498_v61 = vld [vmem:[%s5226_s2 + $0xb8] sm:$0xff] }
 0xbe7   :  { %3488 = vmatpush.msk.msrb.mxu3 %vm334_vm10, %v2732_v19  ;;  %v2713_v32 = vmul.f32 %v4769_v60, %v2712_v16  ;;  %v2603_v60 = vpop.permute.xlu1 %2602  ;;  %v2586_v14 = vmul.f32 %v4741_v4, %v2585_v48  ;;  %vm2597_vm5 = vcmp.eq.f32.partialorder %v2596_v23, 8.507059e+37  ;;  %2854 = vmatpush.msrb.mxu0 %v3505_v58  ;;  %v3502_v19 = vld [vmem:[%s5226_s2 + $0xd8] sm:$0xff]  ;;  %v3495_v8 = vld [vmem:[%s5226_s2 + $0xa0] sm:$0xff]  ;;  %vm5263_vm13 = vcmask 916480  }
 0xbe8   :  { %3476 = vmatmul.msk.f32.gmra.mxu3 %vm278_vm14, %v2474_v56  ;;  %v2600_v11 = vsel %vm2597_vm5, %v2599_v2, %v2595_v28  ;;  %v3501_v56 = vld [vmem:[%s5226_s2 + $0xd0] sm:$0xff]  ;;  %v3494_v16 = vld [vmem:[%s5226_s2 + $0x98] sm:$0xff]  ;;  %vm5265_vm11 = vmmov %vm5263_vm13 }
 0xbe9   :  { %v2601_v22 = vmul.f32 %v4761_v1, %v2600_v11  ;;  %2855 = vmatpush.msrb.mxu0 %v3504_v49  ;;  %v3514_v49 = vld [vmem:[%s5227_s3 + $0x78] sm:$0xff] }
 0xbea   :  { %2985 = vmatpush.msrb.mxu2 %v3514_v49 }
 0xbeb   :  { %2856 = vmatpush.msrb.mxu0 %v3503_v54  ;;  %v3511_v54 = vld [vmem:[%s5227_s3 + $0x60] sm:$0xff] }
 0xbed   :  { %2857 = vmatpush.msrb.mxu0 %v3502_v19  ;;  %v3512_v19 = vld [vmem:[%s5227_s3 + $0x68] sm:$0xff] }
 0xbee   :  { %v2730_v55 = vpop.permute.xlu0 %2729  ;;  %2986 = vmatpush.msrb.mxu2 %v3512_v19  ;;  %v3525_v19 = vld [vmem:[%s5229_s4 + $0x98] sm:$0xff] }
 0xbef   :  { %2757 = vmatpush.msrb.mxu3 %v2730_v55  ;;  %2858 = vmatpush.msrb.mxu0 %v3501_v56  ;;  %v3491_v55 = vld [vmem:[%s5226_s2 + $0x80] sm:$0xff]  ;;  %v3509_v56 = vld [vmem:[%s5227_s3 + $0x50] sm:$0xff] }
 0xbf0   :  { %3489 = vmatmul.msk.f32.vlgmr.msrb.gmra.mxu3 %vm278_vm14, %v2713_v32 }
 0xbf1   :  { %2859 = vmatpush.msrb.mxu0 %v3500_v44  ;;  %v3510_v44 = vld [vmem:[%s5227_s3 + $0x58] sm:$0xff] }
 0xbf2   :  { %2987 = vmatpush.msrb.mxu2 %v3510_v44  ;;  %v3524_v44 = vld [vmem:[%s5229_s4 + $0x90] sm:$0xff] }
 0xbf3   :  { %2860 = vmatpush.msrb.mxu0 %v3499_v33  ;;  %v3507_v33 = vld [vmem:[%s5227_s3 + $0x40] sm:$0xff] }
 0xbf5   :  { %2861 = vmatpush.msrb.mxu0 %v3498_v61  ;;  %v3508_v61 = vld [vmem:[%s5227_s3 + $0x48] sm:$0xff] }
 0xbf6   :  { %v2605_v40 = vpop.permute.xlu0 %2604  ;;  %v1997_v6 = vpop.f32.mrf.mxu3  ;;  %2988 = vmatpush.msrb.mxu2 %v3508_v61 }
 0xbf7   :  { %3481 = vmatpush.msk.msra.mxu1 %vm334_vm10, %v2605_v40  ;;  %2862 = vmatpush.msrb.mxu0 %v3497_v52 }
 0xbf9   :  { %2630 = vmatpush.msra.mxu1 %v2603_v60  ;;  %2863 = vmatpush.msrb.mxu0 %v3496_v0 }
 0xbfa   :  { %3482 = vmatmul.msk.f32.vlgmr.msra.gmra.mxu1 %vm278_vm14, %v2586_v14 }
 0xbfb   :  { %v2124_v24 = vpop.f32.mrf.mxu1  ;;  %2864 = vmatpush.msrb.mxu0 %v3495_v8 }
 0xbfc   :  { %2775 = vrot.lane.b32.xlu0 %v2124_v24, %s3740_s24 }
 0xbfd   :  { %2865 = vmatpush.msrb.mxu0 %v3494_v16 }
 0xbff   :  { %2866 = vmatpush.msrb.mxu0 %v3493_v9 }
 0xc01   :  { %2867 = vmatpush.msrb.mxu0 %v3492_v13 }
 0xc02   :  { %3483 = vmatmul.msk.f32.gmra.mxu1 %vm278_vm14, %v2601_v22 }
 0xc03   :  { %2868 = vmatpush.msrb.mxu0 %v3491_v55 }
 0xc04   :  { %2767 = vrot.lane.b32.xlu0 %v1997_v6, %s3741_s25  ;;  %v2127_v36 = vpop.f32.mrf.mxu1 }
 0xc09   :  { %v2000_v4 = vpop.f32.mrf.mxu3 }
 0xc14   :  { %v2698_v5 = vpop.xlane.xlu2 %2697 }
 0xc15   :  { %3722 = vrcp.f32 %v2698_v5  ;;  %v2725_v15 = vand.u32 2147483648, %v2698_v5  ;;  %v2723_v31 = vand.u32 2147483647, %v2698_v5  ;;  %vm2719_vm15 = vweird.f32 %v2698_v5 }
 0xc17   :  { %v2726_v21 = vor.u32 1.1754944e-38, %v2725_v15  ;;  %vm2724_vm3 = vcmp.eq.f32.partialorder %v2723_v31, 8.507059e+37 }
 0xc19   :  { %v2251_v12 = vpop.f32.mrf.mxu3 }
 0xc1a   :  { %2783 = vrot.lane.b32.xlu2 %v2251_v12, %s3739_s23 }
 0xc1b   :  { %v3723_v37 = vpop.eup %3722 }
 0xc1c   :  { %v2715_v47 = vmul.f32 %v3723_v37, %v2698_v5  ;;  %vm2720_vm10 = vweird.f32 %v3723_v37 }
 0xc1d   :  { %vm2721_vm2 = vmor %vm2719_vm15, %vm2720_vm10 }
 0xc1e   :  { %v2716_v17 = vsub.f32 1.0, %v2715_v47 }
 0xc20   :  { %v2717_v35 = vmul.f32 %v3723_v37, %v2716_v17 }
 0xc22   :  { %v2718_v1 = vadd.f32 %v3723_v37, %v2717_v35 }
 0xc24   :  { %v2722_v20 = vsel %vm2721_vm2, %v3723_v37, %v2718_v1 }
 0xc25   :  { %v2727_v25 = vsel %vm2724_vm3, %v2726_v21, %v2722_v20 }
 0xc26   :  { %v2728_v42 = vmul.f32 %v4804_v29, %v2727_v25 }
 0xc28   :  { %3490 = vmatmul.msk.f32.gmra.mxu3 %vm278_vm14, %v2728_v42  ;;  %vm5262_vm14 = vcmask 785408  }
 0xc29   :  { %vm5264_vm4 = vmmov %vm5262_vm14 }
 0xc5a   :  { %v2378_v39 = vpop.f32.mrf.mxu1  ;;  %v2254_v62 = vpop.f32.mrf.mxu3 }
 0xc5b   :  { %2791 = vrot.lane.b32.xlu0 %v2378_v39, %s3738_s22  ;;  %2785 = vrot.lane.b32.xlu2 %v2254_v62, %s3739_s23 }
 0xc62   :  { %v2505_v45 = vpop.f32.mrf.mxu3  ;;  %v2381_v46 = vpop.f32.mrf.mxu1 }
 0xc63   :  { %2799 = vrot.lane.b32.xlu1 %v2505_v45, %s3736_s20 }
 0xc6b   :  { %v2508_v51 = vpop.f32.mrf.mxu3 }
 0xc6e   :  { %v2776_v57 = vpop.permute.xlu0 %2775 }
 0xc73   :  { %v2759_v34 = vpop.f32.mrf.mxu3 }
 0xc74   :  { %2815 = vrot.lane.b32.xlu1 %v2759_v34, %s3735_s19  ;;  %v2784_v48 = vpop.permute.xlu2 %2783 }
 0xc76   :  { %v2768_v32 = vpop.permute.xlu0 %2767 }
 0xc77   :  { %v2632_v63 = vpop.f32.mrf.mxu1  ;;  %v2821_v7 = vsel %vm238_vm9, %v4883_v59, %v2768_v32 }
 0xc78   :  { %2807 = vrot.lane.b32.xlu0 %v2632_v63, %s3737_s21  ;;  %v2823_v38 = vsel %vm92_vm0, %v2821_v7, %v2776_v57 }
 0xc79   :  { %v2825_v40 = vsel %vm1311_vm6, %v2823_v38, %v2784_v48 }
 0xc7c   :  { %2777 = vrot.lane.b32.xlu1 %v2127_v36, %s3740_s24 }
 0xc7f   :  { %v2635_v29 = vpop.f32.mrf.mxu1 }
 0xc80   :  { %2769 = vrot.lane.b32.xlu0 %v2000_v4, %s3741_s25  ;;  %2809 = vrot.lane.b32.xlu2 %v2635_v29, %s3737_s21 }
 0xc84   :  { %2801 = vrot.lane.b32.xlu1 %v2508_v51, %s3736_s20 }
 0xc88   :  { %2793 = vrot.lane.b32.xlu0 %v2381_v46, %s3738_s22 }
 0xcab   :  { %v2762_v53 = vpop.f32.mrf.mxu3 }
 0xcac   :  { %2817 = vrot.lane.b32.xlu0 %v2762_v53, %s3735_s19 }
 0xcb5   :  { %v2786_v22 = vpop.permute.xlu2 %2785 }
 0xccd   :  { %v2792_v27 = vpop.permute.xlu0 %2791 }
 0xcce   :  { %v2827_v43 = vsel %vm1314_vm7, %v2825_v40, %v2792_v27 }
 0xcd5   :  { %v2800_v41 = vpop.permute.xlu1 %2799 }
 0xcd6   :  { %v2829_v3 = vsel %vm1317_vm8, %v2827_v43, %v2800_v41 }
 0xcda   :  { %v2810_v47 = vpop.permute.xlu2 %2809 }
 0xce6   :  { %v2816_v14 = vpop.permute.xlu1 %2815 }
 0xcea   :  { %v2808_v60 = vpop.permute.xlu0 %2807 }
 0xceb   :  { %v2831_v23 = vsel %vm5262_vm14, %v2829_v3, %v2808_v60 }
 0xcec   :  { %v2833_v28 = vsel %vm5263_vm13, %v2831_v23, %v2816_v14 }
 0xced   :  { %2869 = vmatmul.f32.vlgmr.msrb.gmra.mxu0 %v2833_v28 }
 0xcee   :  { %v2778_v59 = vpop.permute.xlu1 %2777 }
 0xcf2   :  { %v2770_v2 = vpop.permute.xlu0 %2769 }
 0xcf3   :  { %v2822_v24 = vsel %vm238_vm9, %v4890_v18, %v2770_v2  ;;  %v4983_v18 = vld [vmem:[%s5225_s5 + $0x8] sm:$0x3f] }
 0xcf4   :  { %v2824_v11 = vsel %vm92_vm0, %v2822_v24, %v2778_v59  ;;  %v2852_v31 = vperm.slane %v4983_v18, 2  ;;  %v2922_v7 = vperm.slane %v4983_v18, 3  ;;  %v2925_v38 = vperm.slane %v4983_v18, 4 }
 0xcf5   :  { %v2826_v4 = vsel %vm1311_vm6, %v2824_v11, %v2786_v22 }
 0xcf6   :  { %v2802_v12 = vpop.permute.xlu1 %2801 }
 0xcfa   :  { %v2794_v6 = vpop.permute.xlu0 %2793 }
 0xcfb   :  { %v2828_v5 = vsel %vm1314_vm7, %v2826_v4, %v2794_v6 }
 0xcfc   :  { %v2830_v37 = vsel %vm1317_vm8, %v2828_v5, %v2802_v12  ;;  %v3537_v5 = vld [vmem:[%s5229_s4 + $0xf8] sm:$0xff] }
 0xcfd   :  { %v2832_v15 = vsel %vm5264_vm4, %v2830_v37, %v2810_v47  ;;  %3104 = vmatpush.msra.mxu3 %v3537_v5  ;;  %v3536_v37 = vld [vmem:[%s5229_s4 + $0xf0] sm:$0xff] }
 0xcff   :  { %3105 = vmatpush.msra.mxu3 %v3536_v37 }
 0xd1e   :  { %v2818_v17 = vpop.permute.xlu0 %2817 }
 0xd1f   :  { %v2834_v35 = vsel %vm5265_vm11, %v2832_v15, %v2818_v17  ;;  %v3535_v17 = vld [vmem:[%s5229_s4 + $0xe8] sm:$0xff] }
 0xd20   :  { %2872 = vmatmul.f32.gmra.mxu0 %v2834_v35  ;;  %3106 = vmatpush.msra.mxu3 %v3535_v17  ;;  %v3534_v35 = vld [vmem:[%s5229_s4 + $0xe0] sm:$0xff] }
 0xd22   :  { %3107 = vmatpush.msra.mxu3 %v3534_v35 }
 0xd6a   :  { %v2870_v1 = vpop.f32.mrf.mxu0 }
 0xd6b   :  { %v2871_v21 = vadd.f32 %v2870_v1, %v2852_v31  ;;  %v3533_v1 = vld [vmem:[%s5229_s4 + $0xd8] sm:$0xff] }
 0xd6c   :  { %3108 = vmatpush.msra.mxu3 %v3533_v1 }
 0xd6d   :  { %v2876_v20 = vadd.f32 %v2871_v21, %v4494_v26 }
 0xd6f   :  { %v2878_v25 = vsel %vm92_vm0, %v2876_v20, 0.0 }
 0xd70   :  { %2879 = vadd.xlane.f32.xlu1 %v2878_v25 }
 0xd9d   :  { %v2873_v42 = vpop.f32.mrf.mxu0 }
 0xd9e   :  { %v2874_v36 = vadd.f32 %v2873_v42, %v2852_v31  ;;  %v3531_v42 = vld [vmem:[%s5229_s4 + $0xc8] sm:$0xff] }
 0xda0   :  { %v2877_v39 = vadd.f32 %v2874_v36, %v4503_v30  ;;  %v3513_v30 = vld [vmem:[%s5227_s3 + $0x70] sm:$0xff] }
 0xda1   :  { %2962 = vmatpush.msrb.mxu1 %v3513_v30  ;;  %v3526_v30 = vld [vmem:[%s5229_s4 + $0xa0] sm:$0xff] }
 0xda2   :  { %v2881_v62 = vsel %vm96_vm1, %v2877_v39, 0.0 }
 0xda3   :  { %2882 = vadd.xlane.f32.xlu2 %v2881_v62  ;;  %2963 = vmatpush.msrb.mxu1 %v3511_v54  ;;  %v3530_v62 = vld [vmem:[%s5229_s4 + $0xc0] sm:$0xff] }
 0xda5   :  { %2964 = vmatpush.msrb.mxu1 %v3509_v56 }
 0xda7   :  { %2965 = vmatpush.msrb.mxu1 %v3507_v33 }
 0xde3   :  { %v2880_v45 = vpop.xlane.xlu1 %2879 }
 0xde4   :  { %v2884_v51 = vmul.f32 %v2880_v45, %v3820_v10 }
 0xde6   :  { %v2886_v46 = vsub.f32 %v2876_v20, %v2884_v51  ;;  %v3532_v20 = vld [vmem:[%s5229_s4 + $0xd0] sm:$0xff] }
 0xde7   :  { %3109 = vmatpush.msra.mxu3 %v3532_v20 }
 0xde8   :  { %v2888_v34 = vmul.f32 %v2886_v46, %v2886_v46 }
 0xde9   :  { %3110 = vmatpush.msra.mxu3 %v3531_v42 }
 0xdea   :  { %v2890_v63 = vsel %vm92_vm0, %v2888_v34, 0.0 }
 0xdeb   :  { %2891 = vadd.xlane.f32.xlu0 %v2890_v63  ;;  %3111 = vmatpush.msra.mxu3 %v3530_v62 }
 0xe16   :  { %v2883_v29 = vpop.xlane.xlu2 %2882 }
 0xe17   :  { %v2885_v26 = vmul.f32 %v2883_v29, %v3820_v10  ;;  %v3528_v29 = vld [vmem:[%s5229_s4 + $0xb0] sm:$0xff] }
 0xe19   :  { %v2887_v53 = vsub.f32 %v2877_v39, %v2885_v26 }
 0xe1b   :  { %v2889_v50 = vmul.f32 %v2887_v53, %v2887_v53 }
 0xe1d   :  { %v2893_v58 = vsel %vm96_vm1, %v2889_v50, 0.0  ;;  %v3527_v50 = vld [vmem:[%s5229_s4 + $0xa8] sm:$0xff] }
 0xe1e   :  { %2894 = vadd.xlane.f32.xlu1 %v2893_v58 }
 0xe5e   :  { %v2892_v52 = vpop.xlane.xlu0 %2891 }
 0xe5f   :  { %v2896_v0 = vmul.f32 %v2892_v52, %v3820_v10  ;;  %v3523_v52 = vld [vmem:[%s5229_s4 + $0x88] sm:$0xff] }
 0xe61   :  { %v2898_v8 = vadd.f32 1e-05, %v2896_v0 }
 0xe63   :  { %3724 = vrsqrt.f32 %v2898_v8  ;;  %vm2906_vm9 = vweird.f32 %v2898_v8 }
 0xe69   :  { %v3725_v16 = vpop.eup %3724 }
 0xe6a   :  { %v2901_v9 = vmul.f32 %v3725_v16, %v2898_v8  ;;  %vm2907_vm1 = vweird.f32 %v3725_v16  ;;  %v3522_v8 = vld [vmem:[%s5229_s4 + $0x80] sm:$0xff] }
 0xe6b   :  { %vm2908_vm6 = vmor %vm2906_vm9, %vm2907_vm1 }
 0xe6c   :  { %v2902_v13 = vmul.f32 %v3725_v16, %v2901_v9 }
 0xe6e   :  { %v2903_v55 = vmul.f32 0.5, %v2902_v13 }
 0xe70   :  { %v2904_v57 = vsub.f32 1.5, %v2903_v55 }
 0xe72   :  { %v2905_v32 = vmul.f32 %v3725_v16, %v2904_v57 }
 0xe74   :  { %v2909_v27 = vsel %vm2908_vm6, %v3725_v16, %v2905_v32 }
 0xe75   :  { %v2920_v41 = vmul.f32 %v2909_v27, %v2886_v46  ;;  %v3529_v46 = vld [vmem:[%s5229_s4 + $0xb8] sm:$0xff] }
 0xe76   :  { %3112 = vmatpush.msra.mxu3 %v3529_v46 }
 0xe77   :  { %v2923_v48 = vmul.f32 %v2922_v7, %v2920_v41 }
 0xe78   :  { %3113 = vmatpush.msra.mxu3 %v3528_v29 }
 0xe79   :  { %v5021_v40 = vadd.f32 %v2925_v38, %v2923_v48 }
 0xe7a   :  { %3114 = vmatpush.msra.mxu3 %v3527_v50 }
 0xe7b   :  { %3516 = vmatmul.msk.f32.vlgmr.msrb.gmra.mxu1 %vm92_vm0, %v5021_v40  ;;  %3518 = vmatmul.msk.f32.vlgmr.msrb.gmra.mxu2 %vm92_vm0, %v5021_v40 }
 0xe7c   :  { %3115 = vmatpush.msra.mxu3 %v3526_v30 }
 0xe7e   :  { %3116 = vmatpush.msra.mxu3 %v3525_v19 }
 0xe80   :  { %3117 = vmatpush.msra.mxu3 %v3524_v44 }
 0xe82   :  { %3118 = vmatpush.msra.mxu3 %v3523_v52 }
 0xe84   :  { %3119 = vmatpush.msra.mxu3 %v3522_v8 }
 0xe91   :  { %v2895_v43 = vpop.xlane.xlu1 %2894 }
 0xe92   :  { %v2897_v3 = vmul.f32 %v2895_v43, %v3820_v10  ;;  %v5037_v10 = vld [vmem:[%s5228_s6 + $0x2] sm:$0x3] }
 0xe93   :  { %v2941_v12 = vperm.slane %v5037_v10, 1 }
 0xe94   :  { %v2899_v60 = vadd.f32 1e-05, %v2897_v3 }
 0xe96   :  { %3726 = vrsqrt.f32 %v2899_v60  ;;  %vm2916_vm12 = vweird.f32 %v2899_v60 }
 0xe9c   :  { %v3727_v14 = vpop.eup %3726 }
 0xe9d   :  { %v2911_v23 = vmul.f32 %v3727_v14, %v2899_v60  ;;  %vm2917_vm7 = vweird.f32 %v3727_v14 }
 0xe9e   :  { %vm2918_vm5 = vmor %vm2916_vm12, %vm2917_vm7 }
 0xe9f   :  { %v2912_v28 = vmul.f32 %v3727_v14, %v2911_v23 }
 0xea1   :  { %v2913_v2 = vmul.f32 0.5, %v2912_v28 }
 0xea3   :  { %v2914_v59 = vsub.f32 1.5, %v2913_v2  ;;  %v2940_v2 = vperm.slane %v5037_v10, 0 }
 0xea5   :  { %v2915_v24 = vmul.f32 %v3727_v14, %v2914_v59 }
 0xea7   :  { %v2919_v11 = vsel %vm2918_vm5, %v3727_v14, %v2915_v24 }
 0xea8   :  { %v2921_v22 = vmul.f32 %v2919_v11, %v2887_v53 }
 0xeaa   :  { %v2924_v6 = vmul.f32 %v2922_v7, %v2921_v22 }
 0xeac   :  { %v5028_v4 = vadd.f32 %v2925_v38, %v2924_v6 }
 0xeae   :  { %3517 = vmatmul.msk.f32.gmra.mxu1 %vm92_vm0, %v5028_v4  ;;  %3519 = vmatmul.msk.f32.gmra.mxu2 %vm92_vm0, %v5028_v4 }
 0xef8   :  { %v2967_v24 = vpop.f32.mrf.mxu1 }
 0xef9   :  { %v2968_v5 = vadd.f32 %v2967_v24, %v2940_v2  ;;  %v3139_v24 = vld [vmem:[%s5230_s7 + $0x50] sm:$0xff] }
 0xefe   :  { %v2990_v47 = vpop.f32.mrf.mxu2 }
 0xeff   :  { %v5051_v15 = vadd.f32 %v2990_v47, %v2941_v12 }
 0xf01   :  { %v2998_v31 = vmul.f32 0.70710677, %v5051_v15  ;;  %v2996_v11 = vmul.f32 0.5, %v5051_v15 }
 0xf03   :  { %v3000_v21 = vmul.f32 %v2998_v31, %v2998_v31 }
 0xf05   :  { %v3001_v25 = vmin.f32 %v3000_v21, 16.0 }
 0xf07   :  { %v3002_v36 = vmul.f32 2.1237322e-06, %v3001_v25  ;;  %v3013_v39 = vmul.f32 3.8918573e-05, %v3001_v25 }
 0xf09   :  { %v3003_v45 = vadd.f32 0.00028619796, %v3002_v36  ;;  %v3014_v51 = vadd.f32 0.001143296, %v3013_v39 }
 0xf0b   :  { %v3004_v34 = vmul.f32 %v3003_v45, %v3001_v25  ;;  %v3015_v63 = vmul.f32 %v3014_v51, %v3001_v25 }
 0xf0d   :  { %v3016_v26 = vadd.f32 0.014752088, %v3015_v63  ;;  %v3005_v53 = vadd.f32 0.0036580483, %v3004_v34 }
 0xf0f   :  { %v3017_v58 = vmul.f32 %v3016_v26, %v3001_v25  ;;  %v3006_v54 = vmul.f32 %v3005_v53, %v3001_v25 }
 0xf11   :  { %v3018_v49 = vadd.f32 0.112945676, %v3017_v58  ;;  %v3007_v61 = vadd.f32 0.05243302, %v3006_v54 }
 0xf13   :  { %v3019_v56 = vmul.f32 %v3018_v49, %v3001_v25  ;;  %v3008_v9 = vmul.f32 %v3007_v61, %v3001_v25 }
 0xf15   :  { %v3020_v33 = vadd.f32 0.4994258, %v3019_v56  ;;  %v3009_v13 = vadd.f32 0.18741608, %v3008_v9 }
 0xf17   :  { %v3021_v0 = vmul.f32 %v3020_v33, %v3001_v25  ;;  %v3010_v57 = vmul.f32 %v3009_v13, %v3001_v25 }
 0xf19   :  { %v3022_v16 = vadd.f32 1.0, %v3021_v0  ;;  %v3011_v41 = vadd.f32 1.1283791, %v3010_v57 }
 0xf1b   :  { %3728 = vrcp.f32 %v3022_v16  ;;  %v3034_v27 = vand.u32 2147483648, %v3022_v16  ;;  %v3032_v48 = vand.u32 2147483647, %v3022_v16  ;;  %vm3028_vm15 = vweird.f32 %v3022_v16 }
 0xf1c   :  { %v3012_v60 = vmul.f32 %v3011_v41, %v2998_v31 }
 0xf1d   :  { %v3035_v3 = vor.u32 1.1754944e-38, %v3034_v27  ;;  %vm3033_vm3 = vcmp.eq.f32.partialorder %v3032_v48, 8.507059e+37  ;;  %v3131_v48 = vld [vmem:[%s5230_s7 + $0x10] sm:$0xff] }
 0xf21   :  { %v3729_v55 = vpop.eup %3728 }
 0xf22   :  { %v3024_v32 = vmul.f32 %v3729_v55, %v3022_v16  ;;  %vm3029_vm10 = vweird.f32 %v3729_v55 }
 0xf23   :  { %vm3030_vm2 = vmor %vm3028_vm15, %vm3029_vm10 }
 0xf24   :  { %v3025_v7 = vsub.f32 1.0, %v3024_v32 }
 0xf26   :  { %v3026_v38 = vmul.f32 %v3729_v55, %v3025_v7 }
 0xf28   :  { %v3027_v43 = vadd.f32 %v3729_v55, %v3026_v38  ;;  %v3136_v38 = vld [vmem:[%s5230_s7 + $0x38] sm:$0xff] }
 0xf29   :  { %3165 = vmatpush.msra.mxu1 %v3136_v38 }
 0xf2a   :  { %v3031_v14 = vsel %vm3030_vm2, %v3729_v55, %v3027_v43  ;;  %v3135_v43 = vld [vmem:[%s5230_s7 + $0x30] sm:$0xff] }
 0xf2b   :  { %v3036_v23 = vsel %vm3033_vm3, %v3035_v3, %v3031_v14  ;;  %v2970_v55 = vpop.f32.mrf.mxu1  ;;  %v3130_v3 = vld [vmem:[%s5230_s7 + $0x8] sm:$0xff]  ;;  %3166 = vmatpush.msra.mxu1 %v3135_v43  ;;  %v3129_v14 = vld [vmem:[%s5230_s7] sm:$0xff] }
 0xf2c   :  { %v3037_v28 = vmul.f32 %v3036_v23, %v3012_v60  ;;  %v2971_v7 = vadd.f32 %v2970_v55, %v2940_v2  ;;  %v3134_v60 = vld [vmem:[%s5230_s7 + $0x28] sm:$0xff]  ;;  %v3144_v23 = vld [vmem:[%s5230_s7 + $0x78] sm:$0xff] }
 0xf2d   :  { %3167 = vmatpush.msra.mxu1 %v3134_v60  ;;  %v3140_v2 = vld [vmem:[%s5230_s7 + $0x58] sm:$0xff] }
 0xf2e   :  { %v3520_v59 = vclamps-f32 %v3037_v28, 1.0  ;;  %v3133_v28 = vld [vmem:[%s5230_s7 + $0x20] sm:$0xff] }
 0xf2f   :  { %3168 = vmatpush.msra.mxu1 %v3133_v28 }
 0xf30   :  { %v3080_v22 = vadd.f32 1.0, %v3520_v59  ;;  %v3143_v59 = vld [vmem:[%s5230_s7 + $0x70] sm:$0xff] }
 0xf31   :  { %v2993_v6 = vpop.f32.mrf.mxu2  ;;  %3210 = vmatpush.msrb.mxu1 %v3140_v2 }
 0xf32   :  { %v3082_v37 = vmul.f32 %v3080_v22, %v2996_v11  ;;  %v2994_v47 = vadd.f32 %v2993_v6, %v2941_v12  ;;  %v3132_v12 = vld [vmem:[%s5230_s7 + $0x18] sm:$0xff]  ;;  %v3142_v11 = vld [vmem:[%s5230_s7 + $0x68] sm:$0xff]  ;;  %v3141_v6 = vld [vmem:[%s5230_s7 + $0x60] sm:$0xff] }
 0xf33   :  { %3187 = vmatpush.msra.mxu2 %v3132_v12  ;;  %v3138_v22 = vld [vmem:[%s5230_s7 + $0x48] sm:$0xff]  ;;  %3211 = vmatpush.msrb.mxu1 %v3139_v24  ;;  %v3272_v12 = vld [vmem:[%s5233_s9] sm:$0xff] }
 0xf34   :  { %v3084_v17 = vmul.f32 %v3082_v37, %v2968_v5  ;;  %v2999_v35 = vmul.f32 0.70710677, %v2994_v47  ;;  %v2997_v57 = vmul.f32 0.5, %v2994_v47  ;;  %v3137_v5 = vld [vmem:[%s5230_s7 + $0x40] sm:$0xff]  ;;  %v3148_v37 = vld [vmem:[%s5230_s7 + $0x98] sm:$0xff]  ;;  %v3103_v47 = vperm.slane %v4983_v18, 5 }
 0xf35   :  { %3188 = vmatpush.msra.mxu2 %v3131_v48  ;;  %3212 = vmatpush.msrb.mxu1 %v3138_v22  ;;  %v3146_v18 = vld [vmem:[%s5230_s7 + $0x88] sm:$0xff] }
 0xf36   :  { %v3040_v31 = vmul.f32 %v2999_v35, %v2999_v35  ;;  %3120 = vmatmul.f32.vlgmr.msra.gmra.mxu3 %v3084_v17  ;;  %3258 = vmatpush.msra.mxu0 %v3148_v37 }
 0xf37   :  { %3189 = vmatpush.msra.mxu2 %v3130_v3  ;;  %3213 = vmatpush.msrb.mxu1 %v3137_v5 }
 0xf38   :  { %v3041_v1 = vmin.f32 %v3040_v31, 16.0 }
 0xf39   :  { %3190 = vmatpush.msra.mxu2 %v3129_v14 }
 0xf3a   :  { %v3042_v21 = vmul.f32 2.1237322e-06, %v3041_v1  ;;  %v3053_v20 = vmul.f32 3.8918573e-05, %v3041_v1 }
 0xf3b   :  { %3234 = vmatpush.msrb.mxu2 %v3144_v23 }
 0xf3c   :  { %v3043_v25 = vadd.f32 0.00028619796, %v3042_v21  ;;  %v3054_v42 = vadd.f32 0.001143296, %v3053_v20 }
 0xf3d   :  { %3235 = vmatpush.msrb.mxu2 %v3143_v59 }
 0xf3e   :  { %v3044_v36 = vmul.f32 %v3043_v25, %v3041_v1  ;;  %v3055_v39 = vmul.f32 %v3054_v42, %v3041_v1  ;;  %v3147_v25 = vld [vmem:[%s5230_s7 + $0x90] sm:$0xff] }
 0xf3f   :  { %3236 = vmatpush.msrb.mxu2 %v3142_v11  ;;  %3259 = vmatpush.msra.mxu0 %v3147_v25 }
 0xf40   :  { %v3056_v62 = vadd.f32 0.014752088, %v3055_v39  ;;  %v3045_v15 = vadd.f32 0.0036580483, %v3044_v36 }
 0xf41   :  { %3237 = vmatpush.msrb.mxu2 %v3141_v6  ;;  %3260 = vmatpush.msra.mxu0 %v3146_v18 }
 0xf42   :  { %v3057_v45 = vmul.f32 %v3056_v62, %v3041_v1  ;;  %v3046_v46 = vmul.f32 %v3045_v15, %v3041_v1  ;;  %v3281_v62 = vld [vmem:[%s5233_s9 + $0x48] sm:$0xff]  ;;  %v3280_v15 = vld [vmem:[%s5233_s9 + $0x40] sm:$0xff] }
 0xf43   :  { %3295 = vmatpush.msrb.mxu3 %v3281_v62 }
 0xf44   :  { %v3058_v51 = vadd.f32 0.112945676, %v3057_v45  ;;  %v3047_v10 = vadd.f32 0.05243302, %v3046_v46  ;;  %v3279_v45 = vld [vmem:[%s5233_s9 + $0x38] sm:$0xff]  ;;  %v3276_v46 = vld [vmem:[%s5233_s9 + $0x20] sm:$0xff] }
 0xf45   :  { %3296 = vmatpush.msrb.mxu3 %v3280_v15 }
 0xf46   :  { %v3059_v34 = vmul.f32 %v3058_v51, %v3041_v1  ;;  %v3048_v53 = vmul.f32 %v3047_v10, %v3041_v1  ;;  %v3277_v51 = vld [vmem:[%s5233_s9 + $0x28] sm:$0xff] }
 0xf47   :  { %3297 = vmatpush.msrb.mxu3 %v3279_v45  ;;  %v3273_v10 = vld [vmem:[%s5233_s9 + $0x8] sm:$0xff] }
 0xf48   :  { %v3060_v63 = vadd.f32 0.4994258, %v3059_v34  ;;  %v3049_v50 = vadd.f32 0.18741608, %v3048_v53  ;;  %v3275_v34 = vld [vmem:[%s5233_s9 + $0x18] sm:$0xff]  ;;  %v3311_v53 = vld [vmem:[%s5234_s11 + $0x10] sm:$0xff] }
 0xf4a   :  { %v3061_v29 = vmul.f32 %v3060_v63, %v3041_v1  ;;  %v3050_v30 = vmul.f32 %v3049_v50, %v3041_v1  ;;  %v3274_v63 = vld [vmem:[%s5233_s9 + $0x10] sm:$0xff] }
 0xf4c   :  { %v3062_v26 = vadd.f32 1.0, %v3061_v29  ;;  %v3051_v56 = vadd.f32 1.1283791, %v3050_v30  ;;  %v3313_v29 = vld [vmem:[%s5234_s11 + $0x20] sm:$0xff] }
 0xf4e   :  { %3730 = vrcp.f32 %v3062_v26  ;;  %v3074_v19 = vand.u32 2147483648, %v3062_v26  ;;  %v3072_v33 = vand.u32 2147483647, %v3062_v26  ;;  %vm3068_vm13 = vweird.f32 %v3062_v26 }
 0xf4f   :  { %v3052_v0 = vmul.f32 %v3051_v56, %v2999_v35 }
 0xf50   :  { %v3075_v52 = vor.u32 1.1754944e-38, %v3074_v19  ;;  %vm3073_vm11 = vcmp.eq.f32.partialorder %v3072_v33, 8.507059e+37 }
 0xf54   :  { %v3731_v58 = vpop.eup %3730 }
 0xf55   :  { %v3064_v49 = vmul.f32 %v3731_v58, %v3062_v26  ;;  %vm3069_vm14 = vweird.f32 %v3731_v58  ;;  %v3312_v26 = vld [vmem:[%s5234_s11 + $0x18] sm:$0xff] }
 0xf56   :  { %vm3070_vm4 = vmor %vm3068_vm13, %vm3069_vm14 }
 0xf57   :  { %v3065_v54 = vsub.f32 1.0, %v3064_v49 }
 0xf59   :  { %v3066_v44 = vmul.f32 %v3731_v58, %v3065_v54 }
 0xf5b   :  { %v3067_v61 = vadd.f32 %v3731_v58, %v3066_v44  ;;  %v3575_v44 = vld [vmem:[%s5231_s8] ss:$0 sm:$0xff] }
 0xf5d   :  { %v3071_v8 = vsel %vm3070_vm4, %v3731_v58, %v3067_v61 }
 0xf5e   :  { %v3076_v16 = vsel %vm3073_vm11, %v3075_v52, %v3071_v8  ;;  %v3309_v8 = vld [vmem:[%s5234_s11] sm:$0xff] }
 0xf5f   :  { %v3077_v9 = vmul.f32 %v3076_v16, %v3052_v0  ;;  %v3310_v0 = vld [vmem:[%s5234_s11 + $0x8] sm:$0xff]  ;;  %v18_v16 = vstv %s5235_s12 }
 0xf60   :  { %19 = vst [vmem:[#allocation2] sm:$0x1] %v18_v16 }
 0xf61   :  { %v3521_v13 = vclamps-f32 %v3077_v9, 1.0  ;;  %v3576_v9 = vld [vmem:[%s5232_s10] ss:$0 sm:$0xff] }
 0xf63   :  { %v3081_v32 = vadd.f32 1.0, %v3521_v13 }
 0xf65   :  { %v3083_v27 = vmul.f32 %v3081_v32, %v2997_v57 }
 0xf67   :  { %v3085_v41 = vmul.f32 %v3083_v27, %v2971_v7  ;;  %v3577_v57 = vld [vmem:[#allocation2] ss:$0 sm:$0xff] }
 0xf69   :  { %3123 = vmatmul.f32.gmra.mxu3 %v3085_v41 }
 0xfb9   :  { %v3121_v17 = vpop.f32.mrf.mxu3 }
 0xfba   :  { %v3122_v35 = vadd.f32 %v3121_v17, %v3103_v47 }
 0xfbc   :  { %v3127_v31 = vadd.f32 %v3122_v35, %v5021_v40  ;;  %v3145_v40 = vld [vmem:[%s5230_s7 + $0x80] sm:$0xff] }
 0xfbd   :  { %3261 = vmatpush.msra.mxu0 %v3145_v40 }
 0xfbe   :  { %v3150_v1 = vrot.slane %v3127_v31, 2  ;;  %3539 = vmatmul.msk.f32.vlgmr.msra.gmra.mxu2 %vm92_vm0, %v3127_v31  ;;  %v3219_v21 = vrot.slane %v3127_v31, 6  ;;  %v3195_v20 = vrot.slane %v3127_v31, 4 }
 0xfc0   :  { %3538 = vmatmul.msk.f32.vlgmr.msra.gmra.mxu1 %vm92_vm0, %v3150_v1 }
 0xfc1   :  { %3333 = vmatpush.msra.mxu1 %v3313_v29 }
 0xfc3   :  { %3334 = vmatpush.msra.mxu1 %v3312_v26 }
 0xfc5   :  { %3335 = vmatpush.msra.mxu1 %v3311_v53 }
 0xfc6   :  { %3541 = vmatmul.msk.f32.vlgmr.msrb.gmra.mxu2 %vm92_vm0, %v3219_v21 }
 0xfc7   :  { %3336 = vmatpush.msra.mxu1 %v3310_v0 }
 0xfc8   :  { %3540 = vmatmul.msk.f32.vlgmr.msrb.gmra.mxu1 %vm92_vm0, %v3195_v20 }
 0xfc9   :  { %3337 = vmatpush.msra.mxu1 %v3309_v8 }
 0xfec   :  { %v3124_v42 = vpop.f32.mrf.mxu3 }
 0xfed   :  { %v3125_v36 = vadd.f32 %v3124_v42, %v3103_v47 }
 0xfef   :  { %v3128_v39 = vadd.f32 %v3125_v36, %v5028_v4  ;;  %v3278_v4 = vld [vmem:[%s5233_s9 + $0x30] sm:$0xff] }
 0xff0   :  { %3298 = vmatpush.msrb.mxu3 %v3278_v4 }
 0xff1   :  { %3542 = vmatmul.msk.f32.vlgmr.msra.gmra.mxu0 %vm92_vm0, %v3128_v39  ;;  %vm3318_vm0 = vcmask 326656  }
 0xff2   :  { %3299 = vmatpush.msrb.mxu3 %v3277_v51 }
 0xff4   :  { %3300 = vmatpush.msrb.mxu3 %v3276_v46 }
 0xff6   :  { %3301 = vmatpush.msrb.mxu3 %v3275_v34 }
 0xff8   :  { %3302 = vmatpush.msrb.mxu3 %v3274_v63 }
 0xffa   :  { %3303 = vmatpush.msrb.mxu3 %v3273_v10 }
 0xffc   :  { %3304 = vmatpush.msrb.mxu3 %v3272_v12 }
0x103d   :  { %v3170_v50 = vpop.f32.mrf.mxu1 }
0x1041   :  { %v3192_v58 = vpop.f32.mrf.mxu2 }
0x1042   :  { %v3193_v49 = vadd.f32 %v3192_v58, %v3170_v50 }
0x1045   :  { %v3215_v30 = vpop.f32.mrf.mxu1 }
0x1046   :  { %v3218_v19 = vadd.f32 %v3215_v30, %v3193_v49 }
0x1049   :  { %v3239_v54 = vpop.f32.mrf.mxu2 }
0x104a   :  { %v3242_v56 = vadd.f32 %v3239_v54, %v3218_v19 }
0x106e   :  { %v3263_v33 = vpop.f32.mrf.mxu0 }
0x106f   :  { %v3266_v61 = vadd.f32 %v3263_v33, %v3242_v56 }
0x1071   :  { %v3271_v52 = vadd.f32 %v3575_v44, %v3266_v61 }
0x1073   :  { %3543 = vmatmul.msk.f32.vlgmr.msrb.gmra.mxu3 %vm1317_vm8, %v3271_v52  ;;  %vm3342_vm8 = vcmask 1024  }
0x10f6   :  { %v3306_v13 = vpop.f32.mrf.mxu3 }
0x10f7   :  { %v3307_v55 = vadd.f32 %v3576_v9, %v3306_v13 }
0x10f9   :  { %3544 = vmatmul.msk.f32.vlgmr.msra.gmra.mxu1 %vm3318_vm0, %v3307_v55 }
0x1176   :  { %v3339_v32 = vpop.f32.mrf.mxu1 }
0x1177   :  { %v3340_v7 = vadd.f32 %v3577_v57, %v3339_v32 }
0x1179   :  { %3343 = vst.msk [vmem:[%s5236_s13] sm:$0x3] %vm3342_vm8, %v3340_v7 }

</bundles_post_ra>
